<compile_context>
chip_gen: v7x
topology: tpu7x:2x2x1
jax: 0.10.0
libtpu: 0.0.40
codegen_flags: <defaults>
</compile_context>

<pallas_src>
import jax
import jax.numpy as jnp
from jax import lax
from jax.experimental import pallas as pl
from jax.experimental.pallas import tpu as pltpu

BN_EPS = 1e-5
IN_HW = 8                                # module assumes 8x8 input
POOL_K, POOL_S = 5, 3
POOL_O = (IN_HW - POOL_K) // POOL_S + 1  # = 2
NPOS = POOL_O * POOL_O                   # = 4 pooled spatial positions
C_MID = 128
C_FEAT = 768
INV_POOL = 1.0 / (POOL_K * POOL_K)


def aux_head_kernel(x_ref, w1_ref, g1_ref, b1_ref, w2_ref, g2_ref, b2_ref,
                    wc_ref, bc_ref, o_ref):
    n = o_ref.shape[0]          # static batch size
    c_in = x_ref.shape[2]       # static input channels

    # --- ReLU once (bf16, small temp) --------------------------------------
    x = jnp.maximum(x_ref[...], 0.0)                       # (H*W, N, C) bf16

    # --- AvgPool2d(5, stride=3) + Conv2d(C, 128, 1) per pooled position ----
    # Pooling = 25 static-slice adds per position (cheap VPU work, no MXU,
    # no O(N^2) pool matrix); accumulation in f32, then a bf16 MXU matmul.
    y1_blocks = []
    for oh in range(POOL_O):
        for ow in range(POOL_O):
            acc = jnp.zeros((n, c_in), jnp.float32)
            for kh in range(POOL_K):
                for kw in range(POOL_K):
                    idx = (oh * POOL_S + kh) * IN_HW + (ow * POOL_S + kw)
                    acc = acc + x[idx].astype(jnp.float32)          # (N, C)
            pooled = (acc * INV_POOL).astype(jnp.bfloat16)          # (N, C)
            y1_blocks.append(
                jnp.dot(pooled, w1_ref[...],
                        preferred_element_type=jnp.float32))        # (N, 128)

    # --- BatchNorm2d(128) over all 4N rows (training-mode batch stats) -----
    # Two-pass variance in f32 (avoids E[y^2]-mean^2 cancellation).
    cnt1 = float(NPOS * n)
    mean1 = sum(jnp.sum(b, axis=0, keepdims=True) for b in y1_blocks) / cnt1
    var1 = sum(jnp.sum((b - mean1) ** 2, axis=0, keepdims=True)
               for b in y1_blocks) / cnt1
    inv1 = lax.rsqrt(var1 + BN_EPS)
    z1_blocks = [
        jnp.maximum((b - mean1) * inv1 * g1_ref[...] + b1_ref[...], 0.0)
        .astype(jnp.bfloat16)
        for b in y1_blocks
    ]

    # --- Conv2d(128, 768, 2) fused into ONE K=512 matmul -------------------
    # Lane-concat of four 128-lane-aligned blocks in position order p=oh*2+ow;
    # w2 is pre-stacked wrapper-side as (512, 768) with the same row order.
    z1_cat = jnp.concatenate(z1_blocks, axis=1)                      # (N, 512)
    y2 = jnp.dot(z1_cat, w2_ref[...],
                 preferred_element_type=jnp.float32)                 # (N, 768)

    # --- BatchNorm2d(768) + ReLU (two-pass, f32) ----------------------------
    mean2 = jnp.mean(y2, axis=0, keepdims=True)
    var2 = jnp.mean((y2 - mean2) ** 2, axis=0, keepdims=True)
    z2 = jnp.maximum((y2 - mean2) * lax.rsqrt(var2 + BN_EPS) * g2_ref[...]
                     + b2_ref[...], 0.0)                             # (N, 768)

    # --- Linear(768, num_classes) -- class dim padded to 128 lanes ----------
    logits = jnp.dot(z2.astype(jnp.bfloat16), wc_ref[...],
                     preferred_element_type=jnp.float32) + bc_ref[...]
    o_ref[...] = logits.astype(o_ref.dtype)


def init_params(key, C, num_classes):
    """Deterministic init.  Conv weights stored pre-transposed / pre-stacked
    for channels-last matmuls, in bf16 (MXU operands); BN affine params match
    PyTorch defaults (gamma=1, beta=0).  Classifier padded to a 128-lane-dense
    class dimension (zero-padded columns)."""
    k1, k2, k3 = jax.random.split(key, 3)
    cls_pad = max(128, -(-num_classes // 128) * 128)
    # w1[c_in, c_out]            == torch conv1 weight[c_out, c_in, 0, 0]
    # w2[p*128 + c_in, c_out]    == torch conv2 weight[c_out, c_in, kh, kw], p = kh*2+kw
    # wc[c_in, cls] / bc[1, cls] == torch Linear weight.T / bias  (zero-padded)
    w1 = (0.05 * jax.random.normal(k1, (C, C_MID), jnp.float32)).astype(jnp.bfloat16)
    w2 = (0.05 * jax.random.normal(k2, (NPOS, C_MID, C_FEAT), jnp.float32)
          ).reshape(NPOS * C_MID, C_FEAT).astype(jnp.bfloat16)
    wc = 0.05 * jax.random.normal(k3, (C_FEAT, num_classes), jnp.float32)
    wc = jnp.pad(wc, ((0, 0), (0, cls_pad - num_classes))).astype(jnp.bfloat16)
    return {
        "w1": w1,
        "g1": jnp.ones((1, C_MID), jnp.float32),
        "b1": jnp.zeros((1, C_MID), jnp.float32),
        "w2": w2,
        "g2": jnp.ones((1, C_FEAT), jnp.float32),
        "b2": jnp.zeros((1, C_FEAT), jnp.float32),
        "wc": wc,
        "bc": jnp.zeros((1, cls_pad), jnp.float32),
    }


def auxiliary_head_forward(x_nchw, params, num_classes):
    N, C, H, W = x_nchw.shape
    assert H == IN_HW and W == IN_HW, "AuxiliaryHeadCIFAR assumes 8x8 input"
    cls_pad = params["bc"].shape[1]

    # NCHW -> (H*W, N, C): spatial-major, channels-last.  Done exactly once,
    # cast to bf16 (halves the only nontrivial HBM->VMEM DMA).  With this
    # layout every pooling tap in the kernel is a contiguous static (N, C)
    # slab along the leading axis -- no strided loads, no reshapes.
    x3d = jnp.transpose(x_nchw, (2, 3, 0, 1)).reshape(H * W, N, C).astype(jnp.bfloat16)

    operands = (x3d,
                params["w1"], params["g1"], params["b1"],
                params["w2"], params["g2"], params["b2"],
                params["wc"], params["bc"])

    def full(shape):
        nd = len(shape)
        return pl.BlockSpec(tuple(shape), lambda i, _nd=nd: (0,) * _nd)

    out = pl.pallas_call(
        aux_head_kernel,
        out_shape=jax.ShapeDtypeStruct((N, cls_pad), jnp.float32),
        grid=(1,),
        in_specs=[full(op.shape) for op in operands],
        out_specs=full((N, cls_pad)),
        compiler_params=pltpu.CompilerParams(dimension_semantics=("arbitrary",)),
    )(*operands)
    return out[:, :num_classes]


if __name__ == "__main__":
    N, C, num_classes = 2, 128, 10          # small, lane-friendly example shapes
    key = jax.random.PRNGKey(0)
    kx, kp = jax.random.split(key)
    x = jax.random.normal(kx, (N, C, IN_HW, IN_HW), jnp.float32)
    params = init_params(kp, C, num_classes)

    out = auxiliary_head_forward(x, params, num_classes)
    out = jax.block_until_ready(out)
    assert out.shape == (N, num_classes), out.shape
    assert bool(jnp.all(jnp.isfinite(out)))
    print("KERNEL_OK")
</pallas_src>

<mosaic_0001>
module attributes {stable_mosaic.version = 11 : i64} {
  func.func @aux_head_kernel(%arg0: i32, %arg1: memref<64x2x128xbf16, #tpu.memory_space<vmem>>, %arg2: memref<128x128xbf16, #tpu.memory_space<vmem>>, %arg3: memref<1x128xf32, #tpu.memory_space<vmem>>, %arg4: memref<1x128xf32, #tpu.memory_space<vmem>>, %arg5: memref<512x768xbf16, #tpu.memory_space<vmem>>, %arg6: memref<1x768xf32, #tpu.memory_space<vmem>>, %arg7: memref<1x768xf32, #tpu.memory_space<vmem>>, %arg8: memref<768x128xbf16, #tpu.memory_space<vmem>>, %arg9: memref<1x128xf32, #tpu.memory_space<vmem>>, %arg10: memref<2x128xf32, #tpu.memory_space<vmem>>) attributes {dimension_semantics = [#tpu.dimension_semantics<arbitrary>], iteration_bounds = array<i64: 1>, scalar_prefetch = 0 : i64, scratch_operands = 0 : i64, tpu.core_type = #tpu.core_type<tc>, window_params = [{pipeline_mode = #tpu.pipeline_mode<synchronous>, transform_indices = @transform_0, window_bounds = array<i64: 64, 2, 128>}, {pipeline_mode = #tpu.pipeline_mode<synchronous>, transform_indices = @transform_1, window_bounds = array<i64: 128, 128>}, {pipeline_mode = #tpu.pipeline_mode<synchronous>, transform_indices = @transform_2, window_bounds = array<i64: 1, 128>}, {pipeline_mode = #tpu.pipeline_mode<synchronous>, transform_indices = @transform_3, window_bounds = array<i64: 1, 128>}, {pipeline_mode = #tpu.pipeline_mode<synchronous>, transform_indices = @transform_4, window_bounds = array<i64: 512, 768>}, {pipeline_mode = #tpu.pipeline_mode<synchronous>, transform_indices = @transform_5, window_bounds = array<i64: 1, 768>}, {pipeline_mode = #tpu.pipeline_mode<synchronous>, transform_indices = @transform_6, window_bounds = array<i64: 1, 768>}, {pipeline_mode = #tpu.pipeline_mode<synchronous>, transform_indices = @transform_7, window_bounds = array<i64: 768, 128>}, {pipeline_mode = #tpu.pipeline_mode<synchronous>, transform_indices = @transform_8, window_bounds = array<i64: 1, 128>}, {pipeline_mode = #tpu.pipeline_mode<synchronous>, transform_indices = @transform_9, window_bounds = array<i64: 2, 128>}]} {
    %c0 = arith.constant 0 : index
    %c0_0 = arith.constant 0 : index
    %c0_1 = arith.constant 0 : index
    %0 = vector.load %arg1[%c0, %c0_0, %c0_1] : memref<64x2x128xbf16, #tpu.memory_space<vmem>>, vector<64x2x128xbf16>
    %cst = arith.constant 0.000000e+00 : bf16
    %1 = vector.broadcast %cst : bf16 to vector<64x2x128xbf16>
    %2 = arith.maximumf %0, %1 : vector<64x2x128xbf16>
    %cst_2 = arith.constant 0.000000e+00 : f32
    %3 = vector.broadcast %cst_2 : f32 to vector<2x128xf32>
    %4 = vector.extract_strided_slice %2 {offsets = [0, 0, 0], sizes = [1, 2, 128], strides = [1, 1, 1]} : vector<64x2x128xbf16> to vector<1x2x128xbf16>
    %5 = vector.shape_cast %4 : vector<1x2x128xbf16> to vector<2x128xbf16>
    %6 = arith.extf %5 : vector<2x128xbf16> to vector<2x128xf32>
    %7 = arith.addf %3, %6 : vector<2x128xf32>
    %8 = vector.extract_strided_slice %2 {offsets = [1, 0, 0], sizes = [1, 2, 128], strides = [1, 1, 1]} : vector<64x2x128xbf16> to vector<1x2x128xbf16>
    %9 = vector.shape_cast %8 : vector<1x2x128xbf16> to vector<2x128xbf16>
    %10 = arith.extf %9 : vector<2x128xbf16> to vector<2x128xf32>
    %11 = arith.addf %7, %10 : vector<2x128xf32>
    %12 = vector.extract_strided_slice %2 {offsets = [2, 0, 0], sizes = [1, 2, 128], strides = [1, 1, 1]} : vector<64x2x128xbf16> to vector<1x2x128xbf16>
    %13 = vector.shape_cast %12 : vector<1x2x128xbf16> to vector<2x128xbf16>
    %14 = arith.extf %13 : vector<2x128xbf16> to vector<2x128xf32>
    %15 = arith.addf %11, %14 : vector<2x128xf32>
    %16 = vector.extract_strided_slice %2 {offsets = [3, 0, 0], sizes = [1, 2, 128], strides = [1, 1, 1]} : vector<64x2x128xbf16> to vector<1x2x128xbf16>
    %17 = vector.shape_cast %16 : vector<1x2x128xbf16> to vector<2x128xbf16>
    %18 = arith.extf %17 : vector<2x128xbf16> to vector<2x128xf32>
    %19 = arith.addf %15, %18 : vector<2x128xf32>
    %20 = vector.extract_strided_slice %2 {offsets = [4, 0, 0], sizes = [1, 2, 128], strides = [1, 1, 1]} : vector<64x2x128xbf16> to vector<1x2x128xbf16>
    %21 = vector.shape_cast %20 : vector<1x2x128xbf16> to vector<2x128xbf16>
    %22 = arith.extf %21 : vector<2x128xbf16> to vector<2x128xf32>
    %23 = arith.addf %19, %22 : vector<2x128xf32>
    %24 = vector.extract_strided_slice %2 {offsets = [8, 0, 0], sizes = [1, 2, 128], strides = [1, 1, 1]} : vector<64x2x128xbf16> to vector<1x2x128xbf16>
    %25 = vector.shape_cast %24 : vector<1x2x128xbf16> to vector<2x128xbf16>
    %26 = arith.extf %25 : vector<2x128xbf16> to vector<2x128xf32>
    %27 = arith.addf %23, %26 : vector<2x128xf32>
    %28 = vector.extract_strided_slice %2 {offsets = [9, 0, 0], sizes = [1, 2, 128], strides = [1, 1, 1]} : vector<64x2x128xbf16> to vector<1x2x128xbf16>
    %29 = vector.shape_cast %28 : vector<1x2x128xbf16> to vector<2x128xbf16>
    %30 = arith.extf %29 : vector<2x128xbf16> to vector<2x128xf32>
    %31 = arith.addf %27, %30 : vector<2x128xf32>
    %32 = vector.extract_strided_slice %2 {offsets = [10, 0, 0], sizes = [1, 2, 128], strides = [1, 1, 1]} : vector<64x2x128xbf16> to vector<1x2x128xbf16>
    %33 = vector.shape_cast %32 : vector<1x2x128xbf16> to vector<2x128xbf16>
    %34 = arith.extf %33 : vector<2x128xbf16> to vector<2x128xf32>
    %35 = arith.addf %31, %34 : vector<2x128xf32>
    %36 = vector.extract_strided_slice %2 {offsets = [11, 0, 0], sizes = [1, 2, 128], strides = [1, 1, 1]} : vector<64x2x128xbf16> to vector<1x2x128xbf16>
    %37 = vector.shape_cast %36 : vector<1x2x128xbf16> to vector<2x128xbf16>
    %38 = arith.extf %37 : vector<2x128xbf16> to vector<2x128xf32>
    %39 = arith.addf %35, %38 : vector<2x128xf32>
    %40 = vector.extract_strided_slice %2 {offsets = [12, 0, 0], sizes = [1, 2, 128], strides = [1, 1, 1]} : vector<64x2x128xbf16> to vector<1x2x128xbf16>
    %41 = vector.shape_cast %40 : vector<1x2x128xbf16> to vector<2x128xbf16>
    %42 = arith.extf %41 : vector<2x128xbf16> to vector<2x128xf32>
    %43 = arith.addf %39, %42 : vector<2x128xf32>
    %44 = vector.extract_strided_slice %2 {offsets = [16, 0, 0], sizes = [1, 2, 128], strides = [1, 1, 1]} : vector<64x2x128xbf16> to vector<1x2x128xbf16>
    %45 = vector.shape_cast %44 : vector<1x2x128xbf16> to vector<2x128xbf16>
    %46 = arith.extf %45 : vector<2x128xbf16> to vector<2x128xf32>
    %47 = arith.addf %43, %46 : vector<2x128xf32>
    %48 = vector.extract_strided_slice %2 {offsets = [17, 0, 0], sizes = [1, 2, 128], strides = [1, 1, 1]} : vector<64x2x128xbf16> to vector<1x2x128xbf16>
    %49 = vector.shape_cast %48 : vector<1x2x128xbf16> to vector<2x128xbf16>
    %50 = arith.extf %49 : vector<2x128xbf16> to vector<2x128xf32>
    %51 = arith.addf %47, %50 : vector<2x128xf32>
    %52 = vector.extract_strided_slice %2 {offsets = [18, 0, 0], sizes = [1, 2, 128], strides = [1, 1, 1]} : vector<64x2x128xbf16> to vector<1x2x128xbf16>
    %53 = vector.shape_cast %52 : vector<1x2x128xbf16> to vector<2x128xbf16>
    %54 = arith.extf %53 : vector<2x128xbf16> to vector<2x128xf32>
    %55 = arith.addf %51, %54 : vector<2x128xf32>
    %56 = vector.extract_strided_slice %2 {offsets = [19, 0, 0], sizes = [1, 2, 128], strides = [1, 1, 1]} : vector<64x2x128xbf16> to vector<1x2x128xbf16>
    %57 = vector.shape_cast %56 : vector<1x2x128xbf16> to vector<2x128xbf16>
    %58 = arith.extf %57 : vector<2x128xbf16> to vector<2x128xf32>
    %59 = arith.addf %55, %58 : vector<2x128xf32>
    %60 = vector.extract_strided_slice %2 {offsets = [20, 0, 0], sizes = [1, 2, 128], strides = [1, 1, 1]} : vector<64x2x128xbf16> to vector<1x2x128xbf16>
    %61 = vector.shape_cast %60 : vector<1x2x128xbf16> to vector<2x128xbf16>
    %62 = arith.extf %61 : vector<2x128xbf16> to vector<2x128xf32>
    %63 = arith.addf %59, %62 : vector<2x128xf32>
    %64 = vector.extract_strided_slice %2 {offsets = [24, 0, 0], sizes = [1, 2, 128], strides = [1, 1, 1]} : vector<64x2x128xbf16> to vector<1x2x128xbf16>
    %65 = vector.shape_cast %64 : vector<1x2x128xbf16> to vector<2x128xbf16>
    %66 = arith.extf %65 : vector<2x128xbf16> to vector<2x128xf32>
    %67 = arith.addf %63, %66 : vector<2x128xf32>
    %68 = vector.extract_strided_slice %2 {offsets = [25, 0, 0], sizes = [1, 2, 128], strides = [1, 1, 1]} : vector<64x2x128xbf16> to vector<1x2x128xbf16>
    %69 = vector.shape_cast %68 : vector<1x2x128xbf16> to vector<2x128xbf16>
    %70 = arith.extf %69 : vector<2x128xbf16> to vector<2x128xf32>
    %71 = arith.addf %67, %70 : vector<2x128xf32>
    %72 = vector.extract_strided_slice %2 {offsets = [26, 0, 0], sizes = [1, 2, 128], strides = [1, 1, 1]} : vector<64x2x128xbf16> to vector<1x2x128xbf16>
    %73 = vector.shape_cast %72 : vector<1x2x128xbf16> to vector<2x128xbf16>
    %74 = arith.extf %73 : vector<2x128xbf16> to vector<2x128xf32>
    %75 = arith.addf %71, %74 : vector<2x128xf32>
    %76 = vector.extract_strided_slice %2 {offsets = [27, 0, 0], sizes = [1, 2, 128], strides = [1, 1, 1]} : vector<64x2x128xbf16> to vector<1x2x128xbf16>
    %77 = vector.shape_cast %76 : vector<1x2x128xbf16> to vector<2x128xbf16>
    %78 = arith.extf %77 : vector<2x128xbf16> to vector<2x128xf32>
    %79 = arith.addf %75, %78 : vector<2x128xf32>
    %80 = vector.extract_strided_slice %2 {offsets = [28, 0, 0], sizes = [1, 2, 128], strides = [1, 1, 1]} : vector<64x2x128xbf16> to vector<1x2x128xbf16>
    %81 = vector.shape_cast %80 : vector<1x2x128xbf16> to vector<2x128xbf16>
    %82 = arith.extf %81 : vector<2x128xbf16> to vector<2x128xf32>
    %83 = arith.addf %79, %82 : vector<2x128xf32>
    %84 = vector.extract_strided_slice %2 {offsets = [32, 0, 0], sizes = [1, 2, 128], strides = [1, 1, 1]} : vector<64x2x128xbf16> to vector<1x2x128xbf16>
    %85 = vector.shape_cast %84 : vector<1x2x128xbf16> to vector<2x128xbf16>
    %86 = arith.extf %85 : vector<2x128xbf16> to vector<2x128xf32>
    %87 = arith.addf %83, %86 : vector<2x128xf32>
    %88 = vector.extract_strided_slice %2 {offsets = [33, 0, 0], sizes = [1, 2, 128], strides = [1, 1, 1]} : vector<64x2x128xbf16> to vector<1x2x128xbf16>
    %89 = vector.shape_cast %88 : vector<1x2x128xbf16> to vector<2x128xbf16>
    %90 = arith.extf %89 : vector<2x128xbf16> to vector<2x128xf32>
    %91 = arith.addf %87, %90 : vector<2x128xf32>
    %92 = vector.extract_strided_slice %2 {offsets = [34, 0, 0], sizes = [1, 2, 128], strides = [1, 1, 1]} : vector<64x2x128xbf16> to vector<1x2x128xbf16>
    %93 = vector.shape_cast %92 : vector<1x2x128xbf16> to vector<2x128xbf16>
    %94 = arith.extf %93 : vector<2x128xbf16> to vector<2x128xf32>
    %95 = arith.addf %91, %94 : vector<2x128xf32>
    %96 = vector.extract_strided_slice %2 {offsets = [35, 0, 0], sizes = [1, 2, 128], strides = [1, 1, 1]} : vector<64x2x128xbf16> to vector<1x2x128xbf16>
    %97 = vector.shape_cast %96 : vector<1x2x128xbf16> to vector<2x128xbf16>
    %98 = arith.extf %97 : vector<2x128xbf16> to vector<2x128xf32>
    %99 = arith.addf %95, %98 : vector<2x128xf32>
    %100 = vector.extract_strided_slice %2 {offsets = [36, 0, 0], sizes = [1, 2, 128], strides = [1, 1, 1]} : vector<64x2x128xbf16> to vector<1x2x128xbf16>
    %101 = vector.shape_cast %100 : vector<1x2x128xbf16> to vector<2x128xbf16>
    %102 = arith.extf %101 : vector<2x128xbf16> to vector<2x128xf32>
    %103 = arith.addf %99, %102 : vector<2x128xf32>
    %cst_3 = arith.constant 4.000000e-02 : f32
    %104 = vector.broadcast %cst_3 : f32 to vector<2x128xf32>
    %105 = arith.mulf %103, %104 : vector<2x128xf32>
    %106 = arith.truncf %105 : vector<2x128xf32> to vector<2x128xbf16>
    %c0_4 = arith.constant 0 : index
    %c0_5 = arith.constant 0 : index
    %107 = vector.load %arg2[%c0_4, %c0_5] : memref<128x128xbf16, #tpu.memory_space<vmem>>, vector<128x128xbf16>
    %cst_6 = arith.constant dense<0.000000e+00> : vector<2x128xf32>
    %108 = tpu.matmul %106, %107, %cst_6 {dimension_numbers = #tpu.dot_dimension_numbers<[1], [0], [0], [1], [0, 0, 1, 1], [], []>} : vector<2x128xbf16>, vector<128x128xbf16>, vector<2x128xf32> -> vector<2x128xf32>
    %cst_7 = arith.constant 0.000000e+00 : f32
    %109 = vector.broadcast %cst_7 : f32 to vector<2x128xf32>
    %110 = vector.extract_strided_slice %2 {offsets = [3, 0, 0], sizes = [1, 2, 128], strides = [1, 1, 1]} : vector<64x2x128xbf16> to vector<1x2x128xbf16>
    %111 = vector.shape_cast %110 : vector<1x2x128xbf16> to vector<2x128xbf16>
    %112 = arith.extf %111 : vector<2x128xbf16> to vector<2x128xf32>
    %113 = arith.addf %109, %112 : vector<2x128xf32>
    %114 = vector.extract_strided_slice %2 {offsets = [4, 0, 0], sizes = [1, 2, 128], strides = [1, 1, 1]} : vector<64x2x128xbf16> to vector<1x2x128xbf16>
    %115 = vector.shape_cast %114 : vector<1x2x128xbf16> to vector<2x128xbf16>
    %116 = arith.extf %115 : vector<2x128xbf16> to vector<2x128xf32>
    %117 = arith.addf %113, %116 : vector<2x128xf32>
    %118 = vector.extract_strided_slice %2 {offsets = [5, 0, 0], sizes = [1, 2, 128], strides = [1, 1, 1]} : vector<64x2x128xbf16> to vector<1x2x128xbf16>
    %119 = vector.shape_cast %118 : vector<1x2x128xbf16> to vector<2x128xbf16>
    %120 = arith.extf %119 : vector<2x128xbf16> to vector<2x128xf32>
    %121 = arith.addf %117, %120 : vector<2x128xf32>
    %122 = vector.extract_strided_slice %2 {offsets = [6, 0, 0], sizes = [1, 2, 128], strides = [1, 1, 1]} : vector<64x2x128xbf16> to vector<1x2x128xbf16>
    %123 = vector.shape_cast %122 : vector<1x2x128xbf16> to vector<2x128xbf16>
    %124 = arith.extf %123 : vector<2x128xbf16> to vector<2x128xf32>
    %125 = arith.addf %121, %124 : vector<2x128xf32>
    %126 = vector.extract_strided_slice %2 {offsets = [7, 0, 0], sizes = [1, 2, 128], strides = [1, 1, 1]} : vector<64x2x128xbf16> to vector<1x2x128xbf16>
    %127 = vector.shape_cast %126 : vector<1x2x128xbf16> to vector<2x128xbf16>
    %128 = arith.extf %127 : vector<2x128xbf16> to vector<2x128xf32>
    %129 = arith.addf %125, %128 : vector<2x128xf32>
    %130 = vector.extract_strided_slice %2 {offsets = [11, 0, 0], sizes = [1, 2, 128], strides = [1, 1, 1]} : vector<64x2x128xbf16> to vector<1x2x128xbf16>
    %131 = vector.shape_cast %130 : vector<1x2x128xbf16> to vector<2x128xbf16>
    %132 = arith.extf %131 : vector<2x128xbf16> to vector<2x128xf32>
    %133 = arith.addf %129, %132 : vector<2x128xf32>
    %134 = vector.extract_strided_slice %2 {offsets = [12, 0, 0], sizes = [1, 2, 128], strides = [1, 1, 1]} : vector<64x2x128xbf16> to vector<1x2x128xbf16>
    %135 = vector.shape_cast %134 : vector<1x2x128xbf16> to vector<2x128xbf16>
    %136 = arith.extf %135 : vector<2x128xbf16> to vector<2x128xf32>
    %137 = arith.addf %133, %136 : vector<2x128xf32>
    %138 = vector.extract_strided_slice %2 {offsets = [13, 0, 0], sizes = [1, 2, 128], strides = [1, 1, 1]} : vector<64x2x128xbf16> to vector<1x2x128xbf16>
    %139 = vector.shape_cast %138 : vector<1x2x128xbf16> to vector<2x128xbf16>
    %140 = arith.extf %139 : vector<2x128xbf16> to vector<2x128xf32>
    %141 = arith.addf %137, %140 : vector<2x128xf32>
    %142 = vector.extract_strided_slice %2 {offsets = [14, 0, 0], sizes = [1, 2, 128], strides = [1, 1, 1]} : vector<64x2x128xbf16> to vector<1x2x128xbf16>
    %143 = vector.shape_cast %142 : vector<1x2x128xbf16> to vector<2x128xbf16>
    %144 = arith.extf %143 : vector<2x128xbf16> to vector<2x128xf32>
    %145 = arith.addf %141, %144 : vector<2x128xf32>
    %146 = vector.extract_strided_slice %2 {offsets = [15, 0, 0], sizes = [1, 2, 128], strides = [1, 1, 1]} : vector<64x2x128xbf16> to vector<1x2x128xbf16>
    %147 = vector.shape_cast %146 : vector<1x2x128xbf16> to vector<2x128xbf16>
    %148 = arith.extf %147 : vector<2x128xbf16> to vector<2x128xf32>
    %149 = arith.addf %145, %148 : vector<2x128xf32>
    %150 = vector.extract_strided_slice %2 {offsets = [19, 0, 0], sizes = [1, 2, 128], strides = [1, 1, 1]} : vector<64x2x128xbf16> to vector<1x2x128xbf16>
    %151 = vector.shape_cast %150 : vector<1x2x128xbf16> to vector<2x128xbf16>
    %152 = arith.extf %151 : vector<2x128xbf16> to vector<2x128xf32>
    %153 = arith.addf %149, %152 : vector<2x128xf32>
    %154 = vector.extract_strided_slice %2 {offsets = [20, 0, 0], sizes = [1, 2, 128], strides = [1, 1, 1]} : vector<64x2x128xbf16> to vector<1x2x128xbf16>
    %155 = vector.shape_cast %154 : vector<1x2x128xbf16> to vector<2x128xbf16>
    %156 = arith.extf %155 : vector<2x128xbf16> to vector<2x128xf32>
    %157 = arith.addf %153, %156 : vector<2x128xf32>
    %158 = vector.extract_strided_slice %2 {offsets = [21, 0, 0], sizes = [1, 2, 128], strides = [1, 1, 1]} : vector<64x2x128xbf16> to vector<1x2x128xbf16>
    %159 = vector.shape_cast %158 : vector<1x2x128xbf16> to vector<2x128xbf16>
    %160 = arith.extf %159 : vector<2x128xbf16> to vector<2x128xf32>
    %161 = arith.addf %157, %160 : vector<2x128xf32>
    %162 = vector.extract_strided_slice %2 {offsets = [22, 0, 0], sizes = [1, 2, 128], strides = [1, 1, 1]} : vector<64x2x128xbf16> to vector<1x2x128xbf16>
    %163 = vector.shape_cast %162 : vector<1x2x128xbf16> to vector<2x128xbf16>
    %164 = arith.extf %163 : vector<2x128xbf16> to vector<2x128xf32>
    %165 = arith.addf %161, %164 : vector<2x128xf32>
    %166 = vector.extract_strided_slice %2 {offsets = [23, 0, 0], sizes = [1, 2, 128], strides = [1, 1, 1]} : vector<64x2x128xbf16> to vector<1x2x128xbf16>
    %167 = vector.shape_cast %166 : vector<1x2x128xbf16> to vector<2x128xbf16>
    %168 = arith.extf %167 : vector<2x128xbf16> to vector<2x128xf32>
    %169 = arith.addf %165, %168 : vector<2x128xf32>
    %170 = vector.extract_strided_slice %2 {offsets = [27, 0, 0], sizes = [1, 2, 128], strides = [1, 1, 1]} : vector<64x2x128xbf16> to vector<1x2x128xbf16>
    %171 = vector.shape_cast %170 : vector<1x2x128xbf16> to vector<2x128xbf16>
    %172 = arith.extf %171 : vector<2x128xbf16> to vector<2x128xf32>
    %173 = arith.addf %169, %172 : vector<2x128xf32>
    %174 = vector.extract_strided_slice %2 {offsets = [28, 0, 0], sizes = [1, 2, 128], strides = [1, 1, 1]} : vector<64x2x128xbf16> to vector<1x2x128xbf16>
    %175 = vector.shape_cast %174 : vector<1x2x128xbf16> to vector<2x128xbf16>
    %176 = arith.extf %175 : vector<2x128xbf16> to vector<2x128xf32>
    %177 = arith.addf %173, %176 : vector<2x128xf32>
    %178 = vector.extract_strided_slice %2 {offsets = [29, 0, 0], sizes = [1, 2, 128], strides = [1, 1, 1]} : vector<64x2x128xbf16> to vector<1x2x128xbf16>
    %179 = vector.shape_cast %178 : vector<1x2x128xbf16> to vector<2x128xbf16>
    %180 = arith.extf %179 : vector<2x128xbf16> to vector<2x128xf32>
    %181 = arith.addf %177, %180 : vector<2x128xf32>
    %182 = vector.extract_strided_slice %2 {offsets = [30, 0, 0], sizes = [1, 2, 128], strides = [1, 1, 1]} : vector<64x2x128xbf16> to vector<1x2x128xbf16>
    %183 = vector.shape_cast %182 : vector<1x2x128xbf16> to vector<2x128xbf16>
    %184 = arith.extf %183 : vector<2x128xbf16> to vector<2x128xf32>
    %185 = arith.addf %181, %184 : vector<2x128xf32>
    %186 = vector.extract_strided_slice %2 {offsets = [31, 0, 0], sizes = [1, 2, 128], strides = [1, 1, 1]} : vector<64x2x128xbf16> to vector<1x2x128xbf16>
    %187 = vector.shape_cast %186 : vector<1x2x128xbf16> to vector<2x128xbf16>
    %188 = arith.extf %187 : vector<2x128xbf16> to vector<2x128xf32>
    %189 = arith.addf %185, %188 : vector<2x128xf32>
    %190 = vector.extract_strided_slice %2 {offsets = [35, 0, 0], sizes = [1, 2, 128], strides = [1, 1, 1]} : vector<64x2x128xbf16> to vector<1x2x128xbf16>
    %191 = vector.shape_cast %190 : vector<1x2x128xbf16> to vector<2x128xbf16>
    %192 = arith.extf %191 : vector<2x128xbf16> to vector<2x128xf32>
    %193 = arith.addf %189, %192 : vector<2x128xf32>
    %194 = vector.extract_strided_slice %2 {offsets = [36, 0, 0], sizes = [1, 2, 128], strides = [1, 1, 1]} : vector<64x2x128xbf16> to vector<1x2x128xbf16>
    %195 = vector.shape_cast %194 : vector<1x2x128xbf16> to vector<2x128xbf16>
    %196 = arith.extf %195 : vector<2x128xbf16> to vector<2x128xf32>
    %197 = arith.addf %193, %196 : vector<2x128xf32>
    %198 = vector.extract_strided_slice %2 {offsets = [37, 0, 0], sizes = [1, 2, 128], strides = [1, 1, 1]} : vector<64x2x128xbf16> to vector<1x2x128xbf16>
    %199 = vector.shape_cast %198 : vector<1x2x128xbf16> to vector<2x128xbf16>
    %200 = arith.extf %199 : vector<2x128xbf16> to vector<2x128xf32>
    %201 = arith.addf %197, %200 : vector<2x128xf32>
    %202 = vector.extract_strided_slice %2 {offsets = [38, 0, 0], sizes = [1, 2, 128], strides = [1, 1, 1]} : vector<64x2x128xbf16> to vector<1x2x128xbf16>
    %203 = vector.shape_cast %202 : vector<1x2x128xbf16> to vector<2x128xbf16>
    %204 = arith.extf %203 : vector<2x128xbf16> to vector<2x128xf32>
    %205 = arith.addf %201, %204 : vector<2x128xf32>
    %206 = vector.extract_strided_slice %2 {offsets = [39, 0, 0], sizes = [1, 2, 128], strides = [1, 1, 1]} : vector<64x2x128xbf16> to vector<1x2x128xbf16>
    %207 = vector.shape_cast %206 : vector<1x2x128xbf16> to vector<2x128xbf16>
    %208 = arith.extf %207 : vector<2x128xbf16> to vector<2x128xf32>
    %209 = arith.addf %205, %208 : vector<2x128xf32>
    %cst_8 = arith.constant 4.000000e-02 : f32
    %210 = vector.broadcast %cst_8 : f32 to vector<2x128xf32>
    %211 = arith.mulf %209, %210 : vector<2x128xf32>
    %212 = arith.truncf %211 : vector<2x128xf32> to vector<2x128xbf16>
    %c0_9 = arith.constant 0 : index
    %c0_10 = arith.constant 0 : index
    %213 = vector.load %arg2[%c0_9, %c0_10] : memref<128x128xbf16, #tpu.memory_space<vmem>>, vector<128x128xbf16>
    %cst_11 = arith.constant dense<0.000000e+00> : vector<2x128xf32>
    %214 = tpu.matmul %212, %213, %cst_11 {dimension_numbers = #tpu.dot_dimension_numbers<[1], [0], [0], [1], [0, 0, 1, 1], [], []>} : vector<2x128xbf16>, vector<128x128xbf16>, vector<2x128xf32> -> vector<2x128xf32>
    %cst_12 = arith.constant 0.000000e+00 : f32
    %215 = vector.broadcast %cst_12 : f32 to vector<2x128xf32>
    %216 = vector.extract_strided_slice %2 {offsets = [24, 0, 0], sizes = [1, 2, 128], strides = [1, 1, 1]} : vector<64x2x128xbf16> to vector<1x2x128xbf16>
    %217 = vector.shape_cast %216 : vector<1x2x128xbf16> to vector<2x128xbf16>
    %218 = arith.extf %217 : vector<2x128xbf16> to vector<2x128xf32>
    %219 = arith.addf %215, %218 : vector<2x128xf32>
    %220 = vector.extract_strided_slice %2 {offsets = [25, 0, 0], sizes = [1, 2, 128], strides = [1, 1, 1]} : vector<64x2x128xbf16> to vector<1x2x128xbf16>
    %221 = vector.shape_cast %220 : vector<1x2x128xbf16> to vector<2x128xbf16>
    %222 = arith.extf %221 : vector<2x128xbf16> to vector<2x128xf32>
    %223 = arith.addf %219, %222 : vector<2x128xf32>
    %224 = vector.extract_strided_slice %2 {offsets = [26, 0, 0], sizes = [1, 2, 128], strides = [1, 1, 1]} : vector<64x2x128xbf16> to vector<1x2x128xbf16>
    %225 = vector.shape_cast %224 : vector<1x2x128xbf16> to vector<2x128xbf16>
    %226 = arith.extf %225 : vector<2x128xbf16> to vector<2x128xf32>
    %227 = arith.addf %223, %226 : vector<2x128xf32>
    %228 = vector.extract_strided_slice %2 {offsets = [27, 0, 0], sizes = [1, 2, 128], strides = [1, 1, 1]} : vector<64x2x128xbf16> to vector<1x2x128xbf16>
    %229 = vector.shape_cast %228 : vector<1x2x128xbf16> to vector<2x128xbf16>
    %230 = arith.extf %229 : vector<2x128xbf16> to vector<2x128xf32>
    %231 = arith.addf %227, %230 : vector<2x128xf32>
    %232 = vector.extract_strided_slice %2 {offsets = [28, 0, 0], sizes = [1, 2, 128], strides = [1, 1, 1]} : vector<64x2x128xbf16> to vector<1x2x128xbf16>
    %233 = vector.shape_cast %232 : vector<1x2x128xbf16> to vector<2x128xbf16>
    %234 = arith.extf %233 : vector<2x128xbf16> to vector<2x128xf32>
    %235 = arith.addf %231, %234 : vector<2x128xf32>
    %236 = vector.extract_strided_slice %2 {offsets = [32, 0, 0], sizes = [1, 2, 128], strides = [1, 1, 1]} : vector<64x2x128xbf16> to vector<1x2x128xbf16>
    %237 = vector.shape_cast %236 : vector<1x2x128xbf16> to vector<2x128xbf16>
    %238 = arith.extf %237 : vector<2x128xbf16> to vector<2x128xf32>
    %239 = arith.addf %235, %238 : vector<2x128xf32>
    %240 = vector.extract_strided_slice %2 {offsets = [33, 0, 0], sizes = [1, 2, 128], strides = [1, 1, 1]} : vector<64x2x128xbf16> to vector<1x2x128xbf16>
    %241 = vector.shape_cast %240 : vector<1x2x128xbf16> to vector<2x128xbf16>
    %242 = arith.extf %241 : vector<2x128xbf16> to vector<2x128xf32>
    %243 = arith.addf %239, %242 : vector<2x128xf32>
    %244 = vector.extract_strided_slice %2 {offsets = [34, 0, 0], sizes = [1, 2, 128], strides = [1, 1, 1]} : vector<64x2x128xbf16> to vector<1x2x128xbf16>
    %245 = vector.shape_cast %244 : vector<1x2x128xbf16> to vector<2x128xbf16>
    %246 = arith.extf %245 : vector<2x128xbf16> to vector<2x128xf32>
    %247 = arith.addf %243, %246 : vector<2x128xf32>
    %248 = vector.extract_strided_slice %2 {offsets = [35, 0, 0], sizes = [1, 2, 128], strides = [1, 1, 1]} : vector<64x2x128xbf16> to vector<1x2x128xbf16>
    %249 = vector.shape_cast %248 : vector<1x2x128xbf16> to vector<2x128xbf16>
    %250 = arith.extf %249 : vector<2x128xbf16> to vector<2x128xf32>
    %251 = arith.addf %247, %250 : vector<2x128xf32>
    %252 = vector.extract_strided_slice %2 {offsets = [36, 0, 0], sizes = [1, 2, 128], strides = [1, 1, 1]} : vector<64x2x128xbf16> to vector<1x2x128xbf16>
    %253 = vector.shape_cast %252 : vector<1x2x128xbf16> to vector<2x128xbf16>
    %254 = arith.extf %253 : vector<2x128xbf16> to vector<2x128xf32>
    %255 = arith.addf %251, %254 : vector<2x128xf32>
    %256 = vector.extract_strided_slice %2 {offsets = [40, 0, 0], sizes = [1, 2, 128], strides = [1, 1, 1]} : vector<64x2x128xbf16> to vector<1x2x128xbf16>
    %257 = vector.shape_cast %256 : vector<1x2x128xbf16> to vector<2x128xbf16>
    %258 = arith.extf %257 : vector<2x128xbf16> to vector<2x128xf32>
    %259 = arith.addf %255, %258 : vector<2x128xf32>
    %260 = vector.extract_strided_slice %2 {offsets = [41, 0, 0], sizes = [1, 2, 128], strides = [1, 1, 1]} : vector<64x2x128xbf16> to vector<1x2x128xbf16>
    %261 = vector.shape_cast %260 : vector<1x2x128xbf16> to vector<2x128xbf16>
    %262 = arith.extf %261 : vector<2x128xbf16> to vector<2x128xf32>
    %263 = arith.addf %259, %262 : vector<2x128xf32>
    %264 = vector.extract_strided_slice %2 {offsets = [42, 0, 0], sizes = [1, 2, 128], strides = [1, 1, 1]} : vector<64x2x128xbf16> to vector<1x2x128xbf16>
    %265 = vector.shape_cast %264 : vector<1x2x128xbf16> to vector<2x128xbf16>
    %266 = arith.extf %265 : vector<2x128xbf16> to vector<2x128xf32>
    %267 = arith.addf %263, %266 : vector<2x128xf32>
    %268 = vector.extract_strided_slice %2 {offsets = [43, 0, 0], sizes = [1, 2, 128], strides = [1, 1, 1]} : vector<64x2x128xbf16> to vector<1x2x128xbf16>
    %269 = vector.shape_cast %268 : vector<1x2x128xbf16> to vector<2x128xbf16>
    %270 = arith.extf %269 : vector<2x128xbf16> to vector<2x128xf32>
    %271 = arith.addf %267, %270 : vector<2x128xf32>
    %272 = vector.extract_strided_slice %2 {offsets = [44, 0, 0], sizes = [1, 2, 128], strides = [1, 1, 1]} : vector<64x2x128xbf16> to vector<1x2x128xbf16>
    %273 = vector.shape_cast %272 : vector<1x2x128xbf16> to vector<2x128xbf16>
    %274 = arith.extf %273 : vector<2x128xbf16> to vector<2x128xf32>
    %275 = arith.addf %271, %274 : vector<2x128xf32>
    %276 = vector.extract_strided_slice %2 {offsets = [48, 0, 0], sizes = [1, 2, 128], strides = [1, 1, 1]} : vector<64x2x128xbf16> to vector<1x2x128xbf16>
    %277 = vector.shape_cast %276 : vector<1x2x128xbf16> to vector<2x128xbf16>
    %278 = arith.extf %277 : vector<2x128xbf16> to vector<2x128xf32>
    %279 = arith.addf %275, %278 : vector<2x128xf32>
    %280 = vector.extract_strided_slice %2 {offsets = [49, 0, 0], sizes = [1, 2, 128], strides = [1, 1, 1]} : vector<64x2x128xbf16> to vector<1x2x128xbf16>
    %281 = vector.shape_cast %280 : vector<1x2x128xbf16> to vector<2x128xbf16>
    %282 = arith.extf %281 : vector<2x128xbf16> to vector<2x128xf32>
    %283 = arith.addf %279, %282 : vector<2x128xf32>
    %284 = vector.extract_strided_slice %2 {offsets = [50, 0, 0], sizes = [1, 2, 128], strides = [1, 1, 1]} : vector<64x2x128xbf16> to vector<1x2x128xbf16>
    %285 = vector.shape_cast %284 : vector<1x2x128xbf16> to vector<2x128xbf16>
    %286 = arith.extf %285 : vector<2x128xbf16> to vector<2x128xf32>
    %287 = arith.addf %283, %286 : vector<2x128xf32>
    %288 = vector.extract_strided_slice %2 {offsets = [51, 0, 0], sizes = [1, 2, 128], strides = [1, 1, 1]} : vector<64x2x128xbf16> to vector<1x2x128xbf16>
    %289 = vector.shape_cast %288 : vector<1x2x128xbf16> to vector<2x128xbf16>
    %290 = arith.extf %289 : vector<2x128xbf16> to vector<2x128xf32>
    %291 = arith.addf %287, %290 : vector<2x128xf32>
    %292 = vector.extract_strided_slice %2 {offsets = [52, 0, 0], sizes = [1, 2, 128], strides = [1, 1, 1]} : vector<64x2x128xbf16> to vector<1x2x128xbf16>
    %293 = vector.shape_cast %292 : vector<1x2x128xbf16> to vector<2x128xbf16>
    %294 = arith.extf %293 : vector<2x128xbf16> to vector<2x128xf32>
    %295 = arith.addf %291, %294 : vector<2x128xf32>
    %296 = vector.extract_strided_slice %2 {offsets = [56, 0, 0], sizes = [1, 2, 128], strides = [1, 1, 1]} : vector<64x2x128xbf16> to vector<1x2x128xbf16>
    %297 = vector.shape_cast %296 : vector<1x2x128xbf16> to vector<2x128xbf16>
    %298 = arith.extf %297 : vector<2x128xbf16> to vector<2x128xf32>
    %299 = arith.addf %295, %298 : vector<2x128xf32>
    %300 = vector.extract_strided_slice %2 {offsets = [57, 0, 0], sizes = [1, 2, 128], strides = [1, 1, 1]} : vector<64x2x128xbf16> to vector<1x2x128xbf16>
    %301 = vector.shape_cast %300 : vector<1x2x128xbf16> to vector<2x128xbf16>
    %302 = arith.extf %301 : vector<2x128xbf16> to vector<2x128xf32>
    %303 = arith.addf %299, %302 : vector<2x128xf32>
    %304 = vector.extract_strided_slice %2 {offsets = [58, 0, 0], sizes = [1, 2, 128], strides = [1, 1, 1]} : vector<64x2x128xbf16> to vector<1x2x128xbf16>
    %305 = vector.shape_cast %304 : vector<1x2x128xbf16> to vector<2x128xbf16>
    %306 = arith.extf %305 : vector<2x128xbf16> to vector<2x128xf32>
    %307 = arith.addf %303, %306 : vector<2x128xf32>
    %308 = vector.extract_strided_slice %2 {offsets = [59, 0, 0], sizes = [1, 2, 128], strides = [1, 1, 1]} : vector<64x2x128xbf16> to vector<1x2x128xbf16>
    %309 = vector.shape_cast %308 : vector<1x2x128xbf16> to vector<2x128xbf16>
    %310 = arith.extf %309 : vector<2x128xbf16> to vector<2x128xf32>
    %311 = arith.addf %307, %310 : vector<2x128xf32>
    %312 = vector.extract_strided_slice %2 {offsets = [60, 0, 0], sizes = [1, 2, 128], strides = [1, 1, 1]} : vector<64x2x128xbf16> to vector<1x2x128xbf16>
    %313 = vector.shape_cast %312 : vector<1x2x128xbf16> to vector<2x128xbf16>
    %314 = arith.extf %313 : vector<2x128xbf16> to vector<2x128xf32>
    %315 = arith.addf %311, %314 : vector<2x128xf32>
    %cst_13 = arith.constant 4.000000e-02 : f32
    %316 = vector.broadcast %cst_13 : f32 to vector<2x128xf32>
    %317 = arith.mulf %315, %316 : vector<2x128xf32>
    %318 = arith.truncf %317 : vector<2x128xf32> to vector<2x128xbf16>
    %c0_14 = arith.constant 0 : index
    %c0_15 = arith.constant 0 : index
    %319 = vector.load %arg2[%c0_14, %c0_15] : memref<128x128xbf16, #tpu.memory_space<vmem>>, vector<128x128xbf16>
    %cst_16 = arith.constant dense<0.000000e+00> : vector<2x128xf32>
    %320 = tpu.matmul %318, %319, %cst_16 {dimension_numbers = #tpu.dot_dimension_numbers<[1], [0], [0], [1], [0, 0, 1, 1], [], []>} : vector<2x128xbf16>, vector<128x128xbf16>, vector<2x128xf32> -> vector<2x128xf32>
    %cst_17 = arith.constant 0.000000e+00 : f32
    %321 = vector.broadcast %cst_17 : f32 to vector<2x128xf32>
    %322 = vector.extract_strided_slice %2 {offsets = [27, 0, 0], sizes = [1, 2, 128], strides = [1, 1, 1]} : vector<64x2x128xbf16> to vector<1x2x128xbf16>
    %323 = vector.shape_cast %322 : vector<1x2x128xbf16> to vector<2x128xbf16>
    %324 = arith.extf %323 : vector<2x128xbf16> to vector<2x128xf32>
    %325 = arith.addf %321, %324 : vector<2x128xf32>
    %326 = vector.extract_strided_slice %2 {offsets = [28, 0, 0], sizes = [1, 2, 128], strides = [1, 1, 1]} : vector<64x2x128xbf16> to vector<1x2x128xbf16>
    %327 = vector.shape_cast %326 : vector<1x2x128xbf16> to vector<2x128xbf16>
    %328 = arith.extf %327 : vector<2x128xbf16> to vector<2x128xf32>
    %329 = arith.addf %325, %328 : vector<2x128xf32>
    %330 = vector.extract_strided_slice %2 {offsets = [29, 0, 0], sizes = [1, 2, 128], strides = [1, 1, 1]} : vector<64x2x128xbf16> to vector<1x2x128xbf16>
    %331 = vector.shape_cast %330 : vector<1x2x128xbf16> to vector<2x128xbf16>
    %332 = arith.extf %331 : vector<2x128xbf16> to vector<2x128xf32>
    %333 = arith.addf %329, %332 : vector<2x128xf32>
    %334 = vector.extract_strided_slice %2 {offsets = [30, 0, 0], sizes = [1, 2, 128], strides = [1, 1, 1]} : vector<64x2x128xbf16> to vector<1x2x128xbf16>
    %335 = vector.shape_cast %334 : vector<1x2x128xbf16> to vector<2x128xbf16>
    %336 = arith.extf %335 : vector<2x128xbf16> to vector<2x128xf32>
    %337 = arith.addf %333, %336 : vector<2x128xf32>
    %338 = vector.extract_strided_slice %2 {offsets = [31, 0, 0], sizes = [1, 2, 128], strides = [1, 1, 1]} : vector<64x2x128xbf16> to vector<1x2x128xbf16>
    %339 = vector.shape_cast %338 : vector<1x2x128xbf16> to vector<2x128xbf16>
    %340 = arith.extf %339 : vector<2x128xbf16> to vector<2x128xf32>
    %341 = arith.addf %337, %340 : vector<2x128xf32>
    %342 = vector.extract_strided_slice %2 {offsets = [35, 0, 0], sizes = [1, 2, 128], strides = [1, 1, 1]} : vector<64x2x128xbf16> to vector<1x2x128xbf16>
    %343 = vector.shape_cast %342 : vector<1x2x128xbf16> to vector<2x128xbf16>
    %344 = arith.extf %343 : vector<2x128xbf16> to vector<2x128xf32>
    %345 = arith.addf %341, %344 : vector<2x128xf32>
    %346 = vector.extract_strided_slice %2 {offsets = [36, 0, 0], sizes = [1, 2, 128], strides = [1, 1, 1]} : vector<64x2x128xbf16> to vector<1x2x128xbf16>
    %347 = vector.shape_cast %346 : vector<1x2x128xbf16> to vector<2x128xbf16>
    %348 = arith.extf %347 : vector<2x128xbf16> to vector<2x128xf32>
    %349 = arith.addf %345, %348 : vector<2x128xf32>
    %350 = vector.extract_strided_slice %2 {offsets = [37, 0, 0], sizes = [1, 2, 128], strides = [1, 1, 1]} : vector<64x2x128xbf16> to vector<1x2x128xbf16>
    %351 = vector.shape_cast %350 : vector<1x2x128xbf16> to vector<2x128xbf16>
    %352 = arith.extf %351 : vector<2x128xbf16> to vector<2x128xf32>
    %353 = arith.addf %349, %352 : vector<2x128xf32>
    %354 = vector.extract_strided_slice %2 {offsets = [38, 0, 0], sizes = [1, 2, 128], strides = [1, 1, 1]} : vector<64x2x128xbf16> to vector<1x2x128xbf16>
    %355 = vector.shape_cast %354 : vector<1x2x128xbf16> to vector<2x128xbf16>
    %356 = arith.extf %355 : vector<2x128xbf16> to vector<2x128xf32>
    %357 = arith.addf %353, %356 : vector<2x128xf32>
    %358 = vector.extract_strided_slice %2 {offsets = [39, 0, 0], sizes = [1, 2, 128], strides = [1, 1, 1]} : vector<64x2x128xbf16> to vector<1x2x128xbf16>
    %359 = vector.shape_cast %358 : vector<1x2x128xbf16> to vector<2x128xbf16>
    %360 = arith.extf %359 : vector<2x128xbf16> to vector<2x128xf32>
    %361 = arith.addf %357, %360 : vector<2x128xf32>
    %362 = vector.extract_strided_slice %2 {offsets = [43, 0, 0], sizes = [1, 2, 128], strides = [1, 1, 1]} : vector<64x2x128xbf16> to vector<1x2x128xbf16>
    %363 = vector.shape_cast %362 : vector<1x2x128xbf16> to vector<2x128xbf16>
    %364 = arith.extf %363 : vector<2x128xbf16> to vector<2x128xf32>
    %365 = arith.addf %361, %364 : vector<2x128xf32>
    %366 = vector.extract_strided_slice %2 {offsets = [44, 0, 0], sizes = [1, 2, 128], strides = [1, 1, 1]} : vector<64x2x128xbf16> to vector<1x2x128xbf16>
    %367 = vector.shape_cast %366 : vector<1x2x128xbf16> to vector<2x128xbf16>
    %368 = arith.extf %367 : vector<2x128xbf16> to vector<2x128xf32>
    %369 = arith.addf %365, %368 : vector<2x128xf32>
    %370 = vector.extract_strided_slice %2 {offsets = [45, 0, 0], sizes = [1, 2, 128], strides = [1, 1, 1]} : vector<64x2x128xbf16> to vector<1x2x128xbf16>
    %371 = vector.shape_cast %370 : vector<1x2x128xbf16> to vector<2x128xbf16>
    %372 = arith.extf %371 : vector<2x128xbf16> to vector<2x128xf32>
    %373 = arith.addf %369, %372 : vector<2x128xf32>
    %374 = vector.extract_strided_slice %2 {offsets = [46, 0, 0], sizes = [1, 2, 128], strides = [1, 1, 1]} : vector<64x2x128xbf16> to vector<1x2x128xbf16>
    %375 = vector.shape_cast %374 : vector<1x2x128xbf16> to vector<2x128xbf16>
    %376 = arith.extf %375 : vector<2x128xbf16> to vector<2x128xf32>
    %377 = arith.addf %373, %376 : vector<2x128xf32>
    %378 = vector.extract_strided_slice %2 {offsets = [47, 0, 0], sizes = [1, 2, 128], strides = [1, 1, 1]} : vector<64x2x128xbf16> to vector<1x2x128xbf16>
    %379 = vector.shape_cast %378 : vector<1x2x128xbf16> to vector<2x128xbf16>
    %380 = arith.extf %379 : vector<2x128xbf16> to vector<2x128xf32>
    %381 = arith.addf %377, %380 : vector<2x128xf32>
    %382 = vector.extract_strided_slice %2 {offsets = [51, 0, 0], sizes = [1, 2, 128], strides = [1, 1, 1]} : vector<64x2x128xbf16> to vector<1x2x128xbf16>
    %383 = vector.shape_cast %382 : vector<1x2x128xbf16> to vector<2x128xbf16>
    %384 = arith.extf %383 : vector<2x128xbf16> to vector<2x128xf32>
    %385 = arith.addf %381, %384 : vector<2x128xf32>
    %386 = vector.extract_strided_slice %2 {offsets = [52, 0, 0], sizes = [1, 2, 128], strides = [1, 1, 1]} : vector<64x2x128xbf16> to vector<1x2x128xbf16>
    %387 = vector.shape_cast %386 : vector<1x2x128xbf16> to vector<2x128xbf16>
    %388 = arith.extf %387 : vector<2x128xbf16> to vector<2x128xf32>
    %389 = arith.addf %385, %388 : vector<2x128xf32>
    %390 = vector.extract_strided_slice %2 {offsets = [53, 0, 0], sizes = [1, 2, 128], strides = [1, 1, 1]} : vector<64x2x128xbf16> to vector<1x2x128xbf16>
    %391 = vector.shape_cast %390 : vector<1x2x128xbf16> to vector<2x128xbf16>
    %392 = arith.extf %391 : vector<2x128xbf16> to vector<2x128xf32>
    %393 = arith.addf %389, %392 : vector<2x128xf32>
    %394 = vector.extract_strided_slice %2 {offsets = [54, 0, 0], sizes = [1, 2, 128], strides = [1, 1, 1]} : vector<64x2x128xbf16> to vector<1x2x128xbf16>
    %395 = vector.shape_cast %394 : vector<1x2x128xbf16> to vector<2x128xbf16>
    %396 = arith.extf %395 : vector<2x128xbf16> to vector<2x128xf32>
    %397 = arith.addf %393, %396 : vector<2x128xf32>
    %398 = vector.extract_strided_slice %2 {offsets = [55, 0, 0], sizes = [1, 2, 128], strides = [1, 1, 1]} : vector<64x2x128xbf16> to vector<1x2x128xbf16>
    %399 = vector.shape_cast %398 : vector<1x2x128xbf16> to vector<2x128xbf16>
    %400 = arith.extf %399 : vector<2x128xbf16> to vector<2x128xf32>
    %401 = arith.addf %397, %400 : vector<2x128xf32>
    %402 = vector.extract_strided_slice %2 {offsets = [59, 0, 0], sizes = [1, 2, 128], strides = [1, 1, 1]} : vector<64x2x128xbf16> to vector<1x2x128xbf16>
    %403 = vector.shape_cast %402 : vector<1x2x128xbf16> to vector<2x128xbf16>
    %404 = arith.extf %403 : vector<2x128xbf16> to vector<2x128xf32>
    %405 = arith.addf %401, %404 : vector<2x128xf32>
    %406 = vector.extract_strided_slice %2 {offsets = [60, 0, 0], sizes = [1, 2, 128], strides = [1, 1, 1]} : vector<64x2x128xbf16> to vector<1x2x128xbf16>
    %407 = vector.shape_cast %406 : vector<1x2x128xbf16> to vector<2x128xbf16>
    %408 = arith.extf %407 : vector<2x128xbf16> to vector<2x128xf32>
    %409 = arith.addf %405, %408 : vector<2x128xf32>
    %410 = vector.extract_strided_slice %2 {offsets = [61, 0, 0], sizes = [1, 2, 128], strides = [1, 1, 1]} : vector<64x2x128xbf16> to vector<1x2x128xbf16>
    %411 = vector.shape_cast %410 : vector<1x2x128xbf16> to vector<2x128xbf16>
    %412 = arith.extf %411 : vector<2x128xbf16> to vector<2x128xf32>
    %413 = arith.addf %409, %412 : vector<2x128xf32>
    %414 = vector.extract_strided_slice %2 {offsets = [62, 0, 0], sizes = [1, 2, 128], strides = [1, 1, 1]} : vector<64x2x128xbf16> to vector<1x2x128xbf16>
    %415 = vector.shape_cast %414 : vector<1x2x128xbf16> to vector<2x128xbf16>
    %416 = arith.extf %415 : vector<2x128xbf16> to vector<2x128xf32>
    %417 = arith.addf %413, %416 : vector<2x128xf32>
    %418 = vector.extract_strided_slice %2 {offsets = [63, 0, 0], sizes = [1, 2, 128], strides = [1, 1, 1]} : vector<64x2x128xbf16> to vector<1x2x128xbf16>
    %419 = vector.shape_cast %418 : vector<1x2x128xbf16> to vector<2x128xbf16>
    %420 = arith.extf %419 : vector<2x128xbf16> to vector<2x128xf32>
    %421 = arith.addf %417, %420 : vector<2x128xf32>
    %cst_18 = arith.constant 4.000000e-02 : f32
    %422 = vector.broadcast %cst_18 : f32 to vector<2x128xf32>
    %423 = arith.mulf %421, %422 : vector<2x128xf32>
    %424 = arith.truncf %423 : vector<2x128xf32> to vector<2x128xbf16>
    %c0_19 = arith.constant 0 : index
    %c0_20 = arith.constant 0 : index
    %425 = vector.load %arg2[%c0_19, %c0_20] : memref<128x128xbf16, #tpu.memory_space<vmem>>, vector<128x128xbf16>
    %cst_21 = arith.constant dense<0.000000e+00> : vector<2x128xf32>
    %426 = tpu.matmul %424, %425, %cst_21 {dimension_numbers = #tpu.dot_dimension_numbers<[1], [0], [0], [1], [0, 0, 1, 1], [], []>} : vector<2x128xbf16>, vector<128x128xbf16>, vector<2x128xf32> -> vector<2x128xf32>
    %cst_22 = arith.constant dense<0.000000e+00> : vector<128xf32>
    %427 = vector.multi_reduction <add>, %108, %cst_22 [0] : vector<2x128xf32> to vector<128xf32>
    %428 = vector.shape_cast %427 : vector<128xf32> to vector<1x128xf32>
    %cst_23 = arith.constant 0.000000e+00 : f32
    %429 = vector.broadcast %cst_23 : f32 to vector<1x128xf32>
    %430 = arith.addf %429, %428 : vector<1x128xf32>
    %cst_24 = arith.constant dense<0.000000e+00> : vector<128xf32>
    %431 = vector.multi_reduction <add>, %214, %cst_24 [0] : vector<2x128xf32> to vector<128xf32>
    %432 = vector.shape_cast %431 : vector<128xf32> to vector<1x128xf32>
    %433 = arith.addf %430, %432 : vector<1x128xf32>
    %cst_25 = arith.constant dense<0.000000e+00> : vector<128xf32>
    %434 = vector.multi_reduction <add>, %320, %cst_25 [0] : vector<2x128xf32> to vector<128xf32>
    %435 = vector.shape_cast %434 : vector<128xf32> to vector<1x128xf32>
    %436 = arith.addf %433, %435 : vector<1x128xf32>
    %cst_26 = arith.constant dense<0.000000e+00> : vector<128xf32>
    %437 = vector.multi_reduction <add>, %426, %cst_26 [0] : vector<2x128xf32> to vector<128xf32>
    %438 = vector.shape_cast %437 : vector<128xf32> to vector<1x128xf32>
    %439 = arith.addf %436, %438 : vector<1x128xf32>
    %cst_27 = arith.constant 8.000000e+00 : f32
    %440 = vector.broadcast %cst_27 : f32 to vector<1x128xf32>
    %441 = arith.divf %439, %440 : vector<1x128xf32>
    %442 = vector.broadcast %441 : vector<1x128xf32> to vector<2x128xf32>
    %443 = arith.subf %108, %442 : vector<2x128xf32>
    %444 = arith.mulf %443, %443 : vector<2x128xf32>
    %cst_28 = arith.constant dense<0.000000e+00> : vector<128xf32>
    %445 = vector.multi_reduction <add>, %444, %cst_28 [0] : vector<2x128xf32> to vector<128xf32>
    %446 = vector.shape_cast %445 : vector<128xf32> to vector<1x128xf32>
    %cst_29 = arith.constant 0.000000e+00 : f32
    %447 = vector.broadcast %cst_29 : f32 to vector<1x128xf32>
    %448 = arith.addf %447, %446 : vector<1x128xf32>
    %449 = vector.broadcast %441 : vector<1x128xf32> to vector<2x128xf32>
    %450 = arith.subf %214, %449 : vector<2x128xf32>
    %451 = arith.mulf %450, %450 : vector<2x128xf32>
    %cst_30 = arith.constant dense<0.000000e+00> : vector<128xf32>
    %452 = vector.multi_reduction <add>, %451, %cst_30 [0] : vector<2x128xf32> to vector<128xf32>
    %453 = vector.shape_cast %452 : vector<128xf32> to vector<1x128xf32>
    %454 = arith.addf %448, %453 : vector<1x128xf32>
    %455 = vector.broadcast %441 : vector<1x128xf32> to vector<2x128xf32>
    %456 = arith.subf %320, %455 : vector<2x128xf32>
    %457 = arith.mulf %456, %456 : vector<2x128xf32>
    %cst_31 = arith.constant dense<0.000000e+00> : vector<128xf32>
    %458 = vector.multi_reduction <add>, %457, %cst_31 [0] : vector<2x128xf32> to vector<128xf32>
    %459 = vector.shape_cast %458 : vector<128xf32> to vector<1x128xf32>
    %460 = arith.addf %454, %459 : vector<1x128xf32>
    %461 = vector.broadcast %441 : vector<1x128xf32> to vector<2x128xf32>
    %462 = arith.subf %426, %461 : vector<2x128xf32>
    %463 = arith.mulf %462, %462 : vector<2x128xf32>
    %cst_32 = arith.constant dense<0.000000e+00> : vector<128xf32>
    %464 = vector.multi_reduction <add>, %463, %cst_32 [0] : vector<2x128xf32> to vector<128xf32>
    %465 = vector.shape_cast %464 : vector<128xf32> to vector<1x128xf32>
    %466 = arith.addf %460, %465 : vector<1x128xf32>
    %cst_33 = arith.constant 8.000000e+00 : f32
    %467 = vector.broadcast %cst_33 : f32 to vector<1x128xf32>
    %468 = arith.divf %466, %467 : vector<1x128xf32>
    %cst_34 = arith.constant 9.99999974E-6 : f32
    %469 = vector.broadcast %cst_34 : f32 to vector<1x128xf32>
    %470 = arith.addf %468, %469 : vector<1x128xf32>
    %471 = math.rsqrt %470 : vector<1x128xf32>
    %472 = vector.broadcast %441 : vector<1x128xf32> to vector<2x128xf32>
    %473 = arith.subf %108, %472 : vector<2x128xf32>
    %474 = vector.broadcast %471 : vector<1x128xf32> to vector<2x128xf32>
    %475 = arith.mulf %473, %474 : vector<2x128xf32>
    %c0_35 = arith.constant 0 : index
    %c0_36 = arith.constant 0 : index
    %476 = vector.load %arg3[%c0_35, %c0_36] : memref<1x128xf32, #tpu.memory_space<vmem>>, vector<1x128xf32>
    %477 = vector.broadcast %476 : vector<1x128xf32> to vector<2x128xf32>
    %478 = arith.mulf %475, %477 : vector<2x128xf32>
    %c0_37 = arith.constant 0 : index
    %c0_38 = arith.constant 0 : index
    %479 = vector.load %arg4[%c0_37, %c0_38] : memref<1x128xf32, #tpu.memory_space<vmem>>, vector<1x128xf32>
    %480 = vector.broadcast %479 : vector<1x128xf32> to vector<2x128xf32>
    %481 = arith.addf %478, %480 : vector<2x128xf32>
    %cst_39 = arith.constant 0.000000e+00 : f32
    %482 = vector.broadcast %cst_39 : f32 to vector<2x128xf32>
    %483 = arith.maximumf %481, %482 : vector<2x128xf32>
    %484 = arith.truncf %483 : vector<2x128xf32> to vector<2x128xbf16>
    %485 = vector.broadcast %441 : vector<1x128xf32> to vector<2x128xf32>
    %486 = arith.subf %214, %485 : vector<2x128xf32>
    %487 = vector.broadcast %471 : vector<1x128xf32> to vector<2x128xf32>
    %488 = arith.mulf %486, %487 : vector<2x128xf32>
    %c0_40 = arith.constant 0 : index
    %c0_41 = arith.constant 0 : index
    %489 = vector.load %arg3[%c0_40, %c0_41] : memref<1x128xf32, #tpu.memory_space<vmem>>, vector<1x128xf32>
    %490 = vector.broadcast %489 : vector<1x128xf32> to vector<2x128xf32>
    %491 = arith.mulf %488, %490 : vector<2x128xf32>
    %c0_42 = arith.constant 0 : index
    %c0_43 = arith.constant 0 : index
    %492 = vector.load %arg4[%c0_42, %c0_43] : memref<1x128xf32, #tpu.memory_space<vmem>>, vector<1x128xf32>
    %493 = vector.broadcast %492 : vector<1x128xf32> to vector<2x128xf32>
    %494 = arith.addf %491, %493 : vector<2x128xf32>
    %cst_44 = arith.constant 0.000000e+00 : f32
    %495 = vector.broadcast %cst_44 : f32 to vector<2x128xf32>
    %496 = arith.maximumf %494, %495 : vector<2x128xf32>
    %497 = arith.truncf %496 : vector<2x128xf32> to vector<2x128xbf16>
    %498 = vector.broadcast %441 : vector<1x128xf32> to vector<2x128xf32>
    %499 = arith.subf %320, %498 : vector<2x128xf32>
    %500 = vector.broadcast %471 : vector<1x128xf32> to vector<2x128xf32>
    %501 = arith.mulf %499, %500 : vector<2x128xf32>
    %c0_45 = arith.constant 0 : index
    %c0_46 = arith.constant 0 : index
    %502 = vector.load %arg3[%c0_45, %c0_46] : memref<1x128xf32, #tpu.memory_space<vmem>>, vector<1x128xf32>
    %503 = vector.broadcast %502 : vector<1x128xf32> to vector<2x128xf32>
    %504 = arith.mulf %501, %503 : vector<2x128xf32>
    %c0_47 = arith.constant 0 : index
    %c0_48 = arith.constant 0 : index
    %505 = vector.load %arg4[%c0_47, %c0_48] : memref<1x128xf32, #tpu.memory_space<vmem>>, vector<1x128xf32>
    %506 = vector.broadcast %505 : vector<1x128xf32> to vector<2x128xf32>
    %507 = arith.addf %504, %506 : vector<2x128xf32>
    %cst_49 = arith.constant 0.000000e+00 : f32
    %508 = vector.broadcast %cst_49 : f32 to vector<2x128xf32>
    %509 = arith.maximumf %507, %508 : vector<2x128xf32>
    %510 = arith.truncf %509 : vector<2x128xf32> to vector<2x128xbf16>
    %511 = vector.broadcast %441 : vector<1x128xf32> to vector<2x128xf32>
    %512 = arith.subf %426, %511 : vector<2x128xf32>
    %513 = vector.broadcast %471 : vector<1x128xf32> to vector<2x128xf32>
    %514 = arith.mulf %512, %513 : vector<2x128xf32>
    %c0_50 = arith.constant 0 : index
    %c0_51 = arith.constant 0 : index
    %515 = vector.load %arg3[%c0_50, %c0_51] : memref<1x128xf32, #tpu.memory_space<vmem>>, vector<1x128xf32>
    %516 = vector.broadcast %515 : vector<1x128xf32> to vector<2x128xf32>
    %517 = arith.mulf %514, %516 : vector<2x128xf32>
    %c0_52 = arith.constant 0 : index
    %c0_53 = arith.constant 0 : index
    %518 = vector.load %arg4[%c0_52, %c0_53] : memref<1x128xf32, #tpu.memory_space<vmem>>, vector<1x128xf32>
    %519 = vector.broadcast %518 : vector<1x128xf32> to vector<2x128xf32>
    %520 = arith.addf %517, %519 : vector<2x128xf32>
    %cst_54 = arith.constant 0.000000e+00 : f32
    %521 = vector.broadcast %cst_54 : f32 to vector<2x128xf32>
    %522 = arith.maximumf %520, %521 : vector<2x128xf32>
    %523 = arith.truncf %522 : vector<2x128xf32> to vector<2x128xbf16>
    %524 = tpu.concatenate %484, %497, %510, %523 in 1 : vector<2x128xbf16>, vector<2x128xbf16>, vector<2x128xbf16>, vector<2x128xbf16> -> vector<2x512xbf16>
    %c0_55 = arith.constant 0 : index
    %c0_56 = arith.constant 0 : index
    %525 = vector.load %arg5[%c0_55, %c0_56] : memref<512x768xbf16, #tpu.memory_space<vmem>>, vector<512x768xbf16>
    %cst_57 = arith.constant dense<0.000000e+00> : vector<2x768xf32>
    %526 = tpu.matmul %524, %525, %cst_57 {dimension_numbers = #tpu.dot_dimension_numbers<[1], [0], [0], [1], [0, 0, 1, 1], [], []>} : vector<2x512xbf16>, vector<512x768xbf16>, vector<2x768xf32> -> vector<2x768xf32>
    %cst_58 = arith.constant dense<0.000000e+00> : vector<768xf32>
    %527 = vector.multi_reduction <add>, %526, %cst_58 [0] : vector<2x768xf32> to vector<768xf32>
    %528 = vector.shape_cast %527 : vector<768xf32> to vector<1x768xf32>
    %cst_59 = arith.constant 2.000000e+00 : f32
    %529 = vector.broadcast %cst_59 : f32 to vector<1x768xf32>
    %530 = arith.divf %528, %529 : vector<1x768xf32>
    %531 = vector.broadcast %530 : vector<1x768xf32> to vector<2x768xf32>
    %532 = arith.subf %526, %531 : vector<2x768xf32>
    %533 = arith.mulf %532, %532 : vector<2x768xf32>
    %cst_60 = arith.constant dense<0.000000e+00> : vector<768xf32>
    %534 = vector.multi_reduction <add>, %533, %cst_60 [0] : vector<2x768xf32> to vector<768xf32>
    %535 = vector.shape_cast %534 : vector<768xf32> to vector<1x768xf32>
    %cst_61 = arith.constant 2.000000e+00 : f32
    %536 = vector.broadcast %cst_61 : f32 to vector<1x768xf32>
    %537 = arith.divf %535, %536 : vector<1x768xf32>
    %538 = vector.broadcast %530 : vector<1x768xf32> to vector<2x768xf32>
    %539 = arith.subf %526, %538 : vector<2x768xf32>
    %cst_62 = arith.constant 9.99999974E-6 : f32
    %540 = vector.broadcast %cst_62 : f32 to vector<1x768xf32>
    %541 = arith.addf %537, %540 : vector<1x768xf32>
    %542 = math.rsqrt %541 : vector<1x768xf32>
    %543 = vector.broadcast %542 : vector<1x768xf32> to vector<2x768xf32>
    %544 = arith.mulf %539, %543 : vector<2x768xf32>
    %c0_63 = arith.constant 0 : index
    %c0_64 = arith.constant 0 : index
    %545 = vector.load %arg6[%c0_63, %c0_64] : memref<1x768xf32, #tpu.memory_space<vmem>>, vector<1x768xf32>
    %546 = vector.broadcast %545 : vector<1x768xf32> to vector<2x768xf32>
    %547 = arith.mulf %544, %546 : vector<2x768xf32>
    %c0_65 = arith.constant 0 : index
    %c0_66 = arith.constant 0 : index
    %548 = vector.load %arg7[%c0_65, %c0_66] : memref<1x768xf32, #tpu.memory_space<vmem>>, vector<1x768xf32>
    %549 = vector.broadcast %548 : vector<1x768xf32> to vector<2x768xf32>
    %550 = arith.addf %547, %549 : vector<2x768xf32>
    %cst_67 = arith.constant 0.000000e+00 : f32
    %551 = vector.broadcast %cst_67 : f32 to vector<2x768xf32>
    %552 = arith.maximumf %550, %551 : vector<2x768xf32>
    %553 = arith.truncf %552 : vector<2x768xf32> to vector<2x768xbf16>
    %c0_68 = arith.constant 0 : index
    %c0_69 = arith.constant 0 : index
    %554 = vector.load %arg8[%c0_68, %c0_69] : memref<768x128xbf16, #tpu.memory_space<vmem>>, vector<768x128xbf16>
    %cst_70 = arith.constant dense<0.000000e+00> : vector<2x128xf32>
    %555 = tpu.matmul %553, %554, %cst_70 {dimension_numbers = #tpu.dot_dimension_numbers<[1], [0], [0], [1], [0, 0, 1, 1], [], []>} : vector<2x768xbf16>, vector<768x128xbf16>, vector<2x128xf32> -> vector<2x128xf32>
    %c0_71 = arith.constant 0 : index
    %c0_72 = arith.constant 0 : index
    %556 = vector.load %arg9[%c0_71, %c0_72] : memref<1x128xf32, #tpu.memory_space<vmem>>, vector<1x128xf32>
    %557 = vector.broadcast %556 : vector<1x128xf32> to vector<2x128xf32>
    %558 = arith.addf %555, %557 : vector<2x128xf32>
    %c0_73 = arith.constant 0 : index
    %c0_74 = arith.constant 0 : index
    %559 = vector.load %arg10[%c0_73, %c0_74] : memref<2x128xf32, #tpu.memory_space<vmem>>, vector<2x128xf32>
    tpu.vector_store %arg10[%c0_73, %c0_74], %558 {strides = array<i32>} : memref<2x128xf32, #tpu.memory_space<vmem>>, vector<2x128xf32>,
    return
  }
  func.func @transform_0(%arg0: i32) -> (i32, i32, i32) {
    %c0_i32 = arith.constant 0 : i32
    %c0_i32_0 = arith.constant 0 : i32
    %c0_i32_1 = arith.constant 0 : i32
    %c0_i32_2 = arith.constant 0 : i32
    return %c0_i32, %c0_i32_0, %c0_i32_1 : i32, i32, i32
  }
  func.func @transform_1(%arg0: i32) -> (i32, i32) {
    %c0_i32 = arith.constant 0 : i32
    %c0_i32_0 = arith.constant 0 : i32
    %c0_i32_1 = arith.constant 0 : i32
    return %c0_i32, %c0_i32_0 : i32, i32
  }
  func.func @transform_2(%arg0: i32) -> (i32, i32) {
    %c0_i32 = arith.constant 0 : i32
    %c0_i32_0 = arith.constant 0 : i32
    %c0_i32_1 = arith.constant 0 : i32
    return %c0_i32, %c0_i32_0 : i32, i32
  }
  func.func @transform_3(%arg0: i32) -> (i32, i32) {
    %c0_i32 = arith.constant 0 : i32
    %c0_i32_0 = arith.constant 0 : i32
    %c0_i32_1 = arith.constant 0 : i32
    return %c0_i32, %c0_i32_0 : i32, i32
  }
  func.func @transform_4(%arg0: i32) -> (i32, i32) {
    %c0_i32 = arith.constant 0 : i32
    %c0_i32_0 = arith.constant 0 : i32
    %c0_i32_1 = arith.constant 0 : i32
    return %c0_i32, %c0_i32_0 : i32, i32
  }
  func.func @transform_5(%arg0: i32) -> (i32, i32) {
    %c0_i32 = arith.constant 0 : i32
    %c0_i32_0 = arith.constant 0 : i32
    %c0_i32_1 = arith.constant 0 : i32
    return %c0_i32, %c0_i32_0 : i32, i32
  }
  func.func @transform_6(%arg0: i32) -> (i32, i32) {
    %c0_i32 = arith.constant 0 : i32
    %c0_i32_0 = arith.constant 0 : i32
    %c0_i32_1 = arith.constant 0 : i32
    return %c0_i32, %c0_i32_0 : i32, i32
  }
  func.func @transform_7(%arg0: i32) -> (i32, i32) {
    %c0_i32 = arith.constant 0 : i32
    %c0_i32_0 = arith.constant 0 : i32
    %c0_i32_1 = arith.constant 0 : i32
    return %c0_i32, %c0_i32_0 : i32, i32
  }
  func.func @transform_8(%arg0: i32) -> (i32, i32) {
    %c0_i32 = arith.constant 0 : i32
    %c0_i32_0 = arith.constant 0 : i32
    %c0_i32_1 = arith.constant 0 : i32
    return %c0_i32, %c0_i32_0 : i32, i32
  }
  func.func @transform_9(%arg0: i32) -> (i32, i32) {
    %c0_i32 = arith.constant 0 : i32
    %c0_i32_0 = arith.constant 0 : i32
    %c0_i32_1 = arith.constant 0 : i32
    return %c0_i32, %c0_i32_0 : i32, i32
  }
}

</mosaic_0001>

<bundles_post_ra>
// kernel: tpu_custom_call.1
= control target key start
LH: loop header
LB: loop body
LE: loop exit
PB: predicated region body
PF: predicated region fallthrough
CT: control target
= control target key end

     0   :  { %14 = vsyncpa [#allocation3], 0  ;;  %s4315_s0 = inlined_call_operand.hbm [shape: bf16[64,2,128], index: 0, kind: input, shape index: {}]   ;;  %s4316_s1 = inlined_call_operand.hbm [shape: bf16[128,128], index: 1, kind: input, shape index: {}]   ;;  %s4317_s2 = inlined_call_operand.vmem [shape: f32[1,128], index: 2, kind: input, shape index: {}]   ;;  %s4318_s3 = inlined_call_operand.vmem [shape: f32[1,128], index: 3, kind: input, shape index: {}]   ;;  %s4319_s4 = inlined_call_operand.hbm [shape: bf16[512,768], index: 4, kind: input, shape index: {}]   ;;  %s4320_s5 = inlined_call_operand.vmem [shape: f32[1,768], index: 5, kind: input, shape index: {}]   ;;  %s4321_s6 = inlined_call_operand.vmem [shape: f32[1,768], index: 6, kind: input, shape index: {}]   ;;  %s4322_s7 = inlined_call_operand.hbm [shape: bf16[768,128], index: 7, kind: input, shape index: {}]   ;;  %s4323_s8 = inlined_call_operand.vmem [shape: f32[1,128], index: 8, kind: input, shape index: {}]   ;;  %s4324_s9 = inlined_call_operand.hbm [shape: f32[2,128], index: 9, kind: output, shape index: {}]  }
   0x1   :  { %15 = vsyncpa [#allocation6], 0 }
   0x2   :  { %16 = vsyncpa [#allocation9], 0 }
   0x3   :  { %17 = vsyncpa [#allocation4], 0  ;;  %s3806_s30 = smov [#allocation5]   ;;  %s3688_s13 = scalar_lea.hbm %s4316_s1, 1024 }
   0x4   :  { %s35_s10 = sshll.u32 %s3806_s30, 4  ;;  %p3689_p0 = scmp.ne.s32.totalorder %s4316_s1, %s3688_s13  ;;  %s36_s10 = int_to_ptr.vmem [resolvable:$true] %s35_s10 }
   0x5   :  { %p3692_p1 = scmp.lt.u32.totalorder %s3688_s13, %s4316_s1 }
   0x7   :  { %p3694_p2 = pnand %p3692_p1, %p3689_p0 }
   0x9   :  { %3697 = shalt.err (!%p3694_p2)
}
   0xa   :  { %s3698_s18 = scalar_lea.vmem %s36_s10, 1024  ;;  %p3703_p4 = scmp.lt.s32.totalorder %s36_s10, %s36_s10 }
   0xb   :  { %p3699_p3 = scmp.ne.s32.totalorder %s36_s10, %s3698_s18  ;;  %p3704_p5 = scmp.lt.s32.totalorder %s3698_s18, %s3698_s18 }
   0xd   :  { %p3705_p6 = por %p3704_p5, %p3703_p4 }
   0xf   :  { %p3706_p7 = pnand %p3705_p6, %p3699_p3 }
  0x11   :  { %3709 = shalt.err (!%p3706_p7)
}
  0x12   :  { %s3807_s19 = smov 64   ;;  %s3808_s20 = smov 4  }
  0x13   :  { %41 = dma.hbm_to_vmem [thread:$0]  %s4316_s1, 1024, %s36_s10, [#allocation6], %s3807_s19, %s3807_s19, %s3808_s20  }
  0x14   :  { %s3809_s23 = smov [#allocation2]   ;;  %s3710_s27 = scalar_lea.hbm %s4315_s0, 1024 }
  0x15   :  { %s23_s24 = sshll.u32 %s3809_s23, 4  ;;  %p3711_p8 = scmp.ne.s32.totalorder %s4315_s0, %s3710_s27  ;;  %s24_s24 = int_to_ptr.vmem [resolvable:$true] %s23_s24 }
  0x16   :  { %p3714_p9 = scmp.lt.u32.totalorder %s3710_s27, %s4315_s0 }
  0x18   :  { %p3716_p10 = pnand %p3714_p9, %p3711_p8 }
  0x1a   :  { %3719 = shalt.err (!%p3716_p10)
}
  0x1b   :  { %s3720_s12 = scalar_lea.vmem %s24_s24, 1024  ;;  %p3725_p12 = scmp.lt.s32.totalorder %s24_s24, %s24_s24 }
  0x1c   :  { %p3721_p11 = scmp.ne.s32.totalorder %s24_s24, %s3720_s12  ;;  %p3726_p13 = scmp.lt.s32.totalorder %s3720_s12, %s3720_s12 }
  0x1e   :  { %p3727_p0 = por %p3726_p13, %p3725_p12 }
  0x20   :  { %p3728_p1 = pnand %p3727_p0, %p3721_p11 }
  0x22   :  { %3731 = shalt.err (!%p3728_p1)
}
  0x23   :  { %s3810_s1 = smov 16   ;;  %s3811_s10 = smov 1  }
  0x24   :  { %29 = dma.hbm_to_vmem [thread:$0]  %s4315_s0, 1024, %s24_s24, [#allocation3], %s3810_s1, %s3810_s1, %s3811_s10  }
  0x25   :  { %s3812_s15 = smov [#allocation7]   ;;  %s3732_s21 = scalar_lea.hbm %s4319_s4, 24576 }
  0x26   :  { %s51_s16 = sshll.u32 %s3812_s15, 4  ;;  %p3733_p2 = scmp.ne.s32.totalorder %s4319_s4, %s3732_s21  ;;  %s52_s16 = int_to_ptr.vmem [resolvable:$true] %s51_s16 }
  0x27   :  { %p3736_p3 = scmp.lt.u32.totalorder %s3732_s21, %s4319_s4 }
  0x29   :  { %p3738_p4 = pnand %p3736_p3, %p3733_p2 }
  0x2b   :  { %3741 = shalt.err (!%p3738_p4)
}
  0x2c   :  { %s3742_s27 = scalar_lea.vmem %s52_s16, 24576  ;;  %p3747_p6 = scmp.lt.s32.totalorder %s52_s16, %s52_s16 }
  0x2d   :  { %p3743_p5 = scmp.ne.s32.totalorder %s52_s16, %s3742_s27  ;;  %p3748_p7 = scmp.lt.s32.totalorder %s3742_s27, %s3742_s27 }
  0x2f   :  { %p3749_p8 = por %p3748_p7, %p3747_p6 }
  0x31   :  { %p3750_p9 = pnand %p3749_p8, %p3743_p5 }
  0x33   :  { %3753 = shalt.err (!%p3750_p9)
}
  0x34   :  { %s3813_s0 = smov 384   ;;  %s3814_s24 = smov 24  }
  0x35   :  { %57 = dma.hbm_to_vmem [thread:$0]  %s4319_s4, 24576, %s52_s16, [#allocation6], %s3813_s0, %s3813_s0, %s3814_s24  }
  0x36   :  { %s3815_s30 = smov [#allocation8]   ;;  %s3754_s10 = scalar_lea.hbm %s4322_s7, 6144 }
  0x37   :  { %s67_s11 = sshll.u32 %s3815_s30, 4  ;;  %p3755_p10 = scmp.ne.s32.totalorder %s4322_s7, %s3754_s10  ;;  %s68_s11 = int_to_ptr.vmem [resolvable:$true] %s67_s11 }
  0x38   :  { %p3758_p11 = scmp.lt.u32.totalorder %s3754_s10, %s4322_s7 }
  0x3a   :  { %p3760_p12 = pnand %p3758_p11, %p3755_p10 }
  0x3c   :  { %3763 = shalt.err (!%p3760_p12)
}
  0x3d   :  { %s3764_s18 = scalar_lea.vmem %s68_s11, 6144  ;;  %p3769_p0 = scmp.lt.s32.totalorder %s68_s11, %s68_s11 }
  0x3e   :  { %p3765_p13 = scmp.ne.s32.totalorder %s68_s11, %s3764_s18  ;;  %p3770_p1 = scmp.lt.s32.totalorder %s3764_s18, %s3764_s18 }
  0x40   :  { %p3771_p2 = por %p3770_p1, %p3769_p0 }
  0x42   :  { %p3772_p3 = pnand %p3771_p2, %p3765_p13 }
  0x44   :  { %3775 = shalt.err (!%p3772_p3)
}
  0x45   :  { %73 = dma.hbm_to_vmem [thread:$0]  %s4322_s7, 6144, %s68_s11, [#allocation9], %s3807_s19, %s3807_s19, %s3808_s20  }
  0x46   :  { %3798 = dma.done.wait [#allocation3], 1024  }
  0x47   :  { %3799 = vsyncadd [#allocation3], 4294966272 }
  0x48   :  { %3800 = dma.done.wait [#allocation6], 25600  }
  0x49   :  { %3801 = vsyncadd [#allocation6], 4294941696 }
  0x4a   :  { %3802 = dma.done.wait [#allocation9], 6144  }
  0x4b   :  { %3803 = vsyncadd [#allocation9], 4294961152  ;;  %v3816_v0 = vmov 0.0   ;;  %vm3817_vm0 = vmmov 0   ;;  %v3930_v1 = vld [vmem:[#allocation5] sm:$0xff]   ;;  %v3934_v2 = vld [vmem:[#allocation5 + $0x8] sm:$0xff]  }
  0x4c   :  { %3220 = vmatprep.subr.bf16.mxu0 %v3816_v0  ;;  %3240 = vmatprep.subr.bf16.mxu1 %v3816_v0  ;;  %v3940_v3 = vld [vmem:[#allocation5 + $0x10] sm:$0xff]   ;;  %v89_v4 = vld [vmem:[#allocation2] sm:$0x1]  ;;  %v90_v5 = vld [vmem:[#allocation2 + $0x1] sm:$0x1]  ;;  %v3818_v7 = vmov 0  }
  0x4d   :  { %3236 = vmatprep.mubr.msk.bf16.mxu0 %vm3817_vm0, %v3816_v0  ;;  %3256 = vmatprep.mubr.msk.bf16.mxu1 %vm3817_vm0, %v3816_v0  ;;  %v91_v6 = vld [vmem:[#allocation2 + $0x2] sm:$0x1]  ;;  %v153_v8 = vmax.bf16 %v3818_v7, %v89_v4  ;;  %v154_v9 = vmax.bf16 %v3818_v7, %v90_v5  ;;  %v3948_v10 = vld [vmem:[#allocation5 + $0x18] sm:$0xff]   ;;  %v92_v12 = vld [vmem:[#allocation2 + $0x3] sm:$0x1]  ;;  %vm613_vm1 = vcmask 1041408  }
  0x4e   :  { %3221 = vmatpush3.bf16.msra.mxu0 %v3930_v1  ;;  %3241 = vmatpush3.bf16.msra.mxu1 %v3930_v1  ;;  %v155_v11 = vmax.bf16 %v3818_v7, %v91_v6  ;;  %v93_v15 = vld [vmem:[#allocation2 + $0x4] sm:$0x1]  ;;  %v97_v17 = vld [vmem:[#allocation2 + $0x8] sm:$0x1]  ;;  %v94_v18 = vld [vmem:[#allocation2 + $0x5] sm:$0x1]  ;;  %v156_v21 = vmax.bf16 %v3818_v7, %v92_v12 }
  0x4f   :  { %3222 = vmatprep.subr.bf16.mxu0 %v3816_v0  ;;  %3242 = vmatprep.subr.bf16.mxu1 %v3816_v0  ;;  %v217_v13 = vunpack.c.l.bf16 %v153_v8  ;;  %v219_v14 = vunpack.c.l.bf16 %v154_v9  ;;  %v3955_v16 = vld [vmem:[#allocation5 + $0x20] sm:$0xff]   ;;  %v114_v20 = vld [vmem:[#allocation2 + $0x19] sm:$0x1]  ;;  %v98_v24 = vld [vmem:[#allocation2 + $0x9] sm:$0x1]  ;;  %v157_v25 = vmax.bf16 %v3818_v7, %v93_v15  ;;  %v161_v30 = vmax.bf16 %v3818_v7, %v97_v17  ;;  %s3819_s25 = smov [#allocation10]  }
  0x50   :  { %v95_v19 = vld [vmem:[#allocation2 + $0x6] sm:$0x1]  ;;  %v221_v22 = vunpack.c.l.bf16 %v155_v11  ;;  %v96_v23 = vld [vmem:[#allocation2 + $0x7] sm:$0x1]  ;;  %v99_v27 = vld [vmem:[#allocation2 + $0xa] sm:$0x1]  ;;  %v158_v34 = vmax.bf16 %v3818_v7, %v94_v18  ;;  %v3971_v36 = vmax.bf16 %v3818_v7, %v114_v20  ;;  %v162_v41 = vmax.bf16 %v3818_v7, %v98_v24 }
  0x51   :  { %v220_v26 = vadd.f32 %v219_v14, %v217_v13  ;;  %v113_v28 = vld [vmem:[#allocation2 + $0x18] sm:$0x1]  ;;  %v115_v29 = vld [vmem:[#allocation2 + $0x1a] sm:$0x1]  ;;  %v3964_v31 = vld [vmem:[#allocation5 + $0x28] sm:$0xff]   ;;  %v3968_v35 = vmax.bf16 %v3818_v7, %v95_v19  ;;  %v3976_v40 = vmax.bf16 %v3818_v7, %v96_v23  ;;  %v223_v43 = vunpack.c.l.bf16 %v156_v21  ;;  %s2856_s26 = sshll.u32 %s3819_s25, 4  ;;  %s2857_s26 = int_to_ptr.vmem [resolvable:$true] %s2856_s26 }
  0x52   :  { %3223 = vmatpush3.bf16.msra.mxu0 %v3934_v2  ;;  %3243 = vmatpush3.bf16.msra.mxu1 %v3934_v2  ;;  %v100_v32 = vld [vmem:[#allocation2 + $0xb] sm:$0x1]  ;;  %v101_v33 = vld [vmem:[#allocation2 + $0xc] sm:$0x1]  ;;  %v102_v37 = vld [vmem:[#allocation2 + $0xd] sm:$0x1]  ;;  %v163_v46 = vmax.bf16 %v3818_v7, %v99_v27  ;;  %v3981_v47 = vmax.bf16 %v3818_v7, %v113_v28  ;;  %v3984_v48 = vmax.bf16 %v3818_v7, %v115_v29  ;;  %v225_v49 = vunpack.c.l.bf16 %v157_v25  ;;  %p3781_p5 = scmp.lt.s32.totalorder %s2857_s26, %s2857_s26 }
  0x53   :  { %3224 = vmatprep.subr.bf16.mxu0 %v3816_v0  ;;  %3244 = vmatprep.subr.bf16.mxu1 %v3816_v0  ;;  %v103_v38 = vld [vmem:[#allocation2 + $0xe] sm:$0x1]  ;;  %v104_v39 = vld [vmem:[#allocation2 + $0xf] sm:$0x1]  ;;  %v222_v42 = vadd.f32 %v221_v22, %v220_v26  ;;  %v105_v44 = vld [vmem:[#allocation2 + $0x10] sm:$0x1]  ;;  %v3987_v51 = vmax.bf16 %v3818_v7, %v100_v32  ;;  %v3990_v52 = vmax.bf16 %v3818_v7, %v101_v33  ;;  %v227_v54 = vunpack.c.l.bf16 %v161_v30 }
  0x54   :  { %v106_v45 = vld [vmem:[#allocation2 + $0x11] sm:$0x1]  ;;  %v116_v50 = vld [vmem:[#allocation2 + $0x1b] sm:$0x1]  ;;  %v3997_v56 = vmax.bf16 %v3818_v7, %v102_v37  ;;  %v4000_v57 = vmax.bf16 %v3818_v7, %v103_v38  ;;  %v4003_v58 = vmax.bf16 %v3818_v7, %v104_v39  ;;  %v249_v59 = vunpack.c.l.bf16 %v3971_v36  ;;  %v117_v60 = vld [vmem:[#allocation2 + $0x1c] sm:$0x1] }
  0x55   :  { %v224_v53 = vadd.f32 %v223_v43, %v222_v42  ;;  %v3994_v55 = vld [vmem:[#allocation5 + $0x30] sm:$0xff]   ;;  %v121_v61 = vld [vmem:[#allocation2 + $0x20] sm:$0x1]  ;;  %v4009_v62 = vmax.bf16 %v3818_v7, %v105_v44  ;;  %v4012_v63 = vmax.bf16 %v3818_v7, %v106_v45  ;;  %v229_v5 = vunpack.c.l.bf16 %v162_v41  ;;  %v122_v14 = vld [vmem:[#allocation2 + $0x21] sm:$0x1]  ;;  %s3776_s27 = scalar_lea.vmem %s2857_s26, 32 }
  0x56   :  { %3225 = vmatpush3.bf16.msra.mxu0 %v3940_v3  ;;  %3245 = vmatpush3.bf16.msra.mxu1 %v3940_v3  ;;  %v107_v6 = vld [vmem:[#allocation2 + $0x12] sm:$0x1]  ;;  %v180_v8 = vmax.bf16 %v3818_v7, %v116_v50  ;;  %v247_v9 = vunpack.c.l.bf16 %v3981_v47  ;;  %v251_v11 = vunpack.c.l.bf16 %v3984_v48  ;;  %v374_v12 = vadd.f32 %v225_v49, %v223_v43  ;;  %v108_v13 = vld [vmem:[#allocation2 + $0x13] sm:$0x1]  ;;  %v4020_v20 = vld [vmem:[#allocation5 + $0x38] sm:$0xff]   ;;  %p3777_p4 = scmp.ne.s32.totalorder %s2857_s26, %s3776_s27  ;;  %p3782_p6 = scmp.lt.s32.totalorder %s3776_s27, %s3776_s27 }
  0x57   :  { %3226 = vmatprep.subr.bf16.mxu0 %v3816_v0  ;;  %3246 = vmatprep.subr.bf16.mxu1 %v3816_v0  ;;  %v226_v4 = vadd.f32 %v225_v49, %v224_v53  ;;  %v231_v17 = vunpack.c.l.bf16 %v163_v46  ;;  %v375_v18 = vunpack.c.l.bf16 %v158_v34  ;;  %v377_v19 = vunpack.c.l.bf16 %v3968_v35  ;;  %v109_v21 = vld [vmem:[#allocation2 + $0x14] sm:$0x1]  ;;  %v123_v25 = vld [vmem:[#allocation2 + $0x22] sm:$0x1]  ;;  %v124_v30 = vld [vmem:[#allocation2 + $0x23] sm:$0x1] }
  0x58   :  { %v181_v22 = vmax.bf16 %v3818_v7, %v117_v60  ;;  %v4024_v23 = vmax.bf16 %v3818_v7, %v121_v61  ;;  %v456_v24 = vadd.f32 %v249_v59, %v247_v9  ;;  %v4033_v26 = vmax.bf16 %v3818_v7, %v107_v6  ;;  %v125_v32 = vld [vmem:[#allocation2 + $0x24] sm:$0x1]  ;;  %v129_v38 = vld [vmem:[#allocation2 + $0x28] sm:$0x1]  ;;  %v118_v49 = vld [vmem:[#allocation2 + $0x1d] sm:$0x1]  ;;  %p3783_p7 = por %p3782_p6, %p3781_p5 }
  0x59   :  { %v228_v15 = vadd.f32 %v227_v54, %v226_v4  ;;  %v376_v28 = vadd.f32 %v375_v18, %v374_v12  ;;  %v379_v29 = vunpack.c.l.bf16 %v3976_v40  ;;  %v4037_v33 = vmax.bf16 %v3818_v7, %v108_v13  ;;  %v119_v6 = vld [vmem:[#allocation2 + $0x1e] sm:$0x1] }
  0x5a   :  { %3227 = vmatpush3.bf16.msra.mxu0 %v3948_v10  ;;  %3247 = vmatpush3.bf16.msra.mxu1 %v3948_v10  ;;  %v4040_v34 = vmax.bf16 %v3818_v7, %v122_v14  ;;  %v4042_v35 = vunpack.c.l.bf16 %v180_v8  ;;  %v457_v37 = vadd.f32 %v456_v24, %v251_v11  ;;  %v4047_v39 = vmax.bf16 %v3818_v7, %v109_v21  ;;  %v120_v21 = vld [vmem:[#allocation2 + $0x1f] sm:$0x1]  ;;  %p3784_p8 = pnand %p3783_p7, %p3777_p4 }
  0x5b   :  { %3228 = vmatprep.subr.bf16.mxu0 %v3816_v0  ;;  %3248 = vmatprep.subr.bf16.mxu1 %v3816_v0  ;;  %v230_v27 = vadd.f32 %v229_v5, %v228_v15  ;;  %v233_v40 = vunpack.c.l.bf16 %v3987_v51  ;;  %v378_v42 = vadd.f32 %v377_v19, %v376_v28  ;;  %v4053_v43 = vmax.bf16 %v3818_v7, %v123_v25  ;;  %v110_v15 = vld [vmem:[#allocation2 + $0x15] sm:$0x1] }
  0x5c   :  { %v4055_v44 = vunpack.c.l.bf16 %v181_v22  ;;  %v257_v45 = vunpack.c.l.bf16 %v4024_v23  ;;  %v458_v46 = vadd.f32 %v457_v37, %v4042_v35  ;;  %v235_v51 = vunpack.c.l.bf16 %v3990_v52  ;;  %v130_v52 = vld [vmem:[#allocation2 + $0x29] sm:$0x1] }
  0x5d   :  { %v232_v41 = vadd.f32 %v231_v17, %v230_v27  ;;  %v237_v53 = vunpack.c.l.bf16 %v4009_v62  ;;  %v380_v54 = vadd.f32 %v379_v29, %v378_v42  ;;  %v188_v60 = vmax.bf16 %v3818_v7, %v124_v30  ;;  %v131_v27 = vld [vmem:[#allocation2 + $0x2a] sm:$0x1] }
  0x5e   :  { %3229 = vmatpush3.bf16.msra.mxu0 %v3955_v16  ;;  %3249 = vmatpush3.bf16.msra.mxu1 %v3955_v16  ;;  %v189_v61 = vmax.bf16 %v3818_v7, %v125_v32  ;;  %v259_v4 = vunpack.c.l.bf16 %v4040_v34  ;;  %v459_v5 = vadd.f32 %v458_v46, %v4055_v44  ;;  %v239_v12 = vunpack.c.l.bf16 %v4012_v63  ;;  %v111_v63 = vld [vmem:[#allocation2 + $0x16] sm:$0x1] }
  0x5f   :  { %3230 = vmatprep.subr.bf16.mxu0 %v3816_v0  ;;  %3250 = vmatprep.subr.bf16.mxu1 %v3816_v0  ;;  %v234_v50 = vadd.f32 %v233_v40, %v232_v41  ;;  %v381_v13 = vadd.f32 %v380_v54, %v233_v40  ;;  %v383_v14 = vunpack.c.l.bf16 %v3997_v56  ;;  %v193_v62 = vmax.bf16 %v3818_v7, %v129_v38  ;;  %v112_v41 = vld [vmem:[#allocation2 + $0x17] sm:$0x1] }
  0x60   :  { %v241_v17 = vunpack.c.l.bf16 %v4033_v26  ;;  %v261_v18 = vunpack.c.l.bf16 %v4053_v43  ;;  %v460_v19 = vadd.f32 %v459_v5, %v257_v45  ;;  %v385_v25 = vunpack.c.l.bf16 %v4000_v57 }
  0x61   :  { %v236_v8 = vadd.f32 %v235_v51, %v234_v50  ;;  %v382_v24 = vadd.f32 %v381_v13, %v235_v51  ;;  %v4076_v56 = vmax.bf16 %v3818_v7, %v118_v49  ;;  %v243_v28 = vunpack.c.l.bf16 %v4037_v33  ;;  %v126_v50 = vld [vmem:[#allocation2 + $0x25] sm:$0x1]  ;;  %v132_v51 = vld [vmem:[#allocation2 + $0x2b] sm:$0x1]  ;;  %v133_v13 = vld [vmem:[#allocation2 + $0x2c] sm:$0x1] }
  0x62   :  { %3231 = vmatpush3.bf16.msra.mxu0 %v3964_v31  ;;  %3251 = vmatpush3.bf16.msra.mxu1 %v3964_v31  ;;  %v245_v29 = vunpack.c.l.bf16 %v4047_v39  ;;  %v4080_v26 = vunpack.c.l.bf16 %v188_v60  ;;  %v461_v30 = vadd.f32 %v460_v19, %v259_v4  ;;  %v387_v38 = vunpack.c.l.bf16 %v4003_v58 }
  0x63   :  { %3232 = vmatprep.subr.bf16.mxu0 %v3816_v0  ;;  %3252 = vmatprep.subr.bf16.mxu1 %v3816_v0  ;;  %v238_v22 = vadd.f32 %v237_v53, %v236_v8  ;;  %v384_v37 = vadd.f32 %v383_v14, %v382_v24  ;;  %v4086_v57 = vmax.bf16 %v3818_v7, %v119_v6  ;;  %v4088_v40 = vunpack.c.l.bf16 %v189_v61  ;;  %v137_v14 = vld [vmem:[#allocation2 + $0x30] sm:$0x1] }
  0x64   :  { %v462_v33 = vadd.f32 %v461_v30, %v261_v18  ;;  %v174_v39 = vmax.bf16 %v3818_v7, %v110_v15  ;;  %v194_v42 = vmax.bf16 %v3818_v7, %v130_v52  ;;  %v4095_v53 = vmax.bf16 %v3818_v7, %v120_v21 }
  0x65   :  { %v240_v32 = vadd.f32 %v239_v12, %v238_v22  ;;  %v386_v49 = vadd.f32 %v385_v25, %v384_v37  ;;  %v399_v58 = vunpack.c.l.bf16 %v4076_v56  ;;  %v465_v60 = vunpack.c.l.bf16 %v193_v62  ;;  %v127_v12 = vld [vmem:[#allocation2 + $0x26] sm:$0x1]  ;;  %v128_v25 = vld [vmem:[#allocation2 + $0x27] sm:$0x1] }
  0x66   :  { %3233 = vmatpush3.bf16.msra.mxu0 %v3994_v55  ;;  %3253 = vmatpush3.bf16.msra.mxu1 %v3994_v55  ;;  %v463_v54 = vadd.f32 %v462_v33, %v4080_v26  ;;  %v175_v61 = vmax.bf16 %v3818_v7, %v111_v63  ;;  %v195_v5 = vmax.bf16 %v3818_v7, %v131_v27  ;;  %v401_v15 = vunpack.c.l.bf16 %v4086_v57  ;;  %v138_v63 = vld [vmem:[#allocation2 + $0x31] sm:$0x1] }
  0x67   :  { %3234 = vmatprep.subr.bf16.mxu0 %v3816_v0  ;;  %3254 = vmatprep.subr.bf16.mxu1 %v3816_v0  ;;  %v242_v46 = vadd.f32 %v241_v17, %v240_v32  ;;  %v388_v8 = vadd.f32 %v387_v38, %v386_v49  ;;  %v538_v52 = vadd.f32 %v4055_v44, %v4042_v35  ;;  %v391_v21 = vunpack.c.l.bf16 %v174_v39 }
  0x68   :  { %v464_v17 = vadd.f32 %v463_v54, %v4088_v40  ;;  %v176_v19 = vmax.bf16 %v3818_v7, %v112_v41  ;;  %v467_v62 = vunpack.c.l.bf16 %v194_v42  ;;  %v403_v27 = vunpack.c.l.bf16 %v4095_v53 }
  0x69   :  { %v244_v6 = vadd.f32 %v243_v28, %v242_v46  ;;  %v389_v24 = vadd.f32 %v388_v8, %v243_v28  ;;  %v539_v30 = vadd.f32 %v538_v52, %v399_v58  ;;  %v4110_v37 = vmax.bf16 %v3818_v7, %v126_v50 }
  0x6a   :  { %3235 = vmatpush3.bf16.msra.mxu0 %v4020_v20  ;;  %3255 = vmatpush3.bf16.msra.mxu1 %v4020_v20  ;;  %v466_v32 = vadd.f32 %v465_v60, %v464_v17  ;;  %v196_v38 = vmax.bf16 %v3818_v7, %v132_v51  ;;  %v469_v33 = vunpack.c.l.bf16 %v195_v5  ;;  %v393_v42 = vunpack.c.l.bf16 %v175_v61  ;;  %v139_v60 = vld [vmem:[#allocation2 + $0x32] sm:$0x1] }
  0x6b   :  { %3260 = vmatprep.subr.bf16.mxu0 %v3816_v0  ;;  %3280 = vmatprep.subr.bf16.mxu1 %v3816_v0  ;;  %v246_v22 = vadd.f32 %v245_v29, %v244_v6  ;;  %v390_v39 = vadd.f32 %v389_v24, %v245_v29  ;;  %v540_v28 = vadd.f32 %v539_v30, %v401_v15  ;;  %v395_v47 = vunpack.c.l.bf16 %v176_v19  ;;  %v140_v24 = vld [vmem:[#allocation2 + $0x33] sm:$0x1] }
  0x6c   :  { %v4118_v46 = vmax.bf16 %v3818_v7, %v127_v12  ;;  %v197_v49 = vmax.bf16 %v3818_v7, %v133_v13  ;;  %v201_v54 = vmax.bf16 %v3818_v7, %v137_v14  ;;  %v468_v50 = vadd.f32 %v467_v62, %v466_v32  ;;  %v134_v13 = vld [vmem:[#allocation2 + $0x2d] sm:$0x1] }
  0x6d   :  { %v248_v41 = vadd.f32 %v247_v9, %v246_v22  ;;  %v392_v5 = vadd.f32 %v391_v21, %v390_v39  ;;  %v541_v9 = vadd.f32 %v540_v28, %v403_v27  ;;  %v4127_v29 = vmax.bf16 %v3818_v7, %v128_v25  ;;  %v135_v22 = vld [vmem:[#allocation2 + $0x2e] sm:$0x1] }
  0x6e   :  { %v202_v61 = vmax.bf16 %v3818_v7, %v138_v63  ;;  %v470_v6 = vadd.f32 %v469_v33, %v468_v50  ;;  %v471_v8 = vunpack.c.l.bf16 %v196_v38  ;;  %v407_v36 = vunpack.c.l.bf16 %v4110_v37  ;;  %v136_v38 = vld [vmem:[#allocation2 + $0x2f] sm:$0x1] }
  0x6f   :  { %v250_v51 = vadd.f32 %v249_v59, %v248_v41  ;;  %v394_v14 = vadd.f32 %v393_v42, %v392_v5  ;;  %v542_v59 = vadd.f32 %v541_v9, %v4080_v26  ;;  %v409_v52 = vunpack.c.l.bf16 %v4118_v46 }
  0x70   :  { %v472_v17 = vadd.f32 %v471_v8, %v470_v6  ;;  %v473_v19 = vunpack.c.l.bf16 %v197_v49  ;;  %v475_v21 = vunpack.c.l.bf16 %v201_v54  ;;  %v203_v48 = vmax.bf16 %v3818_v7, %v139_v60 }
  0x71   :  { %v252_v12 = vadd.f32 %v251_v11, %v250_v51  ;;  %v396_v25 = vadd.f32 %v395_v47, %v394_v14  ;;  %v543_v63 = vadd.f32 %v542_v59, %v4088_v40  ;;  %v477_v30 = vunpack.c.l.bf16 %v202_v61  ;;  %v141_v47 = vld [vmem:[#allocation2 + $0x34] sm:$0x1]  ;;  %v142_v59 = vld [vmem:[#allocation2 + $0x35] sm:$0x1] }
  0x72   :  { %v474_v11 = vadd.f32 %v473_v19, %v472_v17  ;;  %v411_v41 = vunpack.c.l.bf16 %v4127_v29  ;;  %v198_v42 = vmax.bf16 %v3818_v7, %v134_v13  ;;  %v479_v60 = vunpack.c.l.bf16 %v203_v48 }
  0x73   :  { %v254_v62 = vadd.f32 %v4042_v35, %v252_v12  ;;  %v397_v33 = vadd.f32 %v396_v25, %v4042_v35  ;;  %v544_v39 = vadd.f32 %v543_v63, %v407_v36  ;;  %v199_v51 = vmax.bf16 %v3818_v7, %v135_v22  ;;  %v146_v22 = vld [vmem:[#allocation2 + $0x39] sm:$0x1]  ;;  %v144_v63 = vld [vmem:[#allocation2 + $0x37] sm:$0x1] }
  0x74   :  { %v476_v28 = vadd.f32 %v475_v21, %v474_v11  ;;  %v204_v35 = vmax.bf16 %v3818_v7, %v140_v24  ;;  %v549_v6 = vunpack.c.l.bf16 %v198_v42  ;;  %v205_v24 = vmax.bf16 %v3818_v7, %v141_v47 }
  0x75   :  { %v256_v32 = vadd.f32 %v4055_v44, %v254_v62  ;;  %v398_v54 = vadd.f32 %v397_v33, %v4055_v44  ;;  %v545_v50 = vadd.f32 %v544_v39, %v409_v52  ;;  %v145_v44 = vld [vmem:[#allocation2 + $0x38] sm:$0x1]  ;;  %v551_v17 = vunpack.c.l.bf16 %v199_v51  ;;  %v143_v62 = vld [vmem:[#allocation2 + $0x36] sm:$0x1] }
  0x76   :  { %v478_v5 = vadd.f32 %v477_v30, %v476_v28  ;;  %v206_v48 = vmax.bf16 %v3818_v7, %v142_v59  ;;  %v148_v30 = vld [vmem:[#allocation2 + $0x3b] sm:$0x1]  ;;  %v210_v33 = vmax.bf16 %v3818_v7, %v146_v22  ;;  %v152_v59 = vld [vmem:[#allocation2 + $0x3f] sm:$0x1] }
  0x77   :  { %v258_v49 = vadd.f32 %v257_v45, %v256_v32  ;;  %v400_v61 = vadd.f32 %v399_v58, %v398_v54  ;;  %v546_v23 = vadd.f32 %v545_v50, %v411_v41  ;;  %v200_v45 = vmax.bf16 %v3818_v7, %v136_v38  ;;  %v149_v54 = vld [vmem:[#allocation2 + $0x3c] sm:$0x1] }
  0x78   :  { %v480_v34 = vadd.f32 %v479_v60, %v478_v5  ;;  %v483_v32 = vunpack.c.l.bf16 %v205_v24  ;;  %v207_v38 = vmax.bf16 %v3818_v7, %v143_v62  ;;  %v208_v60 = vmax.bf16 %v3818_v7, %v144_v63  ;;  %v150_v5 = vld [vmem:[#allocation2 + $0x3d] sm:$0x1]  ;;  %v3686_v63 = vld [vmem:[#allocation5 + $0x20] sm:$0xff]  }
  0x79   :  { %v260_v9 = vadd.f32 %v259_v4, %v258_v49  ;;  %v402_v13 = vadd.f32 %v401_v15, %v400_v61  ;;  %v547_v14 = vadd.f32 %v546_v23, %v471_v8  ;;  %v481_v4 = vunpack.c.l.bf16 %v204_v35  ;;  %v151_v61 = vld [vmem:[#allocation2 + $0x3e] sm:$0x1] }
  0x7a   :  { %v553_v43 = vunpack.c.l.bf16 %v200_v45  ;;  %v557_v51 = vunpack.c.l.bf16 %v206_v48  ;;  %v212_v37 = vmax.bf16 %v3818_v7, %v148_v30  ;;  %v216_v22 = vmax.bf16 %v3818_v7, %v152_v59  ;;  %v3687_v48 = vld [vmem:[#allocation5 + $0x28] sm:$0xff]   ;;  %v3391_v59 = vld [vmem:[#allocation7 + $0x1b8] ss:$24 sps:$4 sm:$0xff]  }
  0x7b   :  { %v262_v12 = vadd.f32 %v261_v18, %v260_v9  ;;  %v404_v58 = vadd.f32 %v403_v27, %v402_v13  ;;  %v548_v21 = vadd.f32 %v547_v14, %v473_v19  ;;  %v209_v18 = vmax.bf16 %v3818_v7, %v145_v44  ;;  %v147_v19 = vld [vmem:[#allocation2 + $0x3a] sm:$0x1]  ;;  %v3342_v30 = vld [vmem:[#allocation7 + $0x34] ss:$24 sps:$4 sm:$0xff]  }
  0x7c   :  { %v482_v25 = vadd.f32 %v481_v4, %v480_v34  ;;  %v211_v35 = vmax.bf16 %v3818_v7, %v147_v19  ;;  %v559_v9 = vunpack.c.l.bf16 %v207_v38  ;;  %v213_v44 = vmax.bf16 %v3818_v7, %v149_v54  ;;  %v3337_v19 = vld [vmem:[#allocation7 + $0x8] ss:$24 sps:$4 sm:$0xff]   ;;  %v3360_v54 = vld [vmem:[#allocation7 + $0xc4] ss:$24 sps:$4 sm:$0xff]  }
  0x7d   :  { %v264_v56 = vadd.f32 %v4080_v26, %v262_v12  ;;  %v405_v15 = vadd.f32 %v404_v58, %v4080_v26  ;;  %v550_v8 = vadd.f32 %v549_v6, %v548_v21  ;;  %v485_v39 = vunpack.c.l.bf16 %v209_v18  ;;  %v3340_v38 = vld [vmem:[#allocation7 + $0x30] ss:$24 sps:$4 sm:$0xff]  }
  0x7e   :  { %v484_v49 = vadd.f32 %v483_v32, %v482_v25  ;;  %v561_v6 = vunpack.c.l.bf16 %v208_v60  ;;  %v489_v12 = vunpack.c.l.bf16 %v211_v35  ;;  %v491_v13 = vunpack.c.l.bf16 %v212_v37  ;;  %v3361_v60 = vld [vmem:[#allocation7 + $0xc8] ss:$24 sps:$4 sm:$0xff]   ;;  %v3369_v35 = vld [vmem:[#allocation7 + $0xfc] ss:$24 sps:$4 sm:$0xff]  }
  0x7f   :  { %v266_v57 = vadd.f32 %v4088_v40, %v264_v56  ;;  %v406_v53 = vadd.f32 %v405_v15, %v4088_v40  ;;  %v552_v27 = vadd.f32 %v551_v17, %v550_v8  ;;  %v214_v34 = vmax.bf16 %v3818_v7, %v150_v5  ;;  %v3684_v15 = vld [vmem:[#allocation5 + $0x10] sm:$0xff]   ;;  %v3685_v8 = vld [vmem:[#allocation5 + $0x18] sm:$0xff]  }
  0x80   :  { %v486_v46 = vadd.f32 %v485_v39, %v484_v49  ;;  %v215_v56 = vmax.bf16 %v3818_v7, %v151_v61  ;;  %v569_v18 = vunpack.c.l.bf16 %v216_v22  ;;  %v3349_v39 = vld [vmem:[#allocation7 + $0x68] ss:$24 sps:$4 sm:$0xff]   ;;  %v3355_v49 = vld [vmem:[#allocation7 + $0x98] ss:$24 sps:$4 sm:$0xff]   ;;  %v3372_v5 = vld [vmem:[#allocation7 + $0x124] ss:$24 sps:$4 sm:$0xff]  }
  0x81   :  { %v267_v11 = vmul.f32 0.04, %v266_v57  ;;  %v408_v26 = vadd.f32 %v407_v36, %v406_v53  ;;  %v554_v28 = vadd.f32 %v553_v43, %v552_v27  ;;  %v487_v36 = vunpack.c.l.bf16 %v210_v33  ;;  %v3339_v53 = vld [vmem:[#allocation7 + $0xc] ss:$24 sps:$4 sm:$0xff]   ;;  %v3334_v27 = vld [vmem:[#allocation7] ss:$24 sps:$4 sm:$0xff]  }
  0x82   :  { %v565_v62 = vunpack.c.l.bf16 %v214_v34  ;;  %v567_v43 = vunpack.c.l.bf16 %v215_v56  ;;  %v3343_v33 = vld [vmem:[#allocation7 + $0x38] ss:$24 sps:$4 sm:$0xff]   ;;  %v3381_v61 = vld [vmem:[#allocation7 + $0x15c] ss:$24 sps:$4 sm:$0xff]   ;;  %v3397_v56 = vld [vmem:[#allocation7 + $0x1e8] ss:$24 sps:$4 sm:$0xff]  }
  0x83   :  { %v268_v42 = vpack.c.bf16 %v267_v11, %v267_v11  ;;  %v410_v40 = vadd.f32 %v409_v52, %v408_v26  ;;  %v555_v50 = vadd.f32 %v554_v28, %v481_v4  ;;  %v488_v29 = vadd.f32 %v487_v36, %v486_v46  ;;  %v3336_v11 = vld [vmem:[#allocation7 + $0x4] ss:$24 sps:$4 sm:$0xff]   ;;  %v3352_v28 = vld [vmem:[#allocation7 + $0x90] ss:$24 sps:$4 sm:$0xff]   ;;  %v3370_v46 = vld [vmem:[#allocation7 + $0x120] ss:$24 sps:$4 sm:$0xff]  }
  0x84   :  { %v493_v4 = vunpack.c.l.bf16 %v213_v44  ;;  %v3357_v26 = vld [vmem:[#allocation7 + $0x9c] ss:$24 sps:$4 sm:$0xff]   ;;  %v3364_v37 = vld [vmem:[#allocation7 + $0xf0] ss:$24 sps:$4 sm:$0xff]  }
  0x85   :  { %3237 = vmatmul.mubr.bf16.vlgmr.msra.gmra.mrb[0].mxu0 %v268_v42  ;;  %v412_v47 = vadd.f32 %v411_v41, %v410_v40  ;;  %v556_v52 = vadd.f32 %v555_v50, %v483_v32  ;;  %v490_v58 = vadd.f32 %v489_v12, %v488_v29  ;;  %v3345_v32 = vld [vmem:[#allocation7 + $0x3c] ss:$24 sps:$4 sm:$0xff]   ;;  %v3363_v40 = vld [vmem:[#allocation7 + $0xcc] ss:$24 sps:$4 sm:$0xff]   ;;  %v3358_v50 = vld [vmem:[#allocation7 + $0xc0] ss:$24 sps:$4 sm:$0xff]  }
  0x86   :  { %3261 = vmatpush3.bf16.msra.mxu0 %v3930_v1  ;;  %3276 = vmatprep.mubr.msk.bf16.mxu0 %vm3817_vm0, %v3816_v0  ;;  %v3354_v42 = vld [vmem:[#allocation7 + $0x94] ss:$24 sps:$4 sm:$0xff]   ;;  %v3367_v36 = vld [vmem:[#allocation7 + $0xf8] ss:$24 sps:$4 sm:$0xff]   ;;  %v3396_v34 = vld [vmem:[#allocation7 + $0x1e4] ss:$24 sps:$4 sm:$0xff]  }
  0x87   :  { %3262 = vmatprep.subr.bf16.mxu0 %v3816_v0  ;;  %v413_v23 = vmul.f32 0.04, %v412_v47  ;;  %v558_v45 = vadd.f32 %v557_v51, %v556_v52  ;;  %v3366_v51 = vld [vmem:[#allocation7 + $0xf4] ss:$24 sps:$4 sm:$0xff]   ;;  %v3373_v52 = vld [vmem:[#allocation7 + $0x128] ss:$24 sps:$4 sm:$0xff]  }
  0x88   :  { %v3375_v47 = vld [vmem:[#allocation7 + $0x12c] ss:$24 sps:$4 sm:$0xff]   ;;  %v3379_v44 = vld [vmem:[#allocation7 + $0x158] ss:$24 sps:$4 sm:$0xff]   ;;  %v3393_v29 = vld [vmem:[#allocation7 + $0x1bc] ss:$24 sps:$4 sm:$0xff]  }
  0x89   :  { %v414_v14 = vpack.c.bf16 %v413_v23, %v413_v23  ;;  %v560_v41 = vadd.f32 %v559_v9, %v558_v45  ;;  %v3378_v9 = vld [vmem:[#allocation7 + $0x154] ss:$24 sps:$4 sm:$0xff]   ;;  %v3376_v23 = vld [vmem:[#allocation7 + $0x150] ss:$24 sps:$4 sm:$0xff]   ;;  %v3384_v45 = vld [vmem:[#allocation7 + $0x184] ss:$24 sps:$4 sm:$0xff]  }
  0x8a   :  { %3263 = vmatpush3.bf16.msra.mxu0 %v3934_v2  ;;  %v3382_v12 = vld [vmem:[#allocation7 + $0x180] ss:$24 sps:$4 sm:$0xff]  }
  0x8b   :  { %3264 = vmatprep.subr.bf16.mxu0 %v3816_v0  ;;  %3257 = vmatmul.mubr.bf16.vlgmr.msra.gmra.mrb[0].mxu1 %v414_v14  ;;  %v562_v17 = vadd.f32 %v561_v6, %v560_v41  ;;  %v3387_v6 = vld [vmem:[#allocation7 + $0x18c] ss:$24 sps:$4 sm:$0xff]   ;;  %v3388_v41 = vld [vmem:[#allocation7 + $0x1b0] ss:$24 sps:$4 sm:$0xff]  }
  0x8c   :  { %3281 = vmatpush3.bf16.msra.mxu1 %v3930_v1  ;;  %3296 = vmatprep.mubr.msk.bf16.mxu1 %vm3817_vm0, %v3816_v0  ;;  %v492_v1 = vadd.f32 %v491_v13, %v490_v58  ;;  %v3390_v14 = vld [vmem:[#allocation7 + $0x1b4] ss:$24 sps:$4 sm:$0xff]   ;;  %v3403_v22 = vld [vmem:[#allocation7 + $0x218] ss:$24 sps:$4 sm:$0xff]  }
  0x8d   :  { %3282 = vmatprep.subr.bf16.mxu1 %v3816_v0  ;;  %v563_v21 = vadd.f32 %v562_v17, %v491_v13  ;;  %v3385_v13 = vld [vmem:[#allocation7 + $0x188] ss:$24 sps:$4 sm:$0xff]   ;;  %v3402_v58 = vld [vmem:[#allocation7 + $0x214] ss:$24 sps:$4 sm:$0xff]  }
  0x8e   :  { %3265 = vmatpush3.bf16.msra.mxu0 %v3940_v3  ;;  %v494_v7 = vadd.f32 %v493_v4, %v492_v1  ;;  %v3394_v17 = vld [vmem:[#allocation7 + $0x1e0] ss:$24 sps:$4 sm:$0xff]  }
  0x8f   :  { %3266 = vmatprep.subr.bf16.mxu0 %v3816_v0  ;;  %v564_v24 = vadd.f32 %v563_v21, %v493_v4  ;;  %v3399_v4 = vld [vmem:[#allocation7 + $0x1ec] ss:$24 sps:$4 sm:$0xff]   ;;  %v3405_v21 = vld [vmem:[#allocation7 + $0x21c] ss:$24 sps:$4 sm:$0xff]   ;;  %v3406_v1 = vld [vmem:[#allocation7 + $0x240] ss:$24 sps:$4 sm:$0xff]  }
  0x90   :  { %3283 = vmatpush3.bf16.msra.mxu1 %v3934_v2 }
  0x91   :  { %3284 = vmatprep.subr.bf16.mxu1 %v3816_v0  ;;  %v566_v3 = vadd.f32 %v565_v62, %v564_v24  ;;  %v3400_v62 = vld [vmem:[#allocation7 + $0x210] ss:$24 sps:$4 sm:$0xff]   ;;  %v3408_v24 = vld [vmem:[#allocation7 + $0x244] ss:$24 sps:$4 sm:$0xff]  }
  0x92   :  { %3267 = vmatpush3.bf16.msra.mxu0 %v3948_v10  ;;  %v495_v10 = vmul.f32 0.04, %v494_v7  ;;  %v3415_v7 = vld [vmem:[#allocation7 + $0x278] ss:$24 sps:$4 sm:$0xff]  }
  0x93   :  { %3268 = vmatprep.subr.bf16.mxu0 %v3816_v0  ;;  %v568_v57 = vadd.f32 %v567_v43, %v566_v3  ;;  %v3411_v43 = vld [vmem:[#allocation7 + $0x24c] ss:$24 sps:$4 sm:$0xff]   ;;  %v3409_v3 = vld [vmem:[#allocation7 + $0x248] ss:$24 sps:$4 sm:$0xff]  }
  0x94   :  { %3285 = vmatpush3.bf16.msra.mxu1 %v3684_v15  ;;  %v3412_v15 = vld [vmem:[#allocation7 + $0x270] ss:$24 sps:$4 sm:$0xff]  }
  0x95   :  { %3286 = vmatprep.subr.bf16.mxu1 %v3816_v0  ;;  %v570_v2 = vadd.f32 %v569_v18, %v568_v57  ;;  %v3414_v18 = vld [vmem:[#allocation7 + $0x274] ss:$24 sps:$4 sm:$0xff]  }
  0x96   :  { %3269 = vmatpush3.bf16.msra.mxu0 %v3955_v16  ;;  %v496_v16 = vpack.c.bf16 %v495_v10, %v495_v10  ;;  %v3417_v57 = vld [vmem:[#allocation7 + $0x27c] ss:$24 sps:$4 sm:$0xff]   ;;  %v3421_v10 = vld [vmem:[#allocation7 + $0x2a8] ss:$24 sps:$4 sm:$0xff]  }
  0x97   :  { %3270 = vmatprep.subr.bf16.mxu0 %v3816_v0  ;;  %v571_v25 = vmul.f32 0.04, %v570_v2  ;;  %v3418_v2 = vld [vmem:[#allocation7 + $0x2a0] ss:$24 sps:$4 sm:$0xff]  }
  0x98   :  { %3287 = vmatpush3.bf16.msra.mxu1 %v3685_v8  ;;  %v3420_v8 = vld [vmem:[#allocation7 + $0x2a4] ss:$24 sps:$4 sm:$0xff]  }
  0x99   :  { %3288 = vmatprep.subr.bf16.mxu1 %v3816_v0 }
  0x9a   :  { %3271 = vmatpush3.bf16.msra.mxu0 %v3964_v31  ;;  %v572_v31 = vpack.c.bf16 %v571_v25, %v571_v25  ;;  %v3423_v25 = vld [vmem:[#allocation7 + $0x2ac] ss:$24 sps:$4 sm:$0xff]  }
  0x9b   :  { %3272 = vmatprep.subr.bf16.mxu0 %v3816_v0 }
  0x9c   :  { %3289 = vmatpush3.bf16.msra.mxu1 %v3686_v63  ;;  %v3426_v63 = vld [vmem:[#allocation7 + $0x2d4] ss:$24 sps:$4 sm:$0xff]  }
  0x9d   :  { %3290 = vmatprep.subr.bf16.mxu1 %v3816_v0 }
  0x9e   :  { %3273 = vmatpush3.bf16.msra.mxu0 %v3994_v55 }
  0x9f   :  { %3274 = vmatprep.subr.bf16.mxu0 %v3816_v0 }
  0xa0   :  { %3291 = vmatpush3.bf16.msra.mxu1 %v3687_v48  ;;  %v3424_v48 = vld [vmem:[#allocation7 + $0x2d0] ss:$24 sps:$4 sm:$0xff]  }
  0xa1   :  { %3292 = vmatprep.subr.bf16.mxu1 %v3816_v0 }
  0xa2   :  { %3275 = vmatpush3.bf16.msra.mxu0 %v4020_v20 }
  0xa3   :  { %1877 = vmatprep.subr.bf16.mxu0 %v3336_v11  ;;  %v3432_v11 = vld [vmem:[#allocation7 + $0x304] ss:$24 sps:$4 sm:$0xff]  }
  0xa4   :  { %3293 = vmatpush3.bf16.msra.mxu1 %v3994_v55  ;;  %v3351_v55 = vld [vmem:[#allocation7 + $0x6c] ss:$24 sps:$4 sm:$0xff]  }
  0xa5   :  { %3277 = vmatmul.mubr.bf16.vlgmr.msra.gmra.mrb[4].mxu0 %v496_v16  ;;  %3294 = vmatprep.subr.bf16.mxu1 %v3816_v0  ;;  %v3348_v0 = vld [vmem:[#allocation7 + $0x64] ss:$24 sps:$4 sm:$0xff]  }
  0xa6   :  { %1878 = vmatpush1.bf16.msra.mxu0 %v3334_v27  ;;  %v3429_v16 = vld [vmem:[#allocation7 + $0x2dc] ss:$24 sps:$4 sm:$0xff]  }
  0xa7   :  { %1879 = vmatprep.subr.bf16.mxu0 %v3342_v30 }
  0xa8   :  { %3295 = vmatpush3.bf16.msra.mxu1 %v4020_v20  ;;  %v3346_v20 = vld [vmem:[#allocation7 + $0x60] ss:$24 sps:$4 sm:$0xff]  }
  0xa9   :  { %1959 = vmatprep.subr.bf16.mxu1 %v3339_v53  ;;  %v3435_v53 = vld [vmem:[#allocation7 + $0x30c] ss:$24 sps:$4 sm:$0xff]  }
  0xaa   :  { %1880 = vmatpush1.bf16.msra.mxu0 %v3340_v38 }
  0xab   :  { %3297 = vmatmul.mubr.bf16.vlgmr.msra.gmra.mrb[4].mxu1 %v572_v31  ;;  %1881 = vmatprep.subr.bf16.mxu0 %v3348_v0  ;;  %v3427_v31 = vld [vmem:[#allocation7 + $0x2d8] ss:$24 sps:$4 sm:$0xff]  }
  0xac   :  { %1960 = vmatpush1.bf16.msra.mxu1 %v3337_v19 }
  0xad   :  { %1961 = vmatprep.subr.bf16.mxu1 %v3345_v32 }
  0xae   :  { %1882 = vmatpush1.bf16.msra.mxu0 %v3346_v20 }
  0xaf   :  { %1883 = vmatprep.subr.bf16.mxu0 %v3354_v42 }
  0xb0   :  { %1962 = vmatpush1.bf16.msra.mxu1 %v3343_v33 }
  0xb1   :  { %1963 = vmatprep.subr.bf16.mxu1 %v3351_v55 }
  0xb2   :  { %1884 = vmatpush1.bf16.msra.mxu0 %v3352_v28 }
  0xb3   :  { %1885 = vmatprep.subr.bf16.mxu0 %v3360_v54 }
  0xb4   :  { %1964 = vmatpush1.bf16.msra.mxu1 %v3349_v39 }
  0xb5   :  { %1965 = vmatprep.subr.bf16.mxu1 %v3357_v26 }
  0xb6   :  { %1886 = vmatpush1.bf16.msra.mxu0 %v3358_v50 }
  0xb7   :  { %1887 = vmatprep.subr.bf16.mxu0 %v3366_v51 }
  0xb8   :  { %1966 = vmatpush1.bf16.msra.mxu1 %v3355_v49 }
  0xb9   :  { %1967 = vmatprep.subr.bf16.mxu1 %v3363_v40 }
  0xba   :  { %1888 = vmatpush1.bf16.msra.mxu0 %v3364_v37 }
  0xbb   :  { %1889 = vmatprep.subr.bf16.mxu0 %v3372_v5 }
  0xbc   :  { %1968 = vmatpush1.bf16.msra.mxu1 %v3361_v60 }
  0xbd   :  { %1969 = vmatprep.subr.bf16.mxu1 %v3369_v35 }
  0xbe   :  { %1890 = vmatpush1.bf16.msra.mxu0 %v3370_v46 }
  0xbf   :  { %1891 = vmatprep.subr.bf16.mxu0 %v3378_v9 }
  0xc0   :  { %1970 = vmatpush1.bf16.msra.mxu1 %v3367_v36 }
  0xc1   :  { %1971 = vmatprep.subr.bf16.mxu1 %v3375_v47 }
  0xc2   :  { %1892 = vmatpush1.bf16.msra.mxu0 %v3376_v23 }
  0xc3   :  { %1893 = vmatprep.subr.bf16.mxu0 %v3384_v45 }
  0xc4   :  { %1972 = vmatpush1.bf16.msra.mxu1 %v3373_v52 }
  0xc5   :  { %1973 = vmatprep.subr.bf16.mxu1 %v3381_v61 }
  0xc6   :  { %1894 = vmatpush1.bf16.msra.mxu0 %v3382_v12 }
  0xc7   :  { %1895 = vmatprep.subr.bf16.mxu0 %v3390_v14 }
  0xc8   :  { %1974 = vmatpush1.bf16.msra.mxu1 %v3379_v44 }
  0xc9   :  { %1975 = vmatprep.subr.bf16.mxu1 %v3387_v6 }
  0xca   :  { %1896 = vmatpush1.bf16.msra.mxu0 %v3388_v41 }
  0xcb   :  { %1897 = vmatprep.subr.bf16.mxu0 %v3396_v34 }
  0xcc   :  { %1976 = vmatpush1.bf16.msra.mxu1 %v3385_v13 }
  0xcd   :  { %1977 = vmatprep.subr.bf16.mxu1 %v3393_v29 }
  0xce   :  { %1898 = vmatpush1.bf16.msra.mxu0 %v3394_v17 }
  0xcf   :  { %1899 = vmatprep.subr.bf16.mxu0 %v3402_v58 }
  0xd0   :  { %1978 = vmatpush1.bf16.msra.mxu1 %v3391_v59 }
  0xd1   :  { %1979 = vmatprep.subr.bf16.mxu1 %v3399_v4 }
  0xd2   :  { %1900 = vmatpush1.bf16.msra.mxu0 %v3400_v62 }
  0xd3   :  { %1901 = vmatprep.subr.bf16.mxu0 %v3408_v24 }
  0xd4   :  { %1980 = vmatpush1.bf16.msra.mxu1 %v3397_v56 }
  0xd5   :  { %1981 = vmatprep.subr.bf16.mxu1 %v3405_v21 }
  0xd6   :  { %1902 = vmatpush1.bf16.msra.mxu0 %v3406_v1 }
  0xd7   :  { %1903 = vmatprep.subr.bf16.mxu0 %v3414_v18 }
  0xd8   :  { %1982 = vmatpush1.bf16.msra.mxu1 %v3403_v22 }
  0xd9   :  { %1983 = vmatprep.subr.bf16.mxu1 %v3411_v43 }
  0xda   :  { %1904 = vmatpush1.bf16.msra.mxu0 %v3412_v15 }
  0xdb   :  { %1905 = vmatprep.subr.bf16.mxu0 %v3420_v8 }
  0xdc   :  { %1984 = vmatpush1.bf16.msra.mxu1 %v3409_v3 }
  0xdd   :  { %1985 = vmatprep.subr.bf16.mxu1 %v3417_v57 }
  0xde   :  { %1906 = vmatpush1.bf16.msra.mxu0 %v3418_v2 }
  0xdf   :  { %1907 = vmatprep.subr.bf16.mxu0 %v3426_v63 }
  0xe0   :  { %1986 = vmatpush1.bf16.msra.mxu1 %v3415_v7 }
  0xe1   :  { %1987 = vmatprep.subr.bf16.mxu1 %v3423_v25 }
  0xe2   :  { %1908 = vmatpush1.bf16.msra.mxu0 %v3424_v48 }
  0xe3   :  { %1918 = vmatprep.subr.bf16.mxu0 %v3432_v11 }
  0xe4   :  { %1988 = vmatpush1.bf16.msra.mxu1 %v3421_v10 }
  0xe5   :  { %1989 = vmatprep.subr.bf16.mxu1 %v3429_v16 }
  0xe8   :  { %1990 = vmatpush1.bf16.msra.mxu1 %v3427_v31 }
  0xe9   :  { %2000 = vmatprep.subr.bf16.mxu1 %v3435_v53 }
 0x158   :  { %v367_v27 = vpop.f32.mrb[0].mxu0 }
 0x159   :  { %v614_v19 = vsel %vm613_vm1, %v367_v27, 0.0  ;;  %v3238_v30 = vpop.f32.mrb[1].mxu0 }
 0x15a   :  { %v615_v32 = vrot.slane %v614_v19, 4  ;;  %v370_v38 = vpop.f32.mrb[2].mxu0 }
 0x15b   :  { %v3239_v33 = vpop.f32.mrb[3].mxu0 }
 0x15c   :  { %v616_v0 = vadd.f32 %v615_v32, %v614_v19 }
 0x15e   :  { %v617_v55 = vrot.slane %v616_v0, 2  ;;  %v449_v20 = vpop.f32.mrb[0].mxu1 }
 0x15f   :  { %v622_v39 = vsel %vm613_vm1, %v449_v20, 0.0  ;;  %v3258_v42 = vpop.f32.mrb[1].mxu1 }
 0x160   :  { %v618_v26 = vadd.f32 %v617_v55, %v616_v0  ;;  %v623_v28 = vrot.slane %v622_v39, 4  ;;  %v452_v49 = vpop.f32.mrb[2].mxu1 }
 0x161   :  { %v3259_v54 = vpop.f32.mrb[3].mxu1 }
 0x162   :  { %v624_v40 = vadd.f32 %v623_v28, %v622_v39  ;;  %v619_v50 = vrot.slane %v618_v26, 1 }
 0x164   :  { %v625_v60 = vrot.slane %v624_v40, 2  ;;  %v620_v35 = vadd.f32 %v619_v50, %v618_v26 }
 0x166   :  { %v626_v51 = vadd.f32 %v625_v60, %v624_v40 }
 0x168   :  { %v627_v37 = vrot.slane %v626_v51, 1 }
 0x16a   :  { %v628_v36 = vadd.f32 %v627_v37, %v626_v51 }
 0x16c   :  { %v629_v5 = vadd.f32 %v628_v36, %v620_v35 }
 0x178   :  { %v531_v47 = vpop.f32.mrb[4].mxu0 }
 0x179   :  { %v630_v46 = vsel %vm613_vm1, %v531_v47, 0.0  ;;  %v3278_v52 = vpop.f32.mrb[5].mxu0 }
 0x17a   :  { %v631_v9 = vrot.slane %v630_v46, 4  ;;  %v534_v61 = vpop.f32.mrb[6].mxu0 }
 0x17b   :  { %v3279_v23 = vpop.f32.mrb[7].mxu0 }
 0x17c   :  { %v632_v44 = vadd.f32 %v631_v9, %v630_v46  ;;  %v2875_v9 = vld [vmem:[%s4317_s2] ss:$0 sm:$0xff] }
 0x17e   :  { %v633_v45 = vrot.slane %v632_v44, 2  ;;  %v607_v12 = vpop.f32.mrb[4].mxu1 }
 0x17f   :  { %v638_v13 = vsel %vm613_vm1, %v607_v12, 0.0  ;;  %v3298_v14 = vpop.f32.mrb[5].mxu1 }
 0x180   :  { %v634_v6 = vadd.f32 %v633_v45, %v632_v44  ;;  %v639_v41 = vrot.slane %v638_v13, 4  ;;  %v610_v59 = vpop.f32.mrb[6].mxu1 }
 0x181   :  { %v3299_v34 = vpop.f32.mrb[7].mxu1 }
 0x182   :  { %v635_v29 = vrot.slane %v634_v6, 1  ;;  %v640_v17 = vadd.f32 %v639_v41, %v638_v13 }
 0x184   :  { %v636_v4 = vadd.f32 %v635_v29, %v634_v6  ;;  %v641_v58 = vrot.slane %v640_v17, 2  ;;  %v2876_v6 = vld [vmem:[%s4318_s3] ss:$0 sm:$0xff] }
 0x186   :  { %v637_v56 = vadd.f32 %v636_v4, %v629_v5  ;;  %v642_v21 = vadd.f32 %v641_v58, %v640_v17 }
 0x188   :  { %v643_v62 = vrot.slane %v642_v21, 1 }
 0x18a   :  { %v644_v22 = vadd.f32 %v643_v62, %v642_v21  ;;  %v3430_v62 = vld [vmem:[#allocation7 + $0x300] ss:$24 sps:$4 sm:$0xff]  }
 0x18c   :  { %v645_v24 = vadd.f32 %v644_v22, %v637_v56  ;;  %v3433_v22 = vld [vmem:[#allocation7 + $0x308] ss:$24 sps:$4 sm:$0xff]  }
 0x18e   :  { %v647_v43 = vmul.f32 0.125, %v645_v24 }
 0x190   :  { %v648_v1 = vsub.f32 %v367_v27, %v647_v43  ;;  %v658_v3 = vsub.f32 %v449_v20, %v647_v43  ;;  %v668_v18 = vsub.f32 %v531_v47, %v647_v43  ;;  %v678_v57 = vsub.f32 %v607_v12, %v647_v43  ;;  %v3438_v43 = vld [vmem:[#allocation7 + $0x334] ss:$24 sps:$4 sm:$0xff]  }
 0x192   :  { %v649_v15 = vmul.f32 %v648_v1, %v648_v1  ;;  %v659_v7 = vmul.f32 %v658_v3, %v658_v3  ;;  %v669_v2 = vmul.f32 %v668_v18, %v668_v18  ;;  %v679_v8 = vmul.f32 %v678_v57, %v678_v57 }
 0x194   :  { %v650_v10 = vsel %vm613_vm1, %v649_v15, 0.0  ;;  %v660_v25 = vsel %vm613_vm1, %v659_v7, 0.0  ;;  %v670_v63 = vsel %vm613_vm1, %v669_v2, 0.0  ;;  %v680_v16 = vsel %vm613_vm1, %v679_v8, 0.0  ;;  %v3444_v15 = vld [vmem:[#allocation7 + $0x364] ss:$24 sps:$4 sm:$0xff]  }
 0x195   :  { %v651_v48 = vrot.slane %v650_v10, 4  ;;  %v661_v31 = vrot.slane %v660_v25, 4  ;;  %v671_v11 = vrot.slane %v670_v63, 4  ;;  %v681_v53 = vrot.slane %v680_v16, 4  ;;  %v3447_v7 = vld [vmem:[#allocation7 + $0x36c] ss:$24 sps:$4 sm:$0xff]  }
 0x196   :  { %v3442_v2 = vld [vmem:[#allocation7 + $0x360] ss:$24 sps:$4 sm:$0xff]  }
 0x197   :  { %v652_v27 = vadd.f32 %v651_v48, %v650_v10  ;;  %v662_v19 = vadd.f32 %v661_v31, %v660_v25  ;;  %v672_v30 = vadd.f32 %v671_v11, %v670_v63  ;;  %v682_v32 = vadd.f32 %v681_v53, %v680_v16  ;;  %v3445_v8 = vld [vmem:[#allocation7 + $0x368] ss:$24 sps:$4 sm:$0xff]   ;;  %v3450_v10 = vld [vmem:[#allocation7 + $0x394] ss:$24 sps:$4 sm:$0xff]   ;;  %v3451_v16 = vld [vmem:[#allocation7 + $0x398] ss:$24 sps:$4 sm:$0xff]  }
 0x198   :  { %v3453_v25 = vld [vmem:[#allocation7 + $0x39c] ss:$24 sps:$4 sm:$0xff]   ;;  %v3448_v63 = vld [vmem:[#allocation7 + $0x390] ss:$24 sps:$4 sm:$0xff]   ;;  %v3459_v31 = vld [vmem:[#allocation7 + $0x3cc] ss:$24 sps:$4 sm:$0xff]  }
 0x199   :  { %v653_v38 = vrot.slane %v652_v27, 2  ;;  %v663_v33 = vrot.slane %v662_v19, 2  ;;  %v673_v0 = vrot.slane %v672_v30, 2  ;;  %v683_v55 = vrot.slane %v682_v32, 2  ;;  %v3456_v48 = vld [vmem:[#allocation7 + $0x3c4] ss:$24 sps:$4 sm:$0xff]  }
 0x19a   :  { %v3454_v11 = vld [vmem:[#allocation7 + $0x3c0] ss:$24 sps:$4 sm:$0xff]  }
 0x19b   :  { %v654_v20 = vadd.f32 %v653_v38, %v652_v27  ;;  %v664_v39 = vadd.f32 %v663_v33, %v662_v19  ;;  %v674_v42 = vadd.f32 %v673_v0, %v672_v30  ;;  %v684_v26 = vadd.f32 %v683_v55, %v682_v32  ;;  %v3457_v53 = vld [vmem:[#allocation7 + $0x3c8] ss:$24 sps:$4 sm:$0xff]   ;;  %v3462_v27 = vld [vmem:[#allocation7 + $0x3f4] ss:$24 sps:$4 sm:$0xff]   ;;  %v3463_v32 = vld [vmem:[#allocation7 + $0x3f8] ss:$24 sps:$4 sm:$0xff]  }
 0x19c   :  { %v3465_v19 = vld [vmem:[#allocation7 + $0x3fc] ss:$24 sps:$4 sm:$0xff]   ;;  %v3460_v30 = vld [vmem:[#allocation7 + $0x3f0] ss:$24 sps:$4 sm:$0xff]   ;;  %v3471_v33 = vld [vmem:[#allocation7 + $0x42c] ss:$24 sps:$4 sm:$0xff]  }
 0x19d   :  { %v655_v28 = vrot.slane %v654_v20, 1  ;;  %v665_v49 = vrot.slane %v664_v39, 1  ;;  %v675_v54 = vrot.slane %v674_v42, 1  ;;  %v685_v60 = vrot.slane %v684_v26, 1  ;;  %v3468_v38 = vld [vmem:[#allocation7 + $0x424] ss:$24 sps:$4 sm:$0xff]  }
 0x19e   :  { %v3466_v0 = vld [vmem:[#allocation7 + $0x420] ss:$24 sps:$4 sm:$0xff]  }
 0x19f   :  { %v656_v40 = vadd.f32 %v655_v28, %v654_v20  ;;  %v666_v50 = vadd.f32 %v665_v49, %v664_v39  ;;  %v676_v35 = vadd.f32 %v675_v54, %v674_v42  ;;  %v686_v36 = vadd.f32 %v685_v60, %v684_v26  ;;  %v3469_v55 = vld [vmem:[#allocation7 + $0x428] ss:$24 sps:$4 sm:$0xff]   ;;  %v3474_v20 = vld [vmem:[#allocation7 + $0x454] ss:$24 sps:$4 sm:$0xff]   ;;  %v3475_v26 = vld [vmem:[#allocation7 + $0x458] ss:$24 sps:$4 sm:$0xff]  }
 0x1a0   :  { %v3477_v39 = vld [vmem:[#allocation7 + $0x45c] ss:$24 sps:$4 sm:$0xff]   ;;  %v3472_v42 = vld [vmem:[#allocation7 + $0x450] ss:$24 sps:$4 sm:$0xff]   ;;  %v3483_v49 = vld [vmem:[#allocation7 + $0x48c] ss:$24 sps:$4 sm:$0xff]  }
 0x1a1   :  { %v667_v51 = vadd.f32 %v666_v50, %v656_v40  ;;  %v3480_v28 = vld [vmem:[#allocation7 + $0x484] ss:$24 sps:$4 sm:$0xff]   ;;  %v3478_v54 = vld [vmem:[#allocation7 + $0x480] ss:$24 sps:$4 sm:$0xff]   ;;  %v3486_v50 = vld [vmem:[#allocation7 + $0x4b4] ss:$24 sps:$4 sm:$0xff]  }
 0x1a2   :  { %v3481_v40 = vld [vmem:[#allocation7 + $0x488] ss:$24 sps:$4 sm:$0xff]   ;;  %v3489_v60 = vld [vmem:[#allocation7 + $0x4bc] ss:$24 sps:$4 sm:$0xff]  }
 0x1a3   :  { %v677_v37 = vadd.f32 %v676_v35, %v667_v51  ;;  %v3484_v51 = vld [vmem:[#allocation7 + $0x4b0] ss:$24 sps:$4 sm:$0xff]  }
 0x1a4   :  { %v3487_v35 = vld [vmem:[#allocation7 + $0x4b8] ss:$24 sps:$4 sm:$0xff]  }
 0x1a5   :  { %v687_v5 = vadd.f32 %v686_v36, %v677_v37  ;;  %v3492_v37 = vld [vmem:[#allocation7 + $0x4e4] ss:$24 sps:$4 sm:$0xff]  }
 0x1a6   :  { %v3495_v36 = vld [vmem:[#allocation7 + $0x4ec] ss:$24 sps:$4 sm:$0xff]  }
 0x1a7   :  { %v688_v47 = vmul.f32 0.125, %v687_v5  ;;  %v3490_v5 = vld [vmem:[#allocation7 + $0x4e0] ss:$24 sps:$4 sm:$0xff]  }
 0x1a9   :  { %v689_v46 = vadd.f32 1e-05, %v688_v47  ;;  %v3493_v47 = vld [vmem:[#allocation7 + $0x4e8] ss:$24 sps:$4 sm:$0xff]  }
 0x1ab   :  { %3670 = vrsqrt.f32 %v689_v46  ;;  %v3498_v46 = vld [vmem:[#allocation7 + $0x514] ss:$24 sps:$4 sm:$0xff]  }
 0x1b5   :  { %v3671_v52 = vpop.eup %3670 }
 0x1b6   :  { %v720_v61 = vmul.f32 %v3671_v52, %v678_v57  ;;  %v710_v23 = vmul.f32 %v3671_v52, %v658_v3  ;;  %v691_v44 = vmul.f32 %v3671_v52, %v648_v1  ;;  %v715_v45 = vmul.f32 %v3671_v52, %v668_v18  ;;  %v3441_v1 = vld [vmem:[#allocation7 + $0x33c] ss:$24 sps:$4 sm:$0xff]   ;;  %v3436_v18 = vld [vmem:[#allocation7 + $0x330] ss:$24 sps:$4 sm:$0xff]  }
 0x1b7   :  { %v3439_v57 = vld [vmem:[#allocation7 + $0x338] ss:$24 sps:$4 sm:$0xff]   ;;  %v3501_v52 = vld [vmem:[#allocation7 + $0x51c] ss:$24 sps:$4 sm:$0xff]  }
 0x1b8   :  { %v721_v12 = vmul.f32 %v2875_v9, %v720_v61  ;;  %v711_v13 = vmul.f32 %v2875_v9, %v710_v23  ;;  %v699_v14 = vmul.f32 %v2875_v9, %v691_v44  ;;  %v716_v29 = vmul.f32 %v2875_v9, %v715_v45  ;;  %v3496_v9 = vld [vmem:[#allocation7 + $0x510] ss:$24 sps:$4 sm:$0xff]   ;;  %v3504_v23 = vld [vmem:[#allocation7 + $0x544] ss:$24 sps:$4 sm:$0xff]   ;;  %v3502_v45 = vld [vmem:[#allocation7 + $0x540] ss:$24 sps:$4 sm:$0xff]  }
 0x1b9   :  { %v3499_v61 = vld [vmem:[#allocation7 + $0x518] ss:$24 sps:$4 sm:$0xff]   ;;  %v3507_v44 = vld [vmem:[#allocation7 + $0x54c] ss:$24 sps:$4 sm:$0xff]  }
 0x1ba   :  { %v712_v41 = vadd.f32 %v2876_v6, %v711_v13  ;;  %v707_v59 = vadd.f32 %v2876_v6, %v699_v14  ;;  %v722_v34 = vadd.f32 %v2876_v6, %v721_v12  ;;  %v4230_v4 = vadd.f32 %v2876_v6, %v716_v29  ;;  %v3505_v6 = vld [vmem:[#allocation7 + $0x548] ss:$24 sps:$4 sm:$0xff]   ;;  %v3510_v12 = vld [vmem:[#allocation7 + $0x574] ss:$24 sps:$4 sm:$0xff]   ;;  %v3511_v29 = vld [vmem:[#allocation7 + $0x578] ss:$24 sps:$4 sm:$0xff]  }
 0x1bb   :  { %v3513_v13 = vld [vmem:[#allocation7 + $0x57c] ss:$24 sps:$4 sm:$0xff]   ;;  %v3508_v14 = vld [vmem:[#allocation7 + $0x570] ss:$24 sps:$4 sm:$0xff]  }
 0x1bc   :  { %v713_v17 = vmax.f32 %v712_v41, 0.0  ;;  %v708_v56 = vmax.f32 %v707_v59, 0.0  ;;  %v723_v58 = vmax.f32 %v722_v34, 0.0  ;;  %v3516_v41 = vld [vmem:[#allocation7 + $0x5a4] ss:$24 sps:$4 sm:$0xff]  }
 0x1bd   :  { %v3519_v59 = vld [vmem:[#allocation7 + $0x5ac] ss:$24 sps:$4 sm:$0xff]   ;;  %v3514_v34 = vld [vmem:[#allocation7 + $0x5a0] ss:$24 sps:$4 sm:$0xff]  }
 0x1be   :  { %v4232_v21 = vpack.c.bf16 %v713_v17, %v713_v17  ;;  %v4234_v24 = vpack.c.bf16 %v708_v56, %v708_v56  ;;  %v4240_v3 = vpack.c.bf16 %v723_v58, %v723_v58  ;;  %v3517_v17 = vld [vmem:[#allocation7 + $0x5a8] ss:$24 sps:$4 sm:$0xff]   ;;  %v3522_v56 = vld [vmem:[#allocation7 + $0x5d4] ss:$24 sps:$4 sm:$0xff]  }
 0x1bf   :  { %v3525_v58 = vld [vmem:[#allocation7 + $0x5dc] ss:$24 sps:$4 sm:$0xff]  }
 0x1c0   :  { %1909 = vmatprep.mubr.bf16.mxu0 %v4232_v21  ;;  %1991 = vmatprep.mubr.bf16.mxu1 %v4232_v21 }
 0x1c1   :  { %1910 = vmatmul.mubr.bf16.vlgmr.msra.gmra.mrb[8].mxu0 %v4234_v24  ;;  %1992 = vmatmul.mubr.bf16.vlgmr.msra.gmra.mrb[8].mxu1 %v4234_v24 }
 0x1c2   :  { %1919 = vmatpush1.bf16.msra.mxu0 %v3430_v62  ;;  %2001 = vmatpush1.bf16.msra.mxu1 %v3433_v22  ;;  %v3520_v62 = vld [vmem:[#allocation7 + $0x5d0] ss:$24 sps:$4 sm:$0xff]  }
 0x1c3   :  { %1950 = vmatprep.mubr.bf16.mxu0 %v4240_v3  ;;  %2032 = vmatprep.mubr.bf16.mxu1 %v4240_v3  ;;  %v3523_v22 = vld [vmem:[#allocation7 + $0x5d8] ss:$24 sps:$4 sm:$0xff]  }
 0x1c4   :  { %1920 = vmatprep.subr.bf16.mxu0 %v3438_v43  ;;  %2002 = vmatprep.subr.bf16.mxu1 %v3441_v1  ;;  %v718_v43 = vmax.f32 %v4230_v4, 0.0  ;;  %v3528_v1 = vld [vmem:[#allocation7 + $0x14] ss:$24 sps:$4 sm:$0xff]   ;;  %v3532_v4 = vld [vmem:[#allocation7 + $0x70] ss:$24 sps:$4 sm:$0xff]  }
 0x1c6   :  { %1921 = vmatpush1.bf16.msra.mxu0 %v3436_v18  ;;  %2003 = vmatpush1.bf16.msra.mxu1 %v3439_v57  ;;  %v3526_v18 = vld [vmem:[#allocation7 + $0x10] ss:$24 sps:$4 sm:$0xff]   ;;  %v4245_v57 = vpack.c.bf16 %v718_v43, %v718_v43  ;;  %v3618_v43 = vld [vmem:[#allocation7 + $0x5b4] ss:$24 sps:$4 sm:$0xff]  }
 0x1c7   :  { %1922 = vmatprep.subr.bf16.mxu0 %v3444_v15  ;;  %2004 = vmatprep.subr.bf16.mxu1 %v3447_v7  ;;  %v3531_v15 = vld [vmem:[#allocation7 + $0x44] ss:$24 sps:$4 sm:$0xff]   ;;  %v3529_v7 = vld [vmem:[#allocation7 + $0x40] ss:$24 sps:$4 sm:$0xff]  }
 0x1ca   :  { %1923 = vmatpush1.bf16.msra.mxu0 %v3442_v2  ;;  %2005 = vmatpush1.bf16.msra.mxu1 %v3445_v8  ;;  %v3534_v2 = vld [vmem:[#allocation7 + $0x74] ss:$24 sps:$4 sm:$0xff]   ;;  %v3537_v8 = vld [vmem:[#allocation7 + $0xa4] ss:$24 sps:$4 sm:$0xff]  }
 0x1cb   :  { %1924 = vmatprep.subr.bf16.mxu0 %v3450_v10  ;;  %2006 = vmatprep.subr.bf16.mxu1 %v3453_v25  ;;  %v3535_v10 = vld [vmem:[#allocation7 + $0xa0] ss:$24 sps:$4 sm:$0xff]   ;;  %v3540_v25 = vld [vmem:[#allocation7 + $0xd4] ss:$24 sps:$4 sm:$0xff]  }
 0x1ce   :  { %1925 = vmatpush1.bf16.msra.mxu0 %v3448_v63  ;;  %2007 = vmatpush1.bf16.msra.mxu1 %v3451_v16  ;;  %v3538_v63 = vld [vmem:[#allocation7 + $0xd0] ss:$24 sps:$4 sm:$0xff]   ;;  %v3543_v16 = vld [vmem:[#allocation7 + $0x104] ss:$24 sps:$4 sm:$0xff]  }
 0x1cf   :  { %1926 = vmatprep.subr.bf16.mxu0 %v3456_v48  ;;  %2008 = vmatprep.subr.bf16.mxu1 %v3459_v31  ;;  %v3541_v48 = vld [vmem:[#allocation7 + $0x100] ss:$24 sps:$4 sm:$0xff]   ;;  %v3546_v31 = vld [vmem:[#allocation7 + $0x134] ss:$24 sps:$4 sm:$0xff]  }
 0x1d2   :  { %1927 = vmatpush1.bf16.msra.mxu0 %v3454_v11  ;;  %2009 = vmatpush1.bf16.msra.mxu1 %v3457_v53  ;;  %v3549_v11 = vld [vmem:[#allocation7 + $0x164] ss:$24 sps:$4 sm:$0xff]   ;;  %v3547_v53 = vld [vmem:[#allocation7 + $0x160] ss:$24 sps:$4 sm:$0xff]  }
 0x1d3   :  { %1928 = vmatprep.subr.bf16.mxu0 %v3462_v27  ;;  %2010 = vmatprep.subr.bf16.mxu1 %v3465_v19  ;;  %v3552_v27 = vld [vmem:[#allocation7 + $0x194] ss:$24 sps:$4 sm:$0xff]   ;;  %v3550_v19 = vld [vmem:[#allocation7 + $0x190] ss:$24 sps:$4 sm:$0xff]  }
 0x1d6   :  { %1929 = vmatpush1.bf16.msra.mxu0 %v3460_v30  ;;  %2011 = vmatpush1.bf16.msra.mxu1 %v3463_v32  ;;  %v3555_v30 = vld [vmem:[#allocation7 + $0x1c4] ss:$24 sps:$4 sm:$0xff]   ;;  %v3553_v32 = vld [vmem:[#allocation7 + $0x1c0] ss:$24 sps:$4 sm:$0xff]  }
 0x1d7   :  { %1930 = vmatprep.subr.bf16.mxu0 %v3468_v38  ;;  %2012 = vmatprep.subr.bf16.mxu1 %v3471_v33  ;;  %v3558_v38 = vld [vmem:[#allocation7 + $0x1f4] ss:$24 sps:$4 sm:$0xff]   ;;  %v3556_v33 = vld [vmem:[#allocation7 + $0x1f0] ss:$24 sps:$4 sm:$0xff]  }
 0x1da   :  { %1931 = vmatpush1.bf16.msra.mxu0 %v3466_v0  ;;  %2013 = vmatpush1.bf16.msra.mxu1 %v3469_v55  ;;  %v3561_v0 = vld [vmem:[#allocation7 + $0x224] ss:$24 sps:$4 sm:$0xff]   ;;  %v3559_v55 = vld [vmem:[#allocation7 + $0x220] ss:$24 sps:$4 sm:$0xff]  }
 0x1db   :  { %1932 = vmatprep.subr.bf16.mxu0 %v3474_v20  ;;  %2014 = vmatprep.subr.bf16.mxu1 %v3477_v39  ;;  %v3564_v20 = vld [vmem:[#allocation7 + $0x254] ss:$24 sps:$4 sm:$0xff]   ;;  %v3562_v39 = vld [vmem:[#allocation7 + $0x250] ss:$24 sps:$4 sm:$0xff]  }
 0x1de   :  { %1933 = vmatpush1.bf16.msra.mxu0 %v3472_v42  ;;  %2015 = vmatpush1.bf16.msra.mxu1 %v3475_v26  ;;  %v3567_v42 = vld [vmem:[#allocation7 + $0x284] ss:$24 sps:$4 sm:$0xff]   ;;  %v3565_v26 = vld [vmem:[#allocation7 + $0x280] ss:$24 sps:$4 sm:$0xff]  }
 0x1df   :  { %1934 = vmatprep.subr.bf16.mxu0 %v3480_v28  ;;  %2016 = vmatprep.subr.bf16.mxu1 %v3483_v49  ;;  %v3570_v28 = vld [vmem:[#allocation7 + $0x2b4] ss:$24 sps:$4 sm:$0xff]   ;;  %v3568_v49 = vld [vmem:[#allocation7 + $0x2b0] ss:$24 sps:$4 sm:$0xff]  }
 0x1e2   :  { %1935 = vmatpush1.bf16.msra.mxu0 %v3478_v54  ;;  %2017 = vmatpush1.bf16.msra.mxu1 %v3481_v40  ;;  %v3573_v54 = vld [vmem:[#allocation7 + $0x2e4] ss:$24 sps:$4 sm:$0xff]   ;;  %v3571_v40 = vld [vmem:[#allocation7 + $0x2e0] ss:$24 sps:$4 sm:$0xff]  }
 0x1e3   :  { %1936 = vmatprep.subr.bf16.mxu0 %v3486_v50  ;;  %2018 = vmatprep.subr.bf16.mxu1 %v3489_v60  ;;  %v3576_v50 = vld [vmem:[#allocation7 + $0x314] ss:$24 sps:$4 sm:$0xff]   ;;  %v3574_v60 = vld [vmem:[#allocation7 + $0x310] ss:$24 sps:$4 sm:$0xff]  }
 0x1e6   :  { %1937 = vmatpush1.bf16.msra.mxu0 %v3484_v51  ;;  %2019 = vmatpush1.bf16.msra.mxu1 %v3487_v35  ;;  %v3579_v51 = vld [vmem:[#allocation7 + $0x344] ss:$24 sps:$4 sm:$0xff]   ;;  %v3577_v35 = vld [vmem:[#allocation7 + $0x340] ss:$24 sps:$4 sm:$0xff]  }
 0x1e7   :  { %1938 = vmatprep.subr.bf16.mxu0 %v3492_v37  ;;  %2020 = vmatprep.subr.bf16.mxu1 %v3495_v36  ;;  %v3582_v37 = vld [vmem:[#allocation7 + $0x374] ss:$24 sps:$4 sm:$0xff]   ;;  %v3580_v36 = vld [vmem:[#allocation7 + $0x370] ss:$24 sps:$4 sm:$0xff]  }
 0x1ea   :  { %1939 = vmatpush1.bf16.msra.mxu0 %v3490_v5  ;;  %2021 = vmatpush1.bf16.msra.mxu1 %v3493_v47  ;;  %v3585_v5 = vld [vmem:[#allocation7 + $0x3a4] ss:$24 sps:$4 sm:$0xff]   ;;  %v3583_v47 = vld [vmem:[#allocation7 + $0x3a0] ss:$24 sps:$4 sm:$0xff]  }
 0x1eb   :  { %1940 = vmatprep.subr.bf16.mxu0 %v3498_v46  ;;  %2022 = vmatprep.subr.bf16.mxu1 %v3501_v52  ;;  %v3588_v46 = vld [vmem:[#allocation7 + $0x3d4] ss:$24 sps:$4 sm:$0xff]   ;;  %v3586_v52 = vld [vmem:[#allocation7 + $0x3d0] ss:$24 sps:$4 sm:$0xff]  }
 0x1ee   :  { %1941 = vmatpush1.bf16.msra.mxu0 %v3496_v9  ;;  %2023 = vmatpush1.bf16.msra.mxu1 %v3499_v61  ;;  %v3591_v9 = vld [vmem:[#allocation7 + $0x404] ss:$24 sps:$4 sm:$0xff]   ;;  %v3594_v61 = vld [vmem:[#allocation7 + $0x434] ss:$24 sps:$4 sm:$0xff]  }
 0x1ef   :  { %1942 = vmatprep.subr.bf16.mxu0 %v3504_v23  ;;  %2024 = vmatprep.subr.bf16.mxu1 %v3507_v44  ;;  %v3597_v23 = vld [vmem:[#allocation7 + $0x464] ss:$24 sps:$4 sm:$0xff]   ;;  %v3595_v44 = vld [vmem:[#allocation7 + $0x460] ss:$24 sps:$4 sm:$0xff]  }
 0x1f2   :  { %1943 = vmatpush1.bf16.msra.mxu0 %v3502_v45  ;;  %2025 = vmatpush1.bf16.msra.mxu1 %v3505_v6  ;;  %v3600_v45 = vld [vmem:[#allocation7 + $0x494] ss:$24 sps:$4 sm:$0xff]   ;;  %v3598_v6 = vld [vmem:[#allocation7 + $0x490] ss:$24 sps:$4 sm:$0xff]  }
 0x1f3   :  { %1944 = vmatprep.subr.bf16.mxu0 %v3510_v12  ;;  %2026 = vmatprep.subr.bf16.mxu1 %v3513_v13  ;;  %v3603_v12 = vld [vmem:[#allocation7 + $0x4c4] ss:$24 sps:$4 sm:$0xff]   ;;  %v3601_v13 = vld [vmem:[#allocation7 + $0x4c0] ss:$24 sps:$4 sm:$0xff]  }
 0x1f6   :  { %1945 = vmatpush1.bf16.msra.mxu0 %v3508_v14  ;;  %2027 = vmatpush1.bf16.msra.mxu1 %v3511_v29  ;;  %v3606_v14 = vld [vmem:[#allocation7 + $0x4f4] ss:$24 sps:$4 sm:$0xff]   ;;  %v3604_v29 = vld [vmem:[#allocation7 + $0x4f0] ss:$24 sps:$4 sm:$0xff]  }
 0x1f7   :  { %1946 = vmatprep.subr.bf16.mxu0 %v3516_v41  ;;  %2028 = vmatprep.subr.bf16.mxu1 %v3519_v59  ;;  %v3609_v41 = vld [vmem:[#allocation7 + $0x524] ss:$24 sps:$4 sm:$0xff]   ;;  %v3607_v59 = vld [vmem:[#allocation7 + $0x520] ss:$24 sps:$4 sm:$0xff]  }
 0x1fa   :  { %1947 = vmatpush1.bf16.msra.mxu0 %v3514_v34  ;;  %2029 = vmatpush1.bf16.msra.mxu1 %v3517_v17  ;;  %v3612_v34 = vld [vmem:[#allocation7 + $0x554] ss:$24 sps:$4 sm:$0xff]   ;;  %v3610_v17 = vld [vmem:[#allocation7 + $0x550] ss:$24 sps:$4 sm:$0xff]  }
 0x1fb   :  { %1948 = vmatprep.subr.bf16.mxu0 %v3522_v56  ;;  %2030 = vmatprep.subr.bf16.mxu1 %v3525_v58  ;;  %v3615_v56 = vld [vmem:[#allocation7 + $0x584] ss:$24 sps:$4 sm:$0xff]  }
 0x1fc   :  { %v3622_v58 = vld [vmem:[#allocation8 + $0x40] sm:$0xff]  }
 0x1fe   :  { %1949 = vmatpush1.bf16.msra.mxu0 %v3520_v62  ;;  %2031 = vmatpush1.bf16.msra.mxu1 %v3523_v22  ;;  %v3623_v62 = vld [vmem:[#allocation8] sm:$0xff]  }
 0x1ff   :  { %2041 = vmatprep.subr.bf16.mxu0 %v3528_v1  ;;  %3154 = vmatprep.subr.bf16.mxu1 %v3622_v58  ;;  %v3613_v22 = vld [vmem:[#allocation7 + $0x580] ss:$24 sps:$4 sm:$0xff]   ;;  %v3624_v1 = vld [vmem:[#allocation8 + $0x48] sm:$0xff]  }
 0x201   :  { %1951 = vmatmul.mubr.bf16.vlgmr.msra.gmra.mrb[8].mxu0 %v4245_v57  ;;  %2033 = vmatmul.mubr.bf16.vlgmr.msra.gmra.mrb[8].mxu1 %v4245_v57 }
 0x202   :  { %2042 = vmatpush1.bf16.msra.mxu0 %v3526_v18  ;;  %2073 = vmatprep.mubr.bf16.mxu0 %v4232_v21  ;;  %v3544_v21 = vld [vmem:[#allocation7 + $0x130] ss:$24 sps:$4 sm:$0xff]  }
 0x203   :  { %2043 = vmatprep.subr.bf16.mxu0 %v3531_v15  ;;  %3155 = vmatpush3.bf16.msra.mxu1 %v3623_v62  ;;  %v3625_v18 = vld [vmem:[#allocation8 + $0x8] sm:$0xff]  }
 0x204   :  { %3156 = vmatprep.subr.bf16.mxu1 %v3624_v1  ;;  %v3616_v15 = vld [vmem:[#allocation7 + $0x5b0] ss:$24 sps:$4 sm:$0xff]  }
 0x206   :  { %2044 = vmatpush1.bf16.msra.mxu0 %v3529_v7  ;;  %v3621_v7 = vld [vmem:[#allocation7 + $0x5e4] ss:$24 sps:$4 sm:$0xff]  }
 0x207   :  { %2045 = vmatprep.subr.bf16.mxu0 %v3534_v2  ;;  %3157 = vmatpush3.bf16.msra.mxu1 %v3625_v18  ;;  %v3626_v2 = vld [vmem:[#allocation8 + $0x50] sm:$0xff]  }
 0x208   :  { %3158 = vmatprep.subr.bf16.mxu1 %v3626_v2 }
 0x20a   :  { %2046 = vmatpush1.bf16.msra.mxu0 %v3532_v4  ;;  %v3627_v4 = vld [vmem:[#allocation8 + $0x10] sm:$0xff]  }
 0x20b   :  { %2047 = vmatprep.subr.bf16.mxu0 %v3537_v8  ;;  %v3619_v8 = vld [vmem:[#allocation7 + $0x5e0] ss:$24 sps:$4 sm:$0xff]   ;;  %3159 = vmatpush3.bf16.msra.mxu1 %v3627_v4 }
 0x20e   :  { %2048 = vmatpush1.bf16.msra.mxu0 %v3535_v10  ;;  %v3628_v10 = vld [vmem:[#allocation8 + $0x58] sm:$0xff]  }
 0x20f   :  { %2049 = vmatprep.subr.bf16.mxu0 %v3540_v25  ;;  %v3629_v25 = vld [vmem:[#allocation8 + $0x18] sm:$0xff]   ;;  %3160 = vmatprep.subr.bf16.mxu1 %v3628_v10 }
 0x210   :  { %3161 = vmatpush3.bf16.msra.mxu1 %v3629_v25 }
 0x212   :  { %2050 = vmatpush1.bf16.msra.mxu0 %v3538_v63  ;;  %v3630_v63 = vld [vmem:[#allocation8 + $0x60] sm:$0xff]  }
 0x213   :  { %2051 = vmatprep.subr.bf16.mxu0 %v3543_v16  ;;  %v3631_v16 = vld [vmem:[#allocation8 + $0x20] sm:$0xff]   ;;  %3162 = vmatprep.subr.bf16.mxu1 %v3630_v63 }
 0x214   :  { %3163 = vmatpush3.bf16.msra.mxu1 %v3631_v16 }
 0x216   :  { %2052 = vmatpush1.bf16.msra.mxu0 %v3541_v48  ;;  %v3632_v48 = vld [vmem:[#allocation8 + $0x68] sm:$0xff]  }
 0x217   :  { %2053 = vmatprep.subr.bf16.mxu0 %v3546_v31  ;;  %v3633_v31 = vld [vmem:[#allocation8 + $0x28] sm:$0xff]   ;;  %3164 = vmatprep.subr.bf16.mxu1 %v3632_v48 }
 0x218   :  { %3165 = vmatpush3.bf16.msra.mxu1 %v3633_v31 }
 0x21a   :  { %2054 = vmatpush1.bf16.msra.mxu0 %v3544_v21  ;;  %v3634_v21 = vld [vmem:[#allocation8 + $0x70] sm:$0xff]  }
 0x21b   :  { %2055 = vmatprep.subr.bf16.mxu0 %v3549_v11  ;;  %v3635_v11 = vld [vmem:[#allocation8 + $0x30] sm:$0xff]   ;;  %3166 = vmatprep.subr.bf16.mxu1 %v3634_v21 }
 0x21c   :  { %3167 = vmatpush3.bf16.msra.mxu1 %v3635_v11 }
 0x21e   :  { %2056 = vmatpush1.bf16.msra.mxu0 %v3547_v53  ;;  %v3636_v53 = vld [vmem:[#allocation8 + $0x78] sm:$0xff]  }
 0x21f   :  { %2057 = vmatprep.subr.bf16.mxu0 %v3552_v27  ;;  %v3637_v27 = vld [vmem:[#allocation8 + $0x38] sm:$0xff]   ;;  %3168 = vmatprep.subr.bf16.mxu1 %v3636_v53 }
 0x220   :  { %3169 = vmatpush3.bf16.msra.mxu1 %v3637_v27 }
 0x222   :  { %2058 = vmatpush1.bf16.msra.mxu0 %v3550_v19  ;;  %v3638_v19 = vld [vmem:[#allocation8 + $0xc0] sm:$0xff]  }
 0x223   :  { %2059 = vmatprep.subr.bf16.mxu0 %v3555_v30  ;;  %3176 = vmatprep.subr.bf16.mxu1 %v3638_v19 }
 0x226   :  { %2060 = vmatpush1.bf16.msra.mxu0 %v3553_v32 }
 0x227   :  { %2061 = vmatprep.subr.bf16.mxu0 %v3558_v38 }
 0x22a   :  { %2062 = vmatpush1.bf16.msra.mxu0 %v3556_v33 }
 0x22b   :  { %2063 = vmatprep.subr.bf16.mxu0 %v3561_v0 }
 0x22e   :  { %2064 = vmatpush1.bf16.msra.mxu0 %v3559_v55 }
 0x22f   :  { %2065 = vmatprep.subr.bf16.mxu0 %v3564_v20 }
 0x232   :  { %2066 = vmatpush1.bf16.msra.mxu0 %v3562_v39 }
 0x233   :  { %2067 = vmatprep.subr.bf16.mxu0 %v3567_v42 }
 0x236   :  { %2068 = vmatpush1.bf16.msra.mxu0 %v3565_v26 }
 0x237   :  { %2069 = vmatprep.subr.bf16.mxu0 %v3570_v28 }
 0x23a   :  { %2070 = vmatpush1.bf16.msra.mxu0 %v3568_v49 }
 0x23b   :  { %2071 = vmatprep.subr.bf16.mxu0 %v3573_v54 }
 0x23e   :  { %2072 = vmatpush1.bf16.msra.mxu0 %v3571_v40 }
 0x23f   :  { %2082 = vmatprep.subr.bf16.mxu0 %v3576_v50 }
 0x241   :  { %2074 = vmatmul.mubr.bf16.vlgmr.msra.gmra.mrb[12].mxu0 %v4234_v24  ;;  %v3589_v24 = vld [vmem:[#allocation7 + $0x400] ss:$24 sps:$4 sm:$0xff]  }
 0x242   :  { %2083 = vmatpush1.bf16.msra.mxu0 %v3574_v60  ;;  %2114 = vmatprep.mubr.bf16.mxu0 %v4240_v3  ;;  %v3592_v3 = vld [vmem:[#allocation7 + $0x430] ss:$24 sps:$4 sm:$0xff]  }
 0x243   :  { %2084 = vmatprep.subr.bf16.mxu0 %v3579_v51 }
 0x246   :  { %2085 = vmatpush1.bf16.msra.mxu0 %v3577_v35 }
 0x247   :  { %2086 = vmatprep.subr.bf16.mxu0 %v3582_v37 }
 0x24a   :  { %2087 = vmatpush1.bf16.msra.mxu0 %v3580_v36 }
 0x24b   :  { %2088 = vmatprep.subr.bf16.mxu0 %v3585_v5 }
 0x24e   :  { %2089 = vmatpush1.bf16.msra.mxu0 %v3583_v47 }
 0x24f   :  { %2090 = vmatprep.subr.bf16.mxu0 %v3588_v46 }
 0x252   :  { %2091 = vmatpush1.bf16.msra.mxu0 %v3586_v52 }
 0x253   :  { %2092 = vmatprep.subr.bf16.mxu0 %v3591_v9 }
 0x256   :  { %2093 = vmatpush1.bf16.msra.mxu0 %v3589_v24 }
 0x257   :  { %2094 = vmatprep.subr.bf16.mxu0 %v3594_v61 }
 0x25a   :  { %2095 = vmatpush1.bf16.msra.mxu0 %v3592_v3 }
 0x25b   :  { %2096 = vmatprep.subr.bf16.mxu0 %v3597_v23 }
 0x25e   :  { %2097 = vmatpush1.bf16.msra.mxu0 %v3595_v44 }
 0x25f   :  { %2098 = vmatprep.subr.bf16.mxu0 %v3600_v45 }
 0x262   :  { %2099 = vmatpush1.bf16.msra.mxu0 %v3598_v6 }
 0x263   :  { %2100 = vmatprep.subr.bf16.mxu0 %v3603_v12 }
 0x266   :  { %2101 = vmatpush1.bf16.msra.mxu0 %v3601_v13 }
 0x267   :  { %2102 = vmatprep.subr.bf16.mxu0 %v3606_v14 }
 0x26a   :  { %2103 = vmatpush1.bf16.msra.mxu0 %v3604_v29 }
 0x26b   :  { %2104 = vmatprep.subr.bf16.mxu0 %v3609_v41 }
 0x26e   :  { %2105 = vmatpush1.bf16.msra.mxu0 %v3607_v59 }
 0x26f   :  { %2106 = vmatprep.subr.bf16.mxu0 %v3612_v34 }
 0x272   :  { %2107 = vmatpush1.bf16.msra.mxu0 %v3610_v17 }
 0x273   :  { %2108 = vmatprep.subr.bf16.mxu0 %v3615_v56 }
 0x276   :  { %2109 = vmatpush1.bf16.msra.mxu0 %v3613_v22 }
 0x277   :  { %2110 = vmatprep.subr.bf16.mxu0 %v3618_v43 }
 0x27a   :  { %2111 = vmatpush1.bf16.msra.mxu0 %v3616_v15 }
 0x27b   :  { %2112 = vmatprep.subr.bf16.mxu0 %v3621_v7 }
 0x27e   :  { %2113 = vmatpush1.bf16.msra.mxu0 %v3619_v8 }
 0x281   :  { %2115 = vmatmul.mubr.bf16.vlgmr.msra.gmra.mrb[12].mxu0 %v4245_v57 }
 0x2d4   :  { %v1952_v30 = vpop.f32.mrb[8].mxu0  ;;  %v2034_v32 = vpop.f32.mrb[8].mxu1 }
 0x2d5   :  { %v2123_v57 = vsel %vm613_vm1, %v1952_v30, 0.0  ;;  %v2137_v38 = vsel %vm613_vm1, %v2034_v32, 0.0  ;;  %v1954_v33 = vpop.f32.mrb[9].mxu0  ;;  %v2036_v0 = vpop.f32.mrb[9].mxu1 }
 0x2d6   :  { %v2124_v55 = vrot.slane %v2123_v57, 4  ;;  %v2138_v20 = vrot.slane %v2137_v38, 4  ;;  %v2130_v39 = vsel %vm613_vm1, %v1954_v33, 0.0  ;;  %v2144_v42 = vsel %vm613_vm1, %v2036_v0, 0.0  ;;  %v1956_v26 = vpop.f32.mrb[10].mxu0  ;;  %v2038_v28 = vpop.f32.mrb[10].mxu1 }
 0x2d7   :  { %v2131_v49 = vrot.slane %v2130_v39, 4  ;;  %v2145_v54 = vrot.slane %v2144_v42, 4  ;;  %v1957_v40 = vpop.f32.mrb[11].mxu0  ;;  %v2039_v50 = vpop.f32.mrb[11].mxu1 }
 0x2d8   :  { %v2125_v60 = vadd.f32 %v2124_v55, %v2123_v57  ;;  %v2139_v51 = vadd.f32 %v2138_v20, %v2137_v38 }
 0x2d9   :  { %v2132_v35 = vadd.f32 %v2131_v49, %v2130_v39  ;;  %v2146_v37 = vadd.f32 %v2145_v54, %v2144_v42  ;;  %v2252_v39 = vlaneseq }
 0x2da   :  { %v2126_v36 = vrot.slane %v2125_v60, 2  ;;  %v2140_v5 = vrot.slane %v2139_v51, 2 }
 0x2db   :  { %v2133_v47 = vrot.slane %v2132_v35, 2  ;;  %v2147_v46 = vrot.slane %v2146_v37, 2  ;;  %v4265_v50 = vshrl.u32 %v2252_v39, 7  ;;  %v3652_v39 = vld [vmem:[#allocation8 + $0xf8] sm:$0xff]  }
 0x2dc   :  { %v2127_v52 = vadd.f32 %v2126_v36, %v2125_v60  ;;  %v2141_v9 = vadd.f32 %v2140_v5, %v2139_v51  ;;  %v4277_v5 = vld [vmem:[%s4321_s6] sm:$0x3f] }
 0x2dd   :  { %v2134_v24 = vadd.f32 %v2133_v47, %v2132_v35  ;;  %v2148_v61 = vadd.f32 %v2147_v46, %v2146_v37  ;;  %v2254_v51 = vsub.s32 0, %v4265_v50  ;;  %v4271_v37 = vld [vmem:[%s4320_s5] sm:$0x3f]  ;;  %v2258_v36 = vsub.s32 1, %v4265_v50 }
 0x2de   :  { %v2128_v3 = vrot.slane %v2127_v52, 1  ;;  %v2142_v23 = vrot.slane %v2141_v9, 1  ;;  %v2266_v47 = vsub.s32 3, %v4265_v50 }
 0x2df   :  { %v2135_v44 = vrot.slane %v2134_v24, 1  ;;  %v2149_v45 = vrot.slane %v2148_v61, 1  ;;  %v2255_v46 = vrot.slane %v4271_v37, %v2254_v51 }
 0x2e0   :  { %v2129_v6 = vadd.f32 %v2128_v3, %v2127_v52  ;;  %v2143_v12 = vadd.f32 %v2142_v23, %v2141_v9  ;;  %v2259_v3 = vrot.slane %v4271_v37, %v2258_v36 }
 0x2e1   :  { %v2136_v13 = vadd.f32 %v2135_v44, %v2134_v24  ;;  %v2150_v14 = vadd.f32 %v2149_v45, %v2148_v61  ;;  %v2293_v61 = vrot.slane %v4277_v5, %v2254_v51  ;;  %v2267_v44 = vrot.slane %v4271_v37, %v2266_v47  ;;  %v3659_v51 = vld [vmem:[#allocation8 + $0x110] sm:$0xff]  }
 0x2e2   :  { %v2166_v29 = vmul.f32 0.5, %v2129_v6  ;;  %v2168_v41 = vmul.f32 0.5, %v2143_v12 }
 0x2e3   :  { %v2167_v59 = vmul.f32 0.5, %v2136_v13  ;;  %v2169_v34 = vmul.f32 0.5, %v2150_v14  ;;  %v2297_v14 = vrot.slane %v4277_v5, %v2258_v36  ;;  %v3661_v36 = vld [vmem:[#allocation8 + $0x118] sm:$0xff]  }
 0x2e4   :  { %v2172_v17 = vsub.f32 %v1952_v30, %v2166_v29  ;;  %v4257_v22 = vsub.f32 %v2034_v32, %v2168_v41  ;;  %v2305_v41 = vrot.slane %v4277_v5, %v2266_v47  ;;  %v3662_v47 = vld [vmem:[#allocation8 + $0x160] sm:$0xff]  }
 0x2e5   :  { %v2173_v56 = vsub.f32 %v1954_v33, %v2167_v59  ;;  %v2175_v58 = vsub.f32 %v2036_v0, %v2169_v34 }
 0x2e6   :  { %v2178_v62 = vmul.f32 %v2172_v17, %v2172_v17  ;;  %v2180_v25 = vmul.f32 %v4257_v22, %v4257_v22 }
 0x2e7   :  { %v2179_v43 = vmul.f32 %v2173_v56, %v2173_v56  ;;  %v2181_v1 = vmul.f32 %v2175_v58, %v2175_v58 }
 0x2e8   :  { %v2184_v18 = vsel %vm613_vm1, %v2178_v62, 0.0  ;;  %v2198_v53 = vsel %vm613_vm1, %v2180_v25, 0.0  ;;  %v3640_v25 = vld [vmem:[#allocation8 + $0xc8] sm:$0xff]  }
 0x2e9   :  { %v2185_v15 = vrot.slane %v2184_v18, 4  ;;  %v2191_v7 = vsel %vm613_vm1, %v2179_v43, 0.0  ;;  %v2205_v2 = vsel %vm613_vm1, %v2181_v1, 0.0  ;;  %v2199_v32 = vrot.slane %v2198_v53, 4 }
 0x2ea   :  { %v2192_v4 = vrot.slane %v2191_v7, 4  ;;  %v2206_v8 = vrot.slane %v2205_v2, 4 }
 0x2eb   :  { %v2186_v10 = vadd.f32 %v2185_v15, %v2184_v18  ;;  %v2200_v42 = vadd.f32 %v2199_v32, %v2198_v53  ;;  %v3648_v32 = vld [vmem:[#allocation8 + $0xe8] sm:$0xff]  }
 0x2ec   :  { %v2193_v63 = vadd.f32 %v2192_v4, %v2191_v7  ;;  %v2207_v16 = vadd.f32 %v2206_v8, %v2205_v2  ;;  %v3639_v8 = vld [vmem:[#allocation8 + $0x80] sm:$0xff]  }
 0x2ed   :  { %v2187_v48 = vrot.slane %v2186_v10, 2  ;;  %v2201_v60 = vrot.slane %v2200_v42, 2 }
 0x2ee   :  { %v2194_v31 = vrot.slane %v2193_v63, 2  ;;  %v2208_v21 = vrot.slane %v2207_v16, 2 }
 0x2ef   :  { %v2188_v11 = vadd.f32 %v2187_v48, %v2186_v10  ;;  %v2202_v35 = vadd.f32 %v2201_v60, %v2200_v42  ;;  %v3644_v48 = vld [vmem:[#allocation8 + $0xd8] sm:$0xff]   ;;  %v3658_v60 = vld [vmem:[#allocation8 + $0x150] sm:$0xff]  }
 0x2f0   :  { %v2195_v27 = vadd.f32 %v2194_v31, %v2193_v63  ;;  %v2209_v19 = vadd.f32 %v2208_v21, %v2207_v16  ;;  %v3642_v63 = vld [vmem:[#allocation8 + $0xd0] sm:$0xff]   ;;  %v3645_v31 = vld [vmem:[#allocation8 + $0x98] sm:$0xff]   ;;  %v2262_v21 = vsub.s32 2, %v4265_v50 }
 0x2f1   :  { %v2189_v30 = vrot.slane %v2188_v11, 1  ;;  %v2203_v52 = vrot.slane %v2202_v35, 1  ;;  %v3643_v16 = vld [vmem:[#allocation8 + $0x90] sm:$0xff]   ;;  %v3653_v42 = vld [vmem:[#allocation8 + $0xb8] sm:$0xff]  }
 0x2f2   :  { %v2196_v57 = vrot.slane %v2195_v27, 1  ;;  %v2210_v38 = vrot.slane %v2209_v19, 1 }
 0x2f3   :  { %v2190_v33 = vadd.f32 %v2189_v30, %v2188_v11  ;;  %v2204_v12 = vadd.f32 %v2203_v52, %v2202_v35  ;;  %v3646_v11 = vld [vmem:[#allocation8 + $0xe0] sm:$0xff]   ;;  %v2263_v30 = vrot.slane %v4271_v37, %v2262_v21  ;;  %v3660_v35 = vld [vmem:[#allocation8 + $0x158] sm:$0xff]   ;;  %v3664_v52 = vld [vmem:[#allocation8 + $0x168] sm:$0xff]  }
 0x2f4   :  { %v2197_v0 = vadd.f32 %v2196_v57, %v2195_v27  ;;  %v2211_v55 = vadd.f32 %v2210_v38, %v2209_v19  ;;  %v3647_v27 = vld [vmem:[#allocation8 + $0xa0] sm:$0xff]   ;;  %v3649_v57 = vld [vmem:[#allocation8 + $0xa8] sm:$0xff]  }
 0x2f5   :  { %v2226_v20 = vmul.f32 0.5, %v2190_v33  ;;  %v2301_v33 = vrot.slane %v4277_v5, %v2262_v21 }
 0x2f6   :  { %v2227_v26 = vmul.f32 0.5, %v2197_v0  ;;  %v2229_v28 = vmul.f32 0.5, %v2211_v55  ;;  %v3650_v0 = vld [vmem:[#allocation8 + $0xf0] sm:$0xff]  }
 0x2f7   :  { %v2232_v49 = vadd.f32 1e-05, %v2226_v20  ;;  %v3651_v55 = vld [vmem:[#allocation8 + $0xb0] sm:$0xff]  }
 0x2f8   :  { %v2233_v54 = vadd.f32 1e-05, %v2227_v26  ;;  %v2235_v40 = vadd.f32 1e-05, %v2229_v28  ;;  %v3654_v26 = vld [vmem:[#allocation8 + $0x140] sm:$0xff]  }
 0x2f9   :  { %3672 = vrsqrt.f32 %v2232_v49  ;;  %v3655_v28 = vld [vmem:[#allocation8 + $0x100] sm:$0xff]  }
 0x2fa   :  { %3674 = vrsqrt.f32 %v2233_v54  ;;  %v3656_v54 = vld [vmem:[#allocation8 + $0x148] sm:$0xff]  }
 0x2fb   :  { %3676 = vrsqrt.f32 %v2235_v40  ;;  %v3657_v40 = vld [vmem:[#allocation8 + $0x108] sm:$0xff]  }
 0x303   :  { %v3673_v9 = vpop.eup %3672 }
 0x304   :  { %v2244_v24 = vmul.f32 %v3673_v9, %v2172_v17  ;;  %v3675_v23 = vpop.eup %3674  ;;  %v2228_v17 = vmul.f32 0.5, %v2204_v12  ;;  %v3665_v9 = vld [vmem:[#allocation8 + $0x128] sm:$0xff]  }
 0x305   :  { %v3677_v45 = vpop.eup %3676  ;;  %v2245_v13 = vmul.f32 %v3675_v23, %v2173_v56  ;;  %v3669_v23 = vld [vmem:[#allocation8 + $0x138] sm:$0xff]  }
 0x306   :  { %v2282_v6 = vmul.f32 %v2255_v46, %v2244_v24  ;;  %v2247_v29 = vmul.f32 %v3677_v45, %v2175_v58  ;;  %v2234_v2 = vadd.f32 1e-05, %v2228_v17  ;;  %v3641_v58 = vld [vmem:[#allocation8 + $0x88] sm:$0xff]   ;;  %v3663_v46 = vld [vmem:[#allocation8 + $0x120] sm:$0xff]   ;;  %v3666_v24 = vld [vmem:[#allocation8 + $0x170] sm:$0xff]  }
 0x307   :  { %v2283_v34 = vmul.f32 %v2259_v3, %v2245_v13  ;;  %v3668_v3 = vld [vmem:[#allocation8 + $0x178] sm:$0xff]  }
 0x308   :  { %v2320_v59 = vadd.f32 %v2293_v61, %v2282_v6  ;;  %v2285_v62 = vmul.f32 %v2267_v44, %v2247_v29  ;;  %3678 = vrsqrt.f32 %v2234_v2  ;;  %v3667_v61 = vld [vmem:[#allocation8 + $0x130] sm:$0xff]  }
 0x309   :  { %v2321_v43 = vadd.f32 %v2297_v14, %v2283_v34 }
 0x30a   :  { %v2326_v1 = vmax.f32 %v2320_v59, 0.0  ;;  %v2323_v18 = vadd.f32 %v2305_v41, %v2285_v62 }
 0x30b   :  { %v2327_v15 = vmax.f32 %v2321_v43, 0.0 }
 0x30c   :  { %v2329_v7 = vmax.f32 %v2323_v18, 0.0  ;;  %v2332_v10 = vpack.c.bf16 %v2326_v1, %v2326_v1 }
 0x30d   :  { %v2333_v4 = vpack.c.bf16 %v2327_v15, %v2327_v15 }
 0x30e   :  { %v2335_v56 = vpack.c.bf16 %v2329_v7, %v2329_v7 }
 0x30f   :  { %2761 = vmatprep.mubr.bf16.mxu1 %v2333_v4 }
 0x310   :  { %2762 = vmatmul.mubr.bf16.vlgmr.msra.gmra.mrb[12].mxu1 %v2332_v10 }
 0x311   :  { %3177 = vmatpush3.bf16.msra.mxu1 %v3639_v8  ;;  %2801 = vmatprep.mubr.bf16.mxu1 %v2335_v56 }
 0x312   :  { %3178 = vmatprep.subr.bf16.mxu1 %v3640_v25  ;;  %v3679_v53 = vpop.eup %3678 }
 0x313   :  { %v2246_v19 = vmul.f32 %v3679_v53, %v4257_v22 }
 0x315   :  { %3179 = vmatpush3.bf16.msra.mxu1 %v3641_v58  ;;  %v2284_v38 = vmul.f32 %v2263_v30, %v2246_v19 }
 0x316   :  { %3180 = vmatprep.subr.bf16.mxu1 %v3642_v63 }
 0x317   :  { %v2322_v20 = vadd.f32 %v2301_v33, %v2284_v38 }
 0x319   :  { %3181 = vmatpush3.bf16.msra.mxu1 %v3643_v16  ;;  %v2328_v22 = vmax.f32 %v2322_v20, 0.0 }
 0x31a   :  { %3182 = vmatprep.subr.bf16.mxu1 %v3644_v48 }
 0x31b   :  { %v2334_v49 = vpack.c.bf16 %v2328_v22, %v2328_v22  ;;  %v2274_v22 = vsub.s32 5, %v4265_v50 }
 0x31d   :  { %3183 = vmatpush3.bf16.msra.mxu1 %v3645_v31 }
 0x31e   :  { %3184 = vmatprep.subr.bf16.mxu1 %v3646_v11 }
 0x321   :  { %3185 = vmatpush3.bf16.msra.mxu1 %v3647_v27 }
 0x322   :  { %3186 = vmatprep.subr.bf16.mxu1 %v3648_v32 }
 0x325   :  { %3187 = vmatpush3.bf16.msra.mxu1 %v3649_v57 }
 0x326   :  { %3188 = vmatprep.subr.bf16.mxu1 %v3650_v0 }
 0x329   :  { %3189 = vmatpush3.bf16.msra.mxu1 %v3651_v55 }
 0x32a   :  { %3190 = vmatprep.subr.bf16.mxu1 %v3652_v39 }
 0x32d   :  { %3191 = vmatpush3.bf16.msra.mxu1 %v3653_v42  ;;  %v2270_v42 = vsub.s32 4, %v4265_v50 }
 0x32e   :  { %3198 = vmatprep.subr.bf16.mxu1 %v3654_v26 }
 0x32f   :  { %v2271_v26 = vrot.slane %v4271_v37, %v2270_v42 }
 0x330   :  { %2802 = vmatmul.mubr.bf16.vlgmr.msra.gmra.mrb[16].mxu1 %v2334_v49  ;;  %v2275_v49 = vrot.slane %v4271_v37, %v2274_v22 }
 0x331   :  { %3199 = vmatpush3.bf16.msra.mxu1 %v3655_v28 }
 0x332   :  { %3200 = vmatprep.subr.bf16.mxu1 %v3656_v54 }
 0x335   :  { %3201 = vmatpush3.bf16.msra.mxu1 %v3657_v40 }
 0x336   :  { %3202 = vmatprep.subr.bf16.mxu1 %v3658_v60  ;;  %v2309_v60 = vrot.slane %v4277_v5, %v2270_v42 }
 0x339   :  { %3203 = vmatpush3.bf16.msra.mxu1 %v3659_v51 }
 0x33a   :  { %3204 = vmatprep.subr.bf16.mxu1 %v3660_v35  ;;  %v2313_v35 = vrot.slane %v4277_v5, %v2274_v22 }
 0x33d   :  { %3205 = vmatpush3.bf16.msra.mxu1 %v3661_v36 }
 0x33e   :  { %3206 = vmatprep.subr.bf16.mxu1 %v3662_v47 }
 0x341   :  { %3207 = vmatpush3.bf16.msra.mxu1 %v3663_v46 }
 0x342   :  { %3208 = vmatprep.subr.bf16.mxu1 %v3664_v52 }
 0x345   :  { %3209 = vmatpush3.bf16.msra.mxu1 %v3665_v9 }
 0x346   :  { %3210 = vmatprep.subr.bf16.mxu1 %v3666_v24 }
 0x349   :  { %3211 = vmatpush3.bf16.msra.mxu1 %v3667_v61 }
 0x34a   :  { %3212 = vmatprep.subr.bf16.mxu1 %v3668_v3 }
 0x34d   :  { %3213 = vmatpush3.bf16.msra.mxu1 %v3669_v23 }
 0x354   :  { %v2116_v44 = vpop.f32.mrb[12].mxu0 }
 0x355   :  { %v2151_v45 = vsel %vm613_vm1, %v2116_v44, 0.0  ;;  %v2118_v6 = vpop.f32.mrb[13].mxu0 }
 0x356   :  { %v2152_v12 = vrot.slane %v2151_v45, 4  ;;  %v2158_v13 = vsel %vm613_vm1, %v2118_v6, 0.0  ;;  %v2120_v14 = vpop.f32.mrb[14].mxu0 }
 0x357   :  { %v2159_v29 = vrot.slane %v2158_v13, 4  ;;  %v2121_v41 = vpop.f32.mrb[15].mxu0 }
 0x358   :  { %v2153_v59 = vadd.f32 %v2152_v12, %v2151_v45 }
 0x359   :  { %v2160_v34 = vadd.f32 %v2159_v29, %v2158_v13 }
 0x35a   :  { %v2154_v62 = vrot.slane %v2153_v59, 2 }
 0x35b   :  { %v2161_v17 = vrot.slane %v2160_v34, 2 }
 0x35c   :  { %v2155_v43 = vadd.f32 %v2154_v62, %v2153_v59 }
 0x35d   :  { %v2162_v1 = vadd.f32 %v2161_v17, %v2160_v34 }
 0x35e   :  { %v2156_v18 = vrot.slane %v2155_v43, 1 }
 0x35f   :  { %v2163_v15 = vrot.slane %v2162_v1, 1 }
 0x360   :  { %v2157_v7 = vadd.f32 %v2156_v18, %v2155_v43 }
 0x361   :  { %v2164_v2 = vadd.f32 %v2163_v15, %v2162_v1 }
 0x362   :  { %v2170_v4 = vmul.f32 0.5, %v2157_v7 }
 0x363   :  { %v2171_v8 = vmul.f32 0.5, %v2164_v2 }
 0x364   :  { %v2176_v10 = vsub.f32 %v2116_v44, %v2170_v4 }
 0x365   :  { %v2177_v25 = vsub.f32 %v2118_v6, %v2171_v8  ;;  %v3069_v6 = vld [vmem:[%s4323_s8] ss:$0 sm:$0xff] }
 0x366   :  { %v2182_v56 = vmul.f32 %v2176_v10, %v2176_v10 }
 0x367   :  { %v2183_v58 = vmul.f32 %v2177_v25, %v2177_v25 }
 0x368   :  { %v2212_v63 = vsel %vm613_vm1, %v2182_v56, 0.0 }
 0x369   :  { %v2213_v16 = vrot.slane %v2212_v63, 4  ;;  %v2219_v48 = vsel %vm613_vm1, %v2183_v58, 0.0 }
 0x36a   :  { %v2220_v31 = vrot.slane %v2219_v48, 4 }
 0x36b   :  { %v2214_v21 = vadd.f32 %v2213_v16, %v2212_v63 }
 0x36c   :  { %v2221_v11 = vadd.f32 %v2220_v31, %v2219_v48 }
 0x36d   :  { %v2215_v53 = vrot.slane %v2214_v21, 2 }
 0x36e   :  { %v2222_v27 = vrot.slane %v2221_v11, 2 }
 0x36f   :  { %v2216_v19 = vadd.f32 %v2215_v53, %v2214_v21 }
 0x370   :  { %v2223_v30 = vadd.f32 %v2222_v27, %v2221_v11 }
 0x371   :  { %v2217_v32 = vrot.slane %v2216_v19, 1 }
 0x372   :  { %v2224_v57 = vrot.slane %v2223_v30, 1 }
 0x373   :  { %v2218_v38 = vadd.f32 %v2217_v32, %v2216_v19 }
 0x374   :  { %v2225_v33 = vadd.f32 %v2224_v57, %v2223_v30 }
 0x375   :  { %v2230_v0 = vmul.f32 0.5, %v2218_v38 }
 0x376   :  { %v2231_v55 = vmul.f32 0.5, %v2225_v33 }
 0x377   :  { %v2236_v20 = vadd.f32 1e-05, %v2230_v0 }
 0x378   :  { %v2237_v39 = vadd.f32 1e-05, %v2231_v55 }
 0x379   :  { %3680 = vrsqrt.f32 %v2236_v20 }
 0x37a   :  { %3682 = vrsqrt.f32 %v2237_v39 }
 0x383   :  { %v3681_v28 = vpop.eup %3680 }
 0x384   :  { %v3683_v54 = vpop.eup %3682  ;;  %v2248_v40 = vmul.f32 %v3681_v28, %v2176_v10 }
 0x385   :  { %v2249_v51 = vmul.f32 %v3683_v54, %v2177_v25 }
 0x386   :  { %v2286_v36 = vmul.f32 %v2271_v26, %v2248_v40 }
 0x387   :  { %v2287_v47 = vmul.f32 %v2275_v49, %v2249_v51 }
 0x388   :  { %v2324_v46 = vadd.f32 %v2309_v60, %v2286_v36 }
 0x389   :  { %v2325_v52 = vadd.f32 %v2313_v35, %v2287_v47 }
 0x38a   :  { %v2330_v9 = vmax.f32 %v2324_v46, 0.0 }
 0x38b   :  { %v2331_v24 = vmax.f32 %v2325_v52, 0.0 }
 0x38c   :  { %v2336_v50 = vpack.c.bf16 %v2330_v9, %v2330_v9 }
 0x38d   :  { %v2337_v61 = vpack.c.bf16 %v2331_v24, %v2331_v24 }
 0x38f   :  { %2841 = vmatprep.mubr.bf16.mxu1 %v2337_v61 }
 0x390   :  { %2842 = vmatmul.mubr.bf16.vlgmr.msra.gmra.mrb[20].mxu1 %v2336_v50 }
 0x3e3   :  { %v3170_v3 = vpop.f32.mrb[12].mxu1 }
 0x3e4   :  { %v3171_v23 = vpop.f32.mrb[13].mxu1 }
 0x3e5   :  { %v3172_v37 = vadd.f32 %v3171_v23, %v3170_v3  ;;  %v3173_v44 = vpop.f32.mrb[14].mxu1 }
 0x3e6   :  { %v3174_v45 = vpop.f32.mrb[15].mxu1 }
 0x3e7   :  { %v2764_v13 = vadd.f32 %v3172_v37, %v3069_v6 }
 0x403   :  { %v3192_v5 = vpop.f32.mrb[16].mxu1 }
 0x404   :  { %v3193_v12 = vpop.f32.mrb[17].mxu1 }
 0x405   :  { %v3194_v14 = vadd.f32 %v3193_v12, %v3192_v5  ;;  %v3195_v29 = vpop.f32.mrb[18].mxu1 }
 0x406   :  { %v3196_v41 = vpop.f32.mrb[19].mxu1 }
 0x407   :  { %v2804_v59 = vadd.f32 %v3194_v14, %v2764_v13 }
 0x463   :  { %v3214_v34 = vpop.f32.mrb[20].mxu1 }
 0x464   :  { %v3215_v62 = vpop.f32.mrb[21].mxu1 }
 0x465   :  { %v3216_v17 = vadd.f32 %v3215_v62, %v3214_v34  ;;  %v3217_v43 = vpop.f32.mrb[22].mxu1 }
 0x466   :  { %v3218_v1 = vpop.f32.mrb[23].mxu1 }
 0x467   :  { %v2844_v18 = vadd.f32 %v3216_v17, %v2804_v59 }
 0x469   :  { %2849 = vst [vmem:[#allocation10] sm:$0x3] %v2844_v18 }
 0x46a   :  { %3787 = shalt.err (!%p3784_p8)
}
 0x46b   :  { %s3788_s24 = scalar_lea.hbm %s4324_s9, 32 }
 0x46c   :  { %p3789_p9 = scmp.ne.s32.totalorder %s4324_s9, %s3788_s24  ;;  %p3792_p10 = scmp.lt.u32.totalorder %s3788_s24, %s4324_s9 }
 0x46e   :  { %p3794_p11 = pnand %p3792_p10, %p3789_p9 }
 0x470   :  { %3797 = shalt.err (!%p3794_p11)
}
 0x471   :  { %2859 = dma.vmem_to_hbm [thread:$0]  %s2857_s26, 32, %s4324_s9, [#allocation4]  }
 0x472   :  { %3804 = dma.done.wait [#allocation4], 32  }
 0x473   :  { %3805 = vsyncadd [#allocation4], 4294967264 }
 0x474   :  { %2863 = vsyncpa [#allocation3], 1 }
 0x475   :  { %2864 = vsyncpa [#allocation6], 1 }
 0x476   :  { %2865 = vsyncpa [#allocation9], 1 }
 0x477   :  { %2866 = vsyncpa [#allocation4], 1 }

</bundles_post_ra>
